<compile_context>
chip_gen: v5e
topology: v5e:2x2
jax: 0.10.0
libtpu: 0.0.40
codegen_flags: <defaults>
</compile_context>

<pallas_src>
import jax
import jax.numpy as jnp
from jax import lax
from jax.experimental import pallas as pl
from jax.experimental.pallas import tpu as pltpu


# ----------------------------------------------------------------------------
# LSTM cell helpers (gate order [i, f, o, g] in every packed (., 4H) weight)
# ----------------------------------------------------------------------------
def _lstm_gates(g, c, hh):
    """g: (B, 4H) pre-activations in [i, f, o, g] order."""
    s = jax.nn.sigmoid(g[:, :3 * hh])          # one EUP slab for i|f|o
    i_g = s[:, 0 * hh:1 * hh]
    f_g = s[:, 1 * hh:2 * hh]
    o_g = s[:, 2 * hh:3 * hh]
    g_g = jnp.tanh(g[:, 3 * hh:4 * hh])        # one tanh slab
    c_new = f_g * c + i_g * g_g
    h_new = o_g * jnp.tanh(c_new)
    return h_new, c_new


def _cell_fused(x_t, h, c, w, bb, hh):
    """One LSTM cell with a single fused [x_t, h] @ [Wih; Whh] matmul.
    w: (Dx+H, 4H), bb: bias pre-broadcast to (B, 4H)."""
    xh = jnp.concatenate([x_t, h], axis=-1)
    g = jnp.dot(xh, w, preferred_element_type=jnp.float32) + bb
    return _lstm_gates(g, c, hh)


def _cell_hoisted(xw, h, c, whh, hh):
    """LSTM cell whose input projection (x @ Wih + b) is loop-invariant."""
    g = xw + jnp.dot(h, whh, preferred_element_type=jnp.float32)
    return _lstm_gates(g, c, hh)


# ----------------------------------------------------------------------------
# Kernel 1: frozen encoder + z heads + re-parameterization
# ----------------------------------------------------------------------------
def _encoder_kernel(x_ref, w1_ref, b1_ref, w2_ref, b2_ref,
                    wh_ref, bh_ref, eps_ref, z_ref):
    """x: (T, B, F) time-major.  Emits z = mean + exp(log/2)*eps, shape (B, L).

    w1: (F+H, 4H), w2: (2H, 4H)   -- fused [Wih; Whh], gates [i,f,o,g]
    wh: (H, 2L) = [z_mean | z_sigma] heads fused, bh: (1, 2L)
    """
    T, B, _ = x_ref.shape
    H = w2_ref.shape[0] // 2
    L = z_ref.shape[1]

    w1 = w1_ref[...]
    w2 = w2_ref[...]
    b1 = jnp.broadcast_to(b1_ref[...], (B, 4 * H))   # broadcast hoisted once
    b2 = jnp.broadcast_to(b2_ref[...], (B, 4 * H))

    def body(t, carry):
        h1, c1, h2, c2 = carry
        x_t = x_ref[t]                                   # (B, F)
        h1, c1 = _cell_fused(x_t, h1, c1, w1, b1, H)     # layer 1
        h2, c2 = _cell_fused(h1, h2, c2, w2, b2, H)      # layer 2
        return (h1, c1, h2, c2)

    z0 = jnp.zeros((B, H), jnp.float32)
    _, _, h2, _ = lax.fori_loop(0, T, body, (z0, z0, z0, z0), unroll=True)

    enc_last = jnp.tanh(h2)                              # == tanh(encode_h)[:, -1, :]
    heads = jnp.maximum(                                 # ReLU([z_mean | z_log])
        jnp.dot(enc_last, wh_ref[...], preferred_element_type=jnp.float32)
        + bh_ref[...], 0.0)
    mean = heads[:, :L]
    logv = heads[:, L:2 * L]
    z_ref[...] = mean + jnp.exp(logv * 0.5) * eps_ref[...]   # re-parameterization


def encode_sample(x_tbf, p, eps):
    """x_tbf: (T, B, F) -> z: (B, L)."""
    T, B, F = x_tbf.shape
    L = p["wh"].shape[1] // 2
    full = lambda s: pl.BlockSpec(s, lambda i, _s=s: (0,) * len(_s))
    return pl.pallas_call(
        _encoder_kernel,
        out_shape=jax.ShapeDtypeStruct((B, L), jnp.float32),
        grid=(1,),
        in_specs=[full((T, B, F)),
                  full(p["w1"].shape), full(p["b1"].shape),
                  full(p["w2"].shape), full(p["b2"].shape),
                  full(p["wh"].shape), full(p["bh"].shape),
                  full((B, L))],
        out_specs=full((B, L)),
        compiler_params=pltpu.CompilerParams(
            dimension_semantics=("arbitrary",)),
    )(x_tbf, p["w1"], p["b1"], p["w2"], p["b2"], p["wh"], p["bh"], eps)


# ----------------------------------------------------------------------------
# Kernel 2: decoder branch (hidden-LSTM + shared output-LSTM fused),
#           grid=(2,) over the lo / hi branches
# ----------------------------------------------------------------------------
def _decoder_kernel(z_ref, wih1_ref, whh1_ref, b1_ref, w2_ref, b2_ref,
                    w3_ref, b3_ref, w4_ref, b4_ref, out_ref):
    """z: (B, L).  Per-branch hidden-LSTM weights (leading branch dim squeezed
    by BlockSpec); shared output-LSTM weights.  out: (T, B, I) = tanh(x_hat).
    """
    T, B, I = out_ref.shape
    H = whh1_ref.shape[0]

    whh1 = whh1_ref[...]
    w2 = w2_ref[...]
    w3 = w3_ref[...]
    w4 = w4_ref[...]
    b2 = jnp.broadcast_to(b2_ref[...], (B, 4 * H))
    b3 = jnp.broadcast_to(b3_ref[...], (B, 4 * I))
    b4 = jnp.broadcast_to(b4_ref[...], (B, 4 * I))

    # repeated_z is constant over time -> hoist z @ Wih1 + b1 out of the loop.
    xw1 = (jnp.dot(z_ref[...], wih1_ref[...], preferred_element_type=jnp.float32)
           + jnp.broadcast_to(b1_ref[...], (B, 4 * H)))

    def body(t, carry):
        h1, c1, h2, c2, h3, c3, h4, c4 = carry
        h1, c1 = _cell_hoisted(xw1, h1, c1, whh1, H)     # hidden-LSTM layer 1
        h2, c2 = _cell_fused(h1, h2, c2, w2, b2, H)      # hidden-LSTM layer 2
        d = jnp.tanh(h2)                                 # tanh(decode_h)
        h3, c3 = _cell_fused(d, h3, c3, w3, b3, I)       # output-LSTM layer 1
        h4, c4 = _cell_fused(h3, h4, c4, w4, b4, I)      # output-LSTM layer 2
        out_ref[t] = jnp.tanh(h4)                        # tanh(x_hat)
        return (h1, c1, h2, c2, h3, c3, h4, c4)

    zh = jnp.zeros((B, H), jnp.float32)
    zi = jnp.zeros((B, I), jnp.float32)
    lax.fori_loop(0, T, body, (zh, zh, zh, zh, zi, zi, zi, zi), unroll=True)


def decode_branches(z, hid, outw, T):
    """hid: per-branch hidden-LSTM params stacked on a leading axis of 2
    (index 0 = lo, 1 = hi); outw: SHARED output-LSTM params (output_LSTM_lo,
    reproducing the upstream module's reuse).  Returns (2, T, B, I)."""
    B, L = z.shape
    I = outw["w4"].shape[1] // 4

    def shared(s):
        return pl.BlockSpec(s, lambda i, _n=len(s): (0,) * _n)

    def branch(s):
        return pl.BlockSpec((None,) + tuple(s[1:]),
                            lambda i, _n=len(s): (i,) + (0,) * (_n - 1))

    return pl.pallas_call(
        _decoder_kernel,
        out_shape=jax.ShapeDtypeStruct((2, T, B, I), jnp.float32),
        grid=(2,),
        in_specs=[shared((B, L)),
                  branch(hid["wih1"].shape), branch(hid["whh1"].shape),
                  branch(hid["b1"].shape),
                  branch(hid["w2"].shape), branch(hid["b2"].shape),
                  shared(outw["w3"].shape), shared(outw["b3"].shape),
                  shared(outw["w4"].shape), shared(outw["b4"].shape)],
        out_specs=pl.BlockSpec((None, T, B, I), lambda i: (i, 0, 0, 0)),
        compiler_params=pltpu.CompilerParams(
            dimension_semantics=("parallel",)),     # 2 TCs on v7x
    )(z, hid["wih1"], hid["whh1"], hid["b1"], hid["w2"], hid["b2"],
      outw["w3"], outw["b3"], outw["w4"], outw["b4"])


# ----------------------------------------------------------------------------
# Parameter init (PyTorch-like uniform(-1/sqrt(H), 1/sqrt(H)); gate order
# repacked to [i, f, o, g]; b_ih + b_hh pre-summed; Wih/Whh stacked as (D+H,4H))
# ----------------------------------------------------------------------------
def _uniform(key, shape, scale):
    return jax.random.uniform(key, shape, jnp.float32, -scale, scale)


def _init_lstm_layer(key, d_in, h):
    k1, k2, k3, k4 = jax.random.split(key, 4)
    s = 1.0 / float(h) ** 0.5
    wih = _uniform(k1, (d_in, 4 * h), s)
    whh = _uniform(k2, (h, 4 * h), s)
    b = _uniform(k3, (1, 4 * h), s) + _uniform(k4, (1, 4 * h), s)
    return wih, whh, b


def init_encoder_params(k_lstm, k_heads, f, h, latent):
    k1, k2 = jax.random.split(k_lstm)
    wih1, whh1, b1 = _init_lstm_layer(k1, f, h)
    wih2, whh2, b2 = _init_lstm_layer(k2, h, h)
    km1, km2, ks1, ks2 = jax.random.split(k_heads, 4)
    s = 1.0 / float(h) ** 0.5
    wm, bm = _uniform(km1, (h, latent), s), _uniform(km2, (1, latent), s)
    ws, bs = _uniform(ks1, (h, latent), s), _uniform(ks2, (1, latent), s)
    return dict(
        w1=jnp.concatenate([wih1, whh1], axis=0), b1=b1,
        w2=jnp.concatenate([wih2, whh2], axis=0), b2=b2,
        wh=jnp.concatenate([wm, ws], axis=1),      # fused z_mean | z_sigma head
        bh=jnp.concatenate([bm, bs], axis=1))


def init_hidden_params(key, latent, h):
    k1, k2 = jax.random.split(key)
    wih1, whh1, b1 = _init_lstm_layer(k1, latent, h)   # layer 1 kept split (hoisted)
    wih2, whh2, b2 = _init_lstm_layer(k2, h, h)
    return dict(wih1=wih1, whh1=whh1, b1=b1,
                w2=jnp.concatenate([wih2, whh2], axis=0), b2=b2)


def init_output_params(key, h, out):
    k1, k2 = jax.random.split(key)
    wih1, whh1, b1 = _init_lstm_layer(k1, h, out)
    wih2, whh2, b2 = _init_lstm_layer(k2, out, out)
    return dict(w3=jnp.concatenate([wih1, whh1], axis=0), b3=b1,
                w4=jnp.concatenate([wih2, whh2], axis=0), b4=b2)


def stack_branches(lo, hi):
    return {k: jnp.stack([lo[k], hi[k]], axis=0) for k in lo}


# ----------------------------------------------------------------------------
# DivLstmVAE forward
# ----------------------------------------------------------------------------
def div_lstm_vae_forward(x, params, noise_key):
    """x: (B, T, input_size) batch-first, like the PyTorch module."""
    B, T, _ = x.shape
    L = params["encoder"]["wh"].shape[1] // 2

    # ---- frozen LSTMVAE encoder (torch.no_grad() block) + re-parameterization
    x_sel = jnp.take(x, params["random_samples"], axis=2)    # feature bagging
    x_tbf = jnp.transpose(x_sel, (1, 0, 2))                  # time-major (T,B,F)
    eps = jax.random.normal(noise_key, (B, L), jnp.float32)
    z = encode_sample(x_tbf, params["encoder"], eps)         # (B, L)

    # ---- lo / hi decoder branches; both branches use output_LSTM_lo weights
    # (reproduces the upstream module's forward).
    out = decode_branches(z, params["hidden_stacked"], params["output_lo"], T)
    out_lo = jnp.transpose(out[0], (1, 0, 2))                # (B, T, input_size)
    out_hi = jnp.transpose(out[1], (1, 0, 2))
    return out_lo, out_hi


# ----------------------------------------------------------------------------
# Main
# ----------------------------------------------------------------------------
if __name__ == "__main__":
    B, T = 2, 8
    input_size = 16        # == input_shape
    max_features = 8
    hidden_size = 32
    latent_size = 8        # == latent_dim

    root = jax.random.PRNGKey(0)
    (k_enc, k_heads, k_hlo, k_olo, k_hhi, k_ohi,
     k_rs, k_x, k_eps) = jax.random.split(root, 9)

    # deterministic stand-in for np.random.choice(input_size, size=max_features)
    random_samples = jax.random.permutation(k_rs, input_size)[:max_features]

    params = dict(
        random_samples=random_samples,
        encoder=init_encoder_params(k_enc, k_heads, max_features,
                                    hidden_size, latent_size),
        hidden_stacked=stack_branches(
            init_hidden_params(k_hlo, latent_size, hidden_size),   # lo
            init_hidden_params(k_hhi, latent_size, hidden_size)),  # hi
        output_lo=init_output_params(k_olo, hidden_size, input_size),
        # output_hi is created in __init__ but never used by forward (the
        # upstream module re-uses output_LSTM_lo); kept for parameter parity.
        output_hi=init_output_params(k_ohi, hidden_size, input_size),
    )

    x = jax.random.normal(k_x, (B, T, input_size), jnp.float32)

    forward = jax.jit(div_lstm_vae_forward)
    out_lo, out_hi = forward(x, params, k_eps)
    jax.block_until_ready((out_lo, out_hi))

    assert out_lo.shape == (B, T, input_size)
    assert out_hi.shape == (B, T, input_size)
    assert bool(jnp.all(jnp.isfinite(out_lo))) and bool(jnp.all(jnp.isfinite(out_hi)))
    # outputs are tanh'd -> bounded in (-1, 1)
    assert bool(jnp.all(jnp.abs(out_lo) <= 1.0)) and bool(jnp.all(jnp.abs(out_hi) <= 1.0))
    print("KERNEL_OK")
</pallas_src>

<mosaic_0001>
module attributes {stable_mosaic.version = 11 : i64} {
  func.func @_encoder_kernel(%arg0: i32, %arg1: memref<8x2x8xf32, #tpu.memory_space<vmem>>, %arg2: memref<40x128xf32, #tpu.memory_space<vmem>>, %arg3: memref<1x128xf32, #tpu.memory_space<vmem>>, %arg4: memref<64x128xf32, #tpu.memory_space<vmem>>, %arg5: memref<1x128xf32, #tpu.memory_space<vmem>>, %arg6: memref<32x16xf32, #tpu.memory_space<vmem>>, %arg7: memref<1x16xf32, #tpu.memory_space<vmem>>, %arg8: memref<2x8xf32, #tpu.memory_space<vmem>>, %arg9: memref<2x8xf32, #tpu.memory_space<vmem>>) attributes {dimension_semantics = [#tpu.dimension_semantics<arbitrary>], iteration_bounds = array<i64: 1>, scalar_prefetch = 0 : i64, scratch_operands = 0 : i64, tpu.core_type = #tpu.core_type<tc>, window_params = [{pipeline_mode = #tpu.pipeline_mode<synchronous>, transform_indices = @transform_0, window_bounds = array<i64: 8, 2, 8>}, {pipeline_mode = #tpu.pipeline_mode<synchronous>, transform_indices = @transform_1, window_bounds = array<i64: 40, 128>}, {pipeline_mode = #tpu.pipeline_mode<synchronous>, transform_indices = @transform_2, window_bounds = array<i64: 1, 128>}, {pipeline_mode = #tpu.pipeline_mode<synchronous>, transform_indices = @transform_3, window_bounds = array<i64: 64, 128>}, {pipeline_mode = #tpu.pipeline_mode<synchronous>, transform_indices = @transform_4, window_bounds = array<i64: 1, 128>}, {pipeline_mode = #tpu.pipeline_mode<synchronous>, transform_indices = @transform_5, window_bounds = array<i64: 32, 16>}, {pipeline_mode = #tpu.pipeline_mode<synchronous>, transform_indices = @transform_6, window_bounds = array<i64: 1, 16>}, {pipeline_mode = #tpu.pipeline_mode<synchronous>, transform_indices = @transform_7, window_bounds = array<i64: 2, 8>}, {pipeline_mode = #tpu.pipeline_mode<synchronous>, transform_indices = @transform_8, window_bounds = array<i64: 2, 8>}]} {
    %c0 = arith.constant 0 : index
    %c0_0 = arith.constant 0 : index
    %0 = vector.load %arg2[%c0, %c0_0] : memref<40x128xf32, #tpu.memory_space<vmem>>, vector<40x128xf32>
    %c0_1 = arith.constant 0 : index
    %c0_2 = arith.constant 0 : index
    %1 = vector.load %arg4[%c0_1, %c0_2] : memref<64x128xf32, #tpu.memory_space<vmem>>, vector<64x128xf32>
    %c0_3 = arith.constant 0 : index
    %c0_4 = arith.constant 0 : index
    %2 = vector.load %arg3[%c0_3, %c0_4] : memref<1x128xf32, #tpu.memory_space<vmem>>, vector<1x128xf32>
    %3 = vector.shape_cast %2 : vector<1x128xf32> to vector<1x128xf32>
    %4 = vector.broadcast %3 : vector<1x128xf32> to vector<2x128xf32>
    %c0_5 = arith.constant 0 : index
    %c0_6 = arith.constant 0 : index
    %5 = vector.load %arg5[%c0_5, %c0_6] : memref<1x128xf32, #tpu.memory_space<vmem>>, vector<1x128xf32>
    %6 = vector.shape_cast %5 : vector<1x128xf32> to vector<1x128xf32>
    %7 = vector.broadcast %6 : vector<1x128xf32> to vector<2x128xf32>
    %cst = arith.constant 0.000000e+00 : f32
    %8 = vector.broadcast %cst : f32 to vector<2x32xf32>
    %c0_i32 = arith.constant 0 : i32
    %9 = arith.index_cast %c0_i32 : i32 to index
    %c0_7 = arith.constant 0 : index
    %c0_8 = arith.constant 0 : index
    %10 = vector.load %arg1[%9, %c0_7, %c0_8] : memref<8x2x8xf32, #tpu.memory_space<vmem>>, vector<1x2x8xf32>
    %11 = vector.shape_cast %10 : vector<1x2x8xf32> to vector<2x8xf32>
    %12 = tpu.concatenate %11, %8 in 1 : vector<2x8xf32>, vector<2x32xf32> -> vector<2x40xf32>
    %cst_9 = arith.constant dense<0.000000e+00> : vector<2x128xf32>
    %13 = tpu.matmul %12, %0, %cst_9 {dimension_numbers = #tpu.dot_dimension_numbers<[1], [0], [0], [1], [0, 0, 1, 1], [], []>} : vector<2x40xf32>, vector<40x128xf32>, vector<2x128xf32> -> vector<2x128xf32>
    %14 = arith.addf %13, %4 : vector<2x128xf32>
    %15 = vector.extract_strided_slice %14 {offsets = [0, 0], sizes = [2, 96], strides = [1, 1]} : vector<2x128xf32> to vector<2x96xf32>
    %16 = arith.negf %15 : vector<2x96xf32>
    %17 = math.exp %16 : vector<2x96xf32>
    %cst_10 = arith.constant 1.000000e+00 : f32
    %18 = vector.broadcast %cst_10 : f32 to vector<2x96xf32>
    %19 = arith.addf %18, %17 : vector<2x96xf32>
    %20 = arith.divf %18, %19 : vector<2x96xf32>
    %21 = vector.extract_strided_slice %20 {offsets = [0, 0], sizes = [2, 32], strides = [1, 1]} : vector<2x96xf32> to vector<2x32xf32>
    %22 = vector.extract_strided_slice %20 {offsets = [0, 32], sizes = [2, 32], strides = [1, 1]} : vector<2x96xf32> to vector<2x32xf32>
    %23 = vector.extract_strided_slice %20 {offsets = [0, 64], sizes = [2, 32], strides = [1, 1]} : vector<2x96xf32> to vector<2x32xf32>
    %24 = vector.extract_strided_slice %14 {offsets = [0, 96], sizes = [2, 32], strides = [1, 1]} : vector<2x128xf32> to vector<2x32xf32>
    %25 = math.tanh %24 : vector<2x32xf32>
    %26 = arith.mulf %22, %8 : vector<2x32xf32>
    %27 = arith.mulf %21, %25 : vector<2x32xf32>
    %28 = arith.addf %26, %27 : vector<2x32xf32>
    %29 = math.tanh %28 : vector<2x32xf32>
    %30 = arith.mulf %23, %29 : vector<2x32xf32>
    %31 = tpu.concatenate %30, %8 in 1 : vector<2x32xf32>, vector<2x32xf32> -> vector<2x64xf32>
    %cst_11 = arith.constant dense<0.000000e+00> : vector<2x128xf32>
    %32 = tpu.matmul %31, %1, %cst_11 {dimension_numbers = #tpu.dot_dimension_numbers<[1], [0], [0], [1], [0, 0, 1, 1], [], []>} : vector<2x64xf32>, vector<64x128xf32>, vector<2x128xf32> -> vector<2x128xf32>
    %33 = arith.addf %32, %7 : vector<2x128xf32>
    %34 = vector.extract_strided_slice %33 {offsets = [0, 0], sizes = [2, 96], strides = [1, 1]} : vector<2x128xf32> to vector<2x96xf32>
    %35 = arith.negf %34 : vector<2x96xf32>
    %36 = math.exp %35 : vector<2x96xf32>
    %cst_12 = arith.constant 1.000000e+00 : f32
    %37 = vector.broadcast %cst_12 : f32 to vector<2x96xf32>
    %38 = arith.addf %37, %36 : vector<2x96xf32>
    %39 = arith.divf %37, %38 : vector<2x96xf32>
    %40 = vector.extract_strided_slice %39 {offsets = [0, 0], sizes = [2, 32], strides = [1, 1]} : vector<2x96xf32> to vector<2x32xf32>
    %41 = vector.extract_strided_slice %39 {offsets = [0, 32], sizes = [2, 32], strides = [1, 1]} : vector<2x96xf32> to vector<2x32xf32>
    %42 = vector.extract_strided_slice %39 {offsets = [0, 64], sizes = [2, 32], strides = [1, 1]} : vector<2x96xf32> to vector<2x32xf32>
    %43 = vector.extract_strided_slice %33 {offsets = [0, 96], sizes = [2, 32], strides = [1, 1]} : vector<2x128xf32> to vector<2x32xf32>
    %44 = math.tanh %43 : vector<2x32xf32>
    %45 = arith.mulf %41, %8 : vector<2x32xf32>
    %46 = arith.mulf %40, %44 : vector<2x32xf32>
    %47 = arith.addf %45, %46 : vector<2x32xf32>
    %48 = math.tanh %47 : vector<2x32xf32>
    %49 = arith.mulf %42, %48 : vector<2x32xf32>
    %c1_i32 = arith.constant 1 : i32
    %50 = arith.index_cast %c1_i32 : i32 to index
    %c0_13 = arith.constant 0 : index
    %c0_14 = arith.constant 0 : index
    %51 = vector.load %arg1[%50, %c0_13, %c0_14] : memref<8x2x8xf32, #tpu.memory_space<vmem>>, vector<1x2x8xf32>
    %52 = vector.shape_cast %51 : vector<1x2x8xf32> to vector<2x8xf32>
    %53 = tpu.concatenate %52, %30 in 1 : vector<2x8xf32>, vector<2x32xf32> -> vector<2x40xf32>
    %cst_15 = arith.constant dense<0.000000e+00> : vector<2x128xf32>
    %54 = tpu.matmul %53, %0, %cst_15 {dimension_numbers = #tpu.dot_dimension_numbers<[1], [0], [0], [1], [0, 0, 1, 1], [], []>} : vector<2x40xf32>, vector<40x128xf32>, vector<2x128xf32> -> vector<2x128xf32>
    %55 = arith.addf %54, %4 : vector<2x128xf32>
    %56 = vector.extract_strided_slice %55 {offsets = [0, 0], sizes = [2, 96], strides = [1, 1]} : vector<2x128xf32> to vector<2x96xf32>
    %57 = arith.negf %56 : vector<2x96xf32>
    %58 = math.exp %57 : vector<2x96xf32>
    %cst_16 = arith.constant 1.000000e+00 : f32
    %59 = vector.broadcast %cst_16 : f32 to vector<2x96xf32>
    %60 = arith.addf %59, %58 : vector<2x96xf32>
    %61 = arith.divf %59, %60 : vector<2x96xf32>
    %62 = vector.extract_strided_slice %61 {offsets = [0, 0], sizes = [2, 32], strides = [1, 1]} : vector<2x96xf32> to vector<2x32xf32>
    %63 = vector.extract_strided_slice %61 {offsets = [0, 32], sizes = [2, 32], strides = [1, 1]} : vector<2x96xf32> to vector<2x32xf32>
    %64 = vector.extract_strided_slice %61 {offsets = [0, 64], sizes = [2, 32], strides = [1, 1]} : vector<2x96xf32> to vector<2x32xf32>
    %65 = vector.extract_strided_slice %55 {offsets = [0, 96], sizes = [2, 32], strides = [1, 1]} : vector<2x128xf32> to vector<2x32xf32>
    %66 = math.tanh %65 : vector<2x32xf32>
    %67 = arith.mulf %63, %28 : vector<2x32xf32>
    %68 = arith.mulf %62, %66 : vector<2x32xf32>
    %69 = arith.addf %67, %68 : vector<2x32xf32>
    %70 = math.tanh %69 : vector<2x32xf32>
    %71 = arith.mulf %64, %70 : vector<2x32xf32>
    %72 = tpu.concatenate %71, %49 in 1 : vector<2x32xf32>, vector<2x32xf32> -> vector<2x64xf32>
    %cst_17 = arith.constant dense<0.000000e+00> : vector<2x128xf32>
    %73 = tpu.matmul %72, %1, %cst_17 {dimension_numbers = #tpu.dot_dimension_numbers<[1], [0], [0], [1], [0, 0, 1, 1], [], []>} : vector<2x64xf32>, vector<64x128xf32>, vector<2x128xf32> -> vector<2x128xf32>
    %74 = arith.addf %73, %7 : vector<2x128xf32>
    %75 = vector.extract_strided_slice %74 {offsets = [0, 0], sizes = [2, 96], strides = [1, 1]} : vector<2x128xf32> to vector<2x96xf32>
    %76 = arith.negf %75 : vector<2x96xf32>
    %77 = math.exp %76 : vector<2x96xf32>
    %cst_18 = arith.constant 1.000000e+00 : f32
    %78 = vector.broadcast %cst_18 : f32 to vector<2x96xf32>
    %79 = arith.addf %78, %77 : vector<2x96xf32>
    %80 = arith.divf %78, %79 : vector<2x96xf32>
    %81 = vector.extract_strided_slice %80 {offsets = [0, 0], sizes = [2, 32], strides = [1, 1]} : vector<2x96xf32> to vector<2x32xf32>
    %82 = vector.extract_strided_slice %80 {offsets = [0, 32], sizes = [2, 32], strides = [1, 1]} : vector<2x96xf32> to vector<2x32xf32>
    %83 = vector.extract_strided_slice %80 {offsets = [0, 64], sizes = [2, 32], strides = [1, 1]} : vector<2x96xf32> to vector<2x32xf32>
    %84 = vector.extract_strided_slice %74 {offsets = [0, 96], sizes = [2, 32], strides = [1, 1]} : vector<2x128xf32> to vector<2x32xf32>
    %85 = math.tanh %84 : vector<2x32xf32>
    %86 = arith.mulf %82, %47 : vector<2x32xf32>
    %87 = arith.mulf %81, %85 : vector<2x32xf32>
    %88 = arith.addf %86, %87 : vector<2x32xf32>
    %89 = math.tanh %88 : vector<2x32xf32>
    %90 = arith.mulf %83, %89 : vector<2x32xf32>
    %c2_i32 = arith.constant 2 : i32
    %91 = arith.index_cast %c2_i32 : i32 to index
    %c0_19 = arith.constant 0 : index
    %c0_20 = arith.constant 0 : index
    %92 = vector.load %arg1[%91, %c0_19, %c0_20] : memref<8x2x8xf32, #tpu.memory_space<vmem>>, vector<1x2x8xf32>
    %93 = vector.shape_cast %92 : vector<1x2x8xf32> to vector<2x8xf32>
    %94 = tpu.concatenate %93, %71 in 1 : vector<2x8xf32>, vector<2x32xf32> -> vector<2x40xf32>
    %cst_21 = arith.constant dense<0.000000e+00> : vector<2x128xf32>
    %95 = tpu.matmul %94, %0, %cst_21 {dimension_numbers = #tpu.dot_dimension_numbers<[1], [0], [0], [1], [0, 0, 1, 1], [], []>} : vector<2x40xf32>, vector<40x128xf32>, vector<2x128xf32> -> vector<2x128xf32>
    %96 = arith.addf %95, %4 : vector<2x128xf32>
    %97 = vector.extract_strided_slice %96 {offsets = [0, 0], sizes = [2, 96], strides = [1, 1]} : vector<2x128xf32> to vector<2x96xf32>
    %98 = arith.negf %97 : vector<2x96xf32>
    %99 = math.exp %98 : vector<2x96xf32>
    %cst_22 = arith.constant 1.000000e+00 : f32
    %100 = vector.broadcast %cst_22 : f32 to vector<2x96xf32>
    %101 = arith.addf %100, %99 : vector<2x96xf32>
    %102 = arith.divf %100, %101 : vector<2x96xf32>
    %103 = vector.extract_strided_slice %102 {offsets = [0, 0], sizes = [2, 32], strides = [1, 1]} : vector<2x96xf32> to vector<2x32xf32>
    %104 = vector.extract_strided_slice %102 {offsets = [0, 32], sizes = [2, 32], strides = [1, 1]} : vector<2x96xf32> to vector<2x32xf32>
    %105 = vector.extract_strided_slice %102 {offsets = [0, 64], sizes = [2, 32], strides = [1, 1]} : vector<2x96xf32> to vector<2x32xf32>
    %106 = vector.extract_strided_slice %96 {offsets = [0, 96], sizes = [2, 32], strides = [1, 1]} : vector<2x128xf32> to vector<2x32xf32>
    %107 = math.tanh %106 : vector<2x32xf32>
    %108 = arith.mulf %104, %69 : vector<2x32xf32>
    %109 = arith.mulf %103, %107 : vector<2x32xf32>
    %110 = arith.addf %108, %109 : vector<2x32xf32>
    %111 = math.tanh %110 : vector<2x32xf32>
    %112 = arith.mulf %105, %111 : vector<2x32xf32>
    %113 = tpu.concatenate %112, %90 in 1 : vector<2x32xf32>, vector<2x32xf32> -> vector<2x64xf32>
    %cst_23 = arith.constant dense<0.000000e+00> : vector<2x128xf32>
    %114 = tpu.matmul %113, %1, %cst_23 {dimension_numbers = #tpu.dot_dimension_numbers<[1], [0], [0], [1], [0, 0, 1, 1], [], []>} : vector<2x64xf32>, vector<64x128xf32>, vector<2x128xf32> -> vector<2x128xf32>
    %115 = arith.addf %114, %7 : vector<2x128xf32>
    %116 = vector.extract_strided_slice %115 {offsets = [0, 0], sizes = [2, 96], strides = [1, 1]} : vector<2x128xf32> to vector<2x96xf32>
    %117 = arith.negf %116 : vector<2x96xf32>
    %118 = math.exp %117 : vector<2x96xf32>
    %cst_24 = arith.constant 1.000000e+00 : f32
    %119 = vector.broadcast %cst_24 : f32 to vector<2x96xf32>
    %120 = arith.addf %119, %118 : vector<2x96xf32>
    %121 = arith.divf %119, %120 : vector<2x96xf32>
    %122 = vector.extract_strided_slice %121 {offsets = [0, 0], sizes = [2, 32], strides = [1, 1]} : vector<2x96xf32> to vector<2x32xf32>
    %123 = vector.extract_strided_slice %121 {offsets = [0, 32], sizes = [2, 32], strides = [1, 1]} : vector<2x96xf32> to vector<2x32xf32>
    %124 = vector.extract_strided_slice %121 {offsets = [0, 64], sizes = [2, 32], strides = [1, 1]} : vector<2x96xf32> to vector<2x32xf32>
    %125 = vector.extract_strided_slice %115 {offsets = [0, 96], sizes = [2, 32], strides = [1, 1]} : vector<2x128xf32> to vector<2x32xf32>
    %126 = math.tanh %125 : vector<2x32xf32>
    %127 = arith.mulf %123, %88 : vector<2x32xf32>
    %128 = arith.mulf %122, %126 : vector<2x32xf32>
    %129 = arith.addf %127, %128 : vector<2x32xf32>
    %130 = math.tanh %129 : vector<2x32xf32>
    %131 = arith.mulf %124, %130 : vector<2x32xf32>
    %c3_i32 = arith.constant 3 : i32
    %132 = arith.index_cast %c3_i32 : i32 to index
    %c0_25 = arith.constant 0 : index
    %c0_26 = arith.constant 0 : index
    %133 = vector.load %arg1[%132, %c0_25, %c0_26] : memref<8x2x8xf32, #tpu.memory_space<vmem>>, vector<1x2x8xf32>
    %134 = vector.shape_cast %133 : vector<1x2x8xf32> to vector<2x8xf32>
    %135 = tpu.concatenate %134, %112 in 1 : vector<2x8xf32>, vector<2x32xf32> -> vector<2x40xf32>
    %cst_27 = arith.constant dense<0.000000e+00> : vector<2x128xf32>
    %136 = tpu.matmul %135, %0, %cst_27 {dimension_numbers = #tpu.dot_dimension_numbers<[1], [0], [0], [1], [0, 0, 1, 1], [], []>} : vector<2x40xf32>, vector<40x128xf32>, vector<2x128xf32> -> vector<2x128xf32>
    %137 = arith.addf %136, %4 : vector<2x128xf32>
    %138 = vector.extract_strided_slice %137 {offsets = [0, 0], sizes = [2, 96], strides = [1, 1]} : vector<2x128xf32> to vector<2x96xf32>
    %139 = arith.negf %138 : vector<2x96xf32>
    %140 = math.exp %139 : vector<2x96xf32>
    %cst_28 = arith.constant 1.000000e+00 : f32
    %141 = vector.broadcast %cst_28 : f32 to vector<2x96xf32>
    %142 = arith.addf %141, %140 : vector<2x96xf32>
    %143 = arith.divf %141, %142 : vector<2x96xf32>
    %144 = vector.extract_strided_slice %143 {offsets = [0, 0], sizes = [2, 32], strides = [1, 1]} : vector<2x96xf32> to vector<2x32xf32>
    %145 = vector.extract_strided_slice %143 {offsets = [0, 32], sizes = [2, 32], strides = [1, 1]} : vector<2x96xf32> to vector<2x32xf32>
    %146 = vector.extract_strided_slice %143 {offsets = [0, 64], sizes = [2, 32], strides = [1, 1]} : vector<2x96xf32> to vector<2x32xf32>
    %147 = vector.extract_strided_slice %137 {offsets = [0, 96], sizes = [2, 32], strides = [1, 1]} : vector<2x128xf32> to vector<2x32xf32>
    %148 = math.tanh %147 : vector<2x32xf32>
    %149 = arith.mulf %145, %110 : vector<2x32xf32>
    %150 = arith.mulf %144, %148 : vector<2x32xf32>
    %151 = arith.addf %149, %150 : vector<2x32xf32>
    %152 = math.tanh %151 : vector<2x32xf32>
    %153 = arith.mulf %146, %152 : vector<2x32xf32>
    %154 = tpu.concatenate %153, %131 in 1 : vector<2x32xf32>, vector<2x32xf32> -> vector<2x64xf32>
    %cst_29 = arith.constant dense<0.000000e+00> : vector<2x128xf32>
    %155 = tpu.matmul %154, %1, %cst_29 {dimension_numbers = #tpu.dot_dimension_numbers<[1], [0], [0], [1], [0, 0, 1, 1], [], []>} : vector<2x64xf32>, vector<64x128xf32>, vector<2x128xf32> -> vector<2x128xf32>
    %156 = arith.addf %155, %7 : vector<2x128xf32>
    %157 = vector.extract_strided_slice %156 {offsets = [0, 0], sizes = [2, 96], strides = [1, 1]} : vector<2x128xf32> to vector<2x96xf32>
    %158 = arith.negf %157 : vector<2x96xf32>
    %159 = math.exp %158 : vector<2x96xf32>
    %cst_30 = arith.constant 1.000000e+00 : f32
    %160 = vector.broadcast %cst_30 : f32 to vector<2x96xf32>
    %161 = arith.addf %160, %159 : vector<2x96xf32>
    %162 = arith.divf %160, %161 : vector<2x96xf32>
    %163 = vector.extract_strided_slice %162 {offsets = [0, 0], sizes = [2, 32], strides = [1, 1]} : vector<2x96xf32> to vector<2x32xf32>
    %164 = vector.extract_strided_slice %162 {offsets = [0, 32], sizes = [2, 32], strides = [1, 1]} : vector<2x96xf32> to vector<2x32xf32>
    %165 = vector.extract_strided_slice %162 {offsets = [0, 64], sizes = [2, 32], strides = [1, 1]} : vector<2x96xf32> to vector<2x32xf32>
    %166 = vector.extract_strided_slice %156 {offsets = [0, 96], sizes = [2, 32], strides = [1, 1]} : vector<2x128xf32> to vector<2x32xf32>
    %167 = math.tanh %166 : vector<2x32xf32>
    %168 = arith.mulf %164, %129 : vector<2x32xf32>
    %169 = arith.mulf %163, %167 : vector<2x32xf32>
    %170 = arith.addf %168, %169 : vector<2x32xf32>
    %171 = math.tanh %170 : vector<2x32xf32>
    %172 = arith.mulf %165, %171 : vector<2x32xf32>
    %c4_i32 = arith.constant 4 : i32
    %173 = arith.index_cast %c4_i32 : i32 to index
    %c0_31 = arith.constant 0 : index
    %c0_32 = arith.constant 0 : index
    %174 = vector.load %arg1[%173, %c0_31, %c0_32] : memref<8x2x8xf32, #tpu.memory_space<vmem>>, vector<1x2x8xf32>
    %175 = vector.shape_cast %174 : vector<1x2x8xf32> to vector<2x8xf32>
    %176 = tpu.concatenate %175, %153 in 1 : vector<2x8xf32>, vector<2x32xf32> -> vector<2x40xf32>
    %cst_33 = arith.constant dense<0.000000e+00> : vector<2x128xf32>
    %177 = tpu.matmul %176, %0, %cst_33 {dimension_numbers = #tpu.dot_dimension_numbers<[1], [0], [0], [1], [0, 0, 1, 1], [], []>} : vector<2x40xf32>, vector<40x128xf32>, vector<2x128xf32> -> vector<2x128xf32>
    %178 = arith.addf %177, %4 : vector<2x128xf32>
    %179 = vector.extract_strided_slice %178 {offsets = [0, 0], sizes = [2, 96], strides = [1, 1]} : vector<2x128xf32> to vector<2x96xf32>
    %180 = arith.negf %179 : vector<2x96xf32>
    %181 = math.exp %180 : vector<2x96xf32>
    %cst_34 = arith.constant 1.000000e+00 : f32
    %182 = vector.broadcast %cst_34 : f32 to vector<2x96xf32>
    %183 = arith.addf %182, %181 : vector<2x96xf32>
    %184 = arith.divf %182, %183 : vector<2x96xf32>
    %185 = vector.extract_strided_slice %184 {offsets = [0, 0], sizes = [2, 32], strides = [1, 1]} : vector<2x96xf32> to vector<2x32xf32>
    %186 = vector.extract_strided_slice %184 {offsets = [0, 32], sizes = [2, 32], strides = [1, 1]} : vector<2x96xf32> to vector<2x32xf32>
    %187 = vector.extract_strided_slice %184 {offsets = [0, 64], sizes = [2, 32], strides = [1, 1]} : vector<2x96xf32> to vector<2x32xf32>
    %188 = vector.extract_strided_slice %178 {offsets = [0, 96], sizes = [2, 32], strides = [1, 1]} : vector<2x128xf32> to vector<2x32xf32>
    %189 = math.tanh %188 : vector<2x32xf32>
    %190 = arith.mulf %186, %151 : vector<2x32xf32>
    %191 = arith.mulf %185, %189 : vector<2x32xf32>
    %192 = arith.addf %190, %191 : vector<2x32xf32>
    %193 = math.tanh %192 : vector<2x32xf32>
    %194 = arith.mulf %187, %193 : vector<2x32xf32>
    %195 = tpu.concatenate %194, %172 in 1 : vector<2x32xf32>, vector<2x32xf32> -> vector<2x64xf32>
    %cst_35 = arith.constant dense<0.000000e+00> : vector<2x128xf32>
    %196 = tpu.matmul %195, %1, %cst_35 {dimension_numbers = #tpu.dot_dimension_numbers<[1], [0], [0], [1], [0, 0, 1, 1], [], []>} : vector<2x64xf32>, vector<64x128xf32>, vector<2x128xf32> -> vector<2x128xf32>
    %197 = arith.addf %196, %7 : vector<2x128xf32>
    %198 = vector.extract_strided_slice %197 {offsets = [0, 0], sizes = [2, 96], strides = [1, 1]} : vector<2x128xf32> to vector<2x96xf32>
    %199 = arith.negf %198 : vector<2x96xf32>
    %200 = math.exp %199 : vector<2x96xf32>
    %cst_36 = arith.constant 1.000000e+00 : f32
    %201 = vector.broadcast %cst_36 : f32 to vector<2x96xf32>
    %202 = arith.addf %201, %200 : vector<2x96xf32>
    %203 = arith.divf %201, %202 : vector<2x96xf32>
    %204 = vector.extract_strided_slice %203 {offsets = [0, 0], sizes = [2, 32], strides = [1, 1]} : vector<2x96xf32> to vector<2x32xf32>
    %205 = vector.extract_strided_slice %203 {offsets = [0, 32], sizes = [2, 32], strides = [1, 1]} : vector<2x96xf32> to vector<2x32xf32>
    %206 = vector.extract_strided_slice %203 {offsets = [0, 64], sizes = [2, 32], strides = [1, 1]} : vector<2x96xf32> to vector<2x32xf32>
    %207 = vector.extract_strided_slice %197 {offsets = [0, 96], sizes = [2, 32], strides = [1, 1]} : vector<2x128xf32> to vector<2x32xf32>
    %208 = math.tanh %207 : vector<2x32xf32>
    %209 = arith.mulf %205, %170 : vector<2x32xf32>
    %210 = arith.mulf %204, %208 : vector<2x32xf32>
    %211 = arith.addf %209, %210 : vector<2x32xf32>
    %212 = math.tanh %211 : vector<2x32xf32>
    %213 = arith.mulf %206, %212 : vector<2x32xf32>
    %c5_i32 = arith.constant 5 : i32
    %214 = arith.index_cast %c5_i32 : i32 to index
    %c0_37 = arith.constant 0 : index
    %c0_38 = arith.constant 0 : index
    %215 = vector.load %arg1[%214, %c0_37, %c0_38] : memref<8x2x8xf32, #tpu.memory_space<vmem>>, vector<1x2x8xf32>
    %216 = vector.shape_cast %215 : vector<1x2x8xf32> to vector<2x8xf32>
    %217 = tpu.concatenate %216, %194 in 1 : vector<2x8xf32>, vector<2x32xf32> -> vector<2x40xf32>
    %cst_39 = arith.constant dense<0.000000e+00> : vector<2x128xf32>
    %218 = tpu.matmul %217, %0, %cst_39 {dimension_numbers = #tpu.dot_dimension_numbers<[1], [0], [0], [1], [0, 0, 1, 1], [], []>} : vector<2x40xf32>, vector<40x128xf32>, vector<2x128xf32> -> vector<2x128xf32>
    %219 = arith.addf %218, %4 : vector<2x128xf32>
    %220 = vector.extract_strided_slice %219 {offsets = [0, 0], sizes = [2, 96], strides = [1, 1]} : vector<2x128xf32> to vector<2x96xf32>
    %221 = arith.negf %220 : vector<2x96xf32>
    %222 = math.exp %221 : vector<2x96xf32>
    %cst_40 = arith.constant 1.000000e+00 : f32
    %223 = vector.broadcast %cst_40 : f32 to vector<2x96xf32>
    %224 = arith.addf %223, %222 : vector<2x96xf32>
    %225 = arith.divf %223, %224 : vector<2x96xf32>
    %226 = vector.extract_strided_slice %225 {offsets = [0, 0], sizes = [2, 32], strides = [1, 1]} : vector<2x96xf32> to vector<2x32xf32>
    %227 = vector.extract_strided_slice %225 {offsets = [0, 32], sizes = [2, 32], strides = [1, 1]} : vector<2x96xf32> to vector<2x32xf32>
    %228 = vector.extract_strided_slice %225 {offsets = [0, 64], sizes = [2, 32], strides = [1, 1]} : vector<2x96xf32> to vector<2x32xf32>
    %229 = vector.extract_strided_slice %219 {offsets = [0, 96], sizes = [2, 32], strides = [1, 1]} : vector<2x128xf32> to vector<2x32xf32>
    %230 = math.tanh %229 : vector<2x32xf32>
    %231 = arith.mulf %227, %192 : vector<2x32xf32>
    %232 = arith.mulf %226, %230 : vector<2x32xf32>
    %233 = arith.addf %231, %232 : vector<2x32xf32>
    %234 = math.tanh %233 : vector<2x32xf32>
    %235 = arith.mulf %228, %234 : vector<2x32xf32>
    %236 = tpu.concatenate %235, %213 in 1 : vector<2x32xf32>, vector<2x32xf32> -> vector<2x64xf32>
    %cst_41 = arith.constant dense<0.000000e+00> : vector<2x128xf32>
    %237 = tpu.matmul %236, %1, %cst_41 {dimension_numbers = #tpu.dot_dimension_numbers<[1], [0], [0], [1], [0, 0, 1, 1], [], []>} : vector<2x64xf32>, vector<64x128xf32>, vector<2x128xf32> -> vector<2x128xf32>
    %238 = arith.addf %237, %7 : vector<2x128xf32>
    %239 = vector.extract_strided_slice %238 {offsets = [0, 0], sizes = [2, 96], strides = [1, 1]} : vector<2x128xf32> to vector<2x96xf32>
    %240 = arith.negf %239 : vector<2x96xf32>
    %241 = math.exp %240 : vector<2x96xf32>
    %cst_42 = arith.constant 1.000000e+00 : f32
    %242 = vector.broadcast %cst_42 : f32 to vector<2x96xf32>
    %243 = arith.addf %242, %241 : vector<2x96xf32>
    %244 = arith.divf %242, %243 : vector<2x96xf32>
    %245 = vector.extract_strided_slice %244 {offsets = [0, 0], sizes = [2, 32], strides = [1, 1]} : vector<2x96xf32> to vector<2x32xf32>
    %246 = vector.extract_strided_slice %244 {offsets = [0, 32], sizes = [2, 32], strides = [1, 1]} : vector<2x96xf32> to vector<2x32xf32>
    %247 = vector.extract_strided_slice %244 {offsets = [0, 64], sizes = [2, 32], strides = [1, 1]} : vector<2x96xf32> to vector<2x32xf32>
    %248 = vector.extract_strided_slice %238 {offsets = [0, 96], sizes = [2, 32], strides = [1, 1]} : vector<2x128xf32> to vector<2x32xf32>
    %249 = math.tanh %248 : vector<2x32xf32>
    %250 = arith.mulf %246, %211 : vector<2x32xf32>
    %251 = arith.mulf %245, %249 : vector<2x32xf32>
    %252 = arith.addf %250, %251 : vector<2x32xf32>
    %253 = math.tanh %252 : vector<2x32xf32>
    %254 = arith.mulf %247, %253 : vector<2x32xf32>
    %c6_i32 = arith.constant 6 : i32
    %255 = arith.index_cast %c6_i32 : i32 to index
    %c0_43 = arith.constant 0 : index
    %c0_44 = arith.constant 0 : index
    %256 = vector.load %arg1[%255, %c0_43, %c0_44] : memref<8x2x8xf32, #tpu.memory_space<vmem>>, vector<1x2x8xf32>
    %257 = vector.shape_cast %256 : vector<1x2x8xf32> to vector<2x8xf32>
    %258 = tpu.concatenate %257, %235 in 1 : vector<2x8xf32>, vector<2x32xf32> -> vector<2x40xf32>
    %cst_45 = arith.constant dense<0.000000e+00> : vector<2x128xf32>
    %259 = tpu.matmul %258, %0, %cst_45 {dimension_numbers = #tpu.dot_dimension_numbers<[1], [0], [0], [1], [0, 0, 1, 1], [], []>} : vector<2x40xf32>, vector<40x128xf32>, vector<2x128xf32> -> vector<2x128xf32>
    %260 = arith.addf %259, %4 : vector<2x128xf32>
    %261 = vector.extract_strided_slice %260 {offsets = [0, 0], sizes = [2, 96], strides = [1, 1]} : vector<2x128xf32> to vector<2x96xf32>
    %262 = arith.negf %261 : vector<2x96xf32>
    %263 = math.exp %262 : vector<2x96xf32>
    %cst_46 = arith.constant 1.000000e+00 : f32
    %264 = vector.broadcast %cst_46 : f32 to vector<2x96xf32>
    %265 = arith.addf %264, %263 : vector<2x96xf32>
    %266 = arith.divf %264, %265 : vector<2x96xf32>
    %267 = vector.extract_strided_slice %266 {offsets = [0, 0], sizes = [2, 32], strides = [1, 1]} : vector<2x96xf32> to vector<2x32xf32>
    %268 = vector.extract_strided_slice %266 {offsets = [0, 32], sizes = [2, 32], strides = [1, 1]} : vector<2x96xf32> to vector<2x32xf32>
    %269 = vector.extract_strided_slice %266 {offsets = [0, 64], sizes = [2, 32], strides = [1, 1]} : vector<2x96xf32> to vector<2x32xf32>
    %270 = vector.extract_strided_slice %260 {offsets = [0, 96], sizes = [2, 32], strides = [1, 1]} : vector<2x128xf32> to vector<2x32xf32>
    %271 = math.tanh %270 : vector<2x32xf32>
    %272 = arith.mulf %268, %233 : vector<2x32xf32>
    %273 = arith.mulf %267, %271 : vector<2x32xf32>
    %274 = arith.addf %272, %273 : vector<2x32xf32>
    %275 = math.tanh %274 : vector<2x32xf32>
    %276 = arith.mulf %269, %275 : vector<2x32xf32>
    %277 = tpu.concatenate %276, %254 in 1 : vector<2x32xf32>, vector<2x32xf32> -> vector<2x64xf32>
    %cst_47 = arith.constant dense<0.000000e+00> : vector<2x128xf32>
    %278 = tpu.matmul %277, %1, %cst_47 {dimension_numbers = #tpu.dot_dimension_numbers<[1], [0], [0], [1], [0, 0, 1, 1], [], []>} : vector<2x64xf32>, vector<64x128xf32>, vector<2x128xf32> -> vector<2x128xf32>
    %279 = arith.addf %278, %7 : vector<2x128xf32>
    %280 = vector.extract_strided_slice %279 {offsets = [0, 0], sizes = [2, 96], strides = [1, 1]} : vector<2x128xf32> to vector<2x96xf32>
    %281 = arith.negf %280 : vector<2x96xf32>
    %282 = math.exp %281 : vector<2x96xf32>
    %cst_48 = arith.constant 1.000000e+00 : f32
    %283 = vector.broadcast %cst_48 : f32 to vector<2x96xf32>
    %284 = arith.addf %283, %282 : vector<2x96xf32>
    %285 = arith.divf %283, %284 : vector<2x96xf32>
    %286 = vector.extract_strided_slice %285 {offsets = [0, 0], sizes = [2, 32], strides = [1, 1]} : vector<2x96xf32> to vector<2x32xf32>
    %287 = vector.extract_strided_slice %285 {offsets = [0, 32], sizes = [2, 32], strides = [1, 1]} : vector<2x96xf32> to vector<2x32xf32>
    %288 = vector.extract_strided_slice %285 {offsets = [0, 64], sizes = [2, 32], strides = [1, 1]} : vector<2x96xf32> to vector<2x32xf32>
    %289 = vector.extract_strided_slice %279 {offsets = [0, 96], sizes = [2, 32], strides = [1, 1]} : vector<2x128xf32> to vector<2x32xf32>
    %290 = math.tanh %289 : vector<2x32xf32>
    %291 = arith.mulf %287, %252 : vector<2x32xf32>
    %292 = arith.mulf %286, %290 : vector<2x32xf32>
    %293 = arith.addf %291, %292 : vector<2x32xf32>
    %294 = math.tanh %293 : vector<2x32xf32>
    %295 = arith.mulf %288, %294 : vector<2x32xf32>
    %c7_i32 = arith.constant 7 : i32
    %296 = arith.index_cast %c7_i32 : i32 to index
    %c0_49 = arith.constant 0 : index
    %c0_50 = arith.constant 0 : index
    %297 = vector.load %arg1[%296, %c0_49, %c0_50] : memref<8x2x8xf32, #tpu.memory_space<vmem>>, vector<1x2x8xf32>
    %298 = vector.shape_cast %297 : vector<1x2x8xf32> to vector<2x8xf32>
    %299 = tpu.concatenate %298, %276 in 1 : vector<2x8xf32>, vector<2x32xf32> -> vector<2x40xf32>
    %cst_51 = arith.constant dense<0.000000e+00> : vector<2x128xf32>
    %300 = tpu.matmul %299, %0, %cst_51 {dimension_numbers = #tpu.dot_dimension_numbers<[1], [0], [0], [1], [0, 0, 1, 1], [], []>} : vector<2x40xf32>, vector<40x128xf32>, vector<2x128xf32> -> vector<2x128xf32>
    %301 = arith.addf %300, %4 : vector<2x128xf32>
    %302 = vector.extract_strided_slice %301 {offsets = [0, 0], sizes = [2, 96], strides = [1, 1]} : vector<2x128xf32> to vector<2x96xf32>
    %303 = arith.negf %302 : vector<2x96xf32>
    %304 = math.exp %303 : vector<2x96xf32>
    %cst_52 = arith.constant 1.000000e+00 : f32
    %305 = vector.broadcast %cst_52 : f32 to vector<2x96xf32>
    %306 = arith.addf %305, %304 : vector<2x96xf32>
    %307 = arith.divf %305, %306 : vector<2x96xf32>
    %308 = vector.extract_strided_slice %307 {offsets = [0, 0], sizes = [2, 32], strides = [1, 1]} : vector<2x96xf32> to vector<2x32xf32>
    %309 = vector.extract_strided_slice %307 {offsets = [0, 32], sizes = [2, 32], strides = [1, 1]} : vector<2x96xf32> to vector<2x32xf32>
    %310 = vector.extract_strided_slice %307 {offsets = [0, 64], sizes = [2, 32], strides = [1, 1]} : vector<2x96xf32> to vector<2x32xf32>
    %311 = vector.extract_strided_slice %301 {offsets = [0, 96], sizes = [2, 32], strides = [1, 1]} : vector<2x128xf32> to vector<2x32xf32>
    %312 = math.tanh %311 : vector<2x32xf32>
    %313 = arith.mulf %309, %274 : vector<2x32xf32>
    %314 = arith.mulf %308, %312 : vector<2x32xf32>
    %315 = arith.addf %313, %314 : vector<2x32xf32>
    %316 = math.tanh %315 : vector<2x32xf32>
    %317 = arith.mulf %310, %316 : vector<2x32xf32>
    %318 = tpu.concatenate %317, %295 in 1 : vector<2x32xf32>, vector<2x32xf32> -> vector<2x64xf32>
    %cst_53 = arith.constant dense<0.000000e+00> : vector<2x128xf32>
    %319 = tpu.matmul %318, %1, %cst_53 {dimension_numbers = #tpu.dot_dimension_numbers<[1], [0], [0], [1], [0, 0, 1, 1], [], []>} : vector<2x64xf32>, vector<64x128xf32>, vector<2x128xf32> -> vector<2x128xf32>
    %320 = arith.addf %319, %7 : vector<2x128xf32>
    %321 = vector.extract_strided_slice %320 {offsets = [0, 0], sizes = [2, 96], strides = [1, 1]} : vector<2x128xf32> to vector<2x96xf32>
    %322 = arith.negf %321 : vector<2x96xf32>
    %323 = math.exp %322 : vector<2x96xf32>
    %cst_54 = arith.constant 1.000000e+00 : f32
    %324 = vector.broadcast %cst_54 : f32 to vector<2x96xf32>
    %325 = arith.addf %324, %323 : vector<2x96xf32>
    %326 = arith.divf %324, %325 : vector<2x96xf32>
    %327 = vector.extract_strided_slice %326 {offsets = [0, 0], sizes = [2, 32], strides = [1, 1]} : vector<2x96xf32> to vector<2x32xf32>
    %328 = vector.extract_strided_slice %326 {offsets = [0, 32], sizes = [2, 32], strides = [1, 1]} : vector<2x96xf32> to vector<2x32xf32>
    %329 = vector.extract_strided_slice %326 {offsets = [0, 64], sizes = [2, 32], strides = [1, 1]} : vector<2x96xf32> to vector<2x32xf32>
    %330 = vector.extract_strided_slice %320 {offsets = [0, 96], sizes = [2, 32], strides = [1, 1]} : vector<2x128xf32> to vector<2x32xf32>
    %331 = math.tanh %330 : vector<2x32xf32>
    %332 = arith.mulf %328, %293 : vector<2x32xf32>
    %333 = arith.mulf %327, %331 : vector<2x32xf32>
    %334 = arith.addf %332, %333 : vector<2x32xf32>
    %335 = math.tanh %334 : vector<2x32xf32>
    %336 = arith.mulf %329, %335 : vector<2x32xf32>
    %c8_i32 = arith.constant 8 : i32
    %337 = math.tanh %336 : vector<2x32xf32>
    %c0_55 = arith.constant 0 : index
    %c0_56 = arith.constant 0 : index
    %338 = vector.load %arg6[%c0_55, %c0_56] : memref<32x16xf32, #tpu.memory_space<vmem>>, vector<32x16xf32>
    %cst_57 = arith.constant dense<0.000000e+00> : vector<2x16xf32>
    %339 = tpu.matmul %337, %338, %cst_57 {dimension_numbers = #tpu.dot_dimension_numbers<[1], [0], [0], [1], [0, 0, 1, 1], [], []>} : vector<2x32xf32>, vector<32x16xf32>, vector<2x16xf32> -> vector<2x16xf32>
    %c0_58 = arith.constant 0 : index
    %c0_59 = arith.constant 0 : index
    %340 = vector.load %arg7[%c0_58, %c0_59] : memref<1x16xf32, #tpu.memory_space<vmem>>, vector<1x16xf32>
    %341 = vector.broadcast %340 : vector<1x16xf32> to vector<2x16xf32>
    %342 = arith.addf %339, %341 : vector<2x16xf32>
    %cst_60 = arith.constant 0.000000e+00 : f32
    %343 = vector.broadcast %cst_60 : f32 to vector<2x16xf32>
    %344 = arith.maximumf %342, %343 : vector<2x16xf32>
    %345 = vector.extract_strided_slice %344 {offsets = [0, 0], sizes = [2, 8], strides = [1, 1]} : vector<2x16xf32> to vector<2x8xf32>
    %346 = vector.extract_strided_slice %344 {offsets = [0, 8], sizes = [2, 8], strides = [1, 1]} : vector<2x16xf32> to vector<2x8xf32>
    %cst_61 = arith.constant 5.000000e-01 : f32
    %347 = vector.broadcast %cst_61 : f32 to vector<2x8xf32>
    %348 = arith.mulf %346, %347 : vector<2x8xf32>
    %349 = math.exp %348 : vector<2x8xf32>
    %c0_62 = arith.constant 0 : index
    %c0_63 = arith.constant 0 : index
    %350 = vector.load %arg8[%c0_62, %c0_63] : memref<2x8xf32, #tpu.memory_space<vmem>>, vector<2x8xf32>
    %351 = arith.mulf %349, %350 : vector<2x8xf32>
    %352 = arith.addf %345, %351 : vector<2x8xf32>
    %c0_64 = arith.constant 0 : index
    %c0_65 = arith.constant 0 : index
    %353 = vector.load %arg9[%c0_64, %c0_65] : memref<2x8xf32, #tpu.memory_space<vmem>>, vector<2x8xf32>
    tpu.vector_store %arg9[%c0_64, %c0_65], %352 {strides = array<i32>} : memref<2x8xf32, #tpu.memory_space<vmem>>, vector<2x8xf32>,
    return
  }
  func.func @transform_0(%arg0: i32) -> (i32, i32, i32) {
    %c0_i32 = arith.constant 0 : i32
    %c0_i32_0 = arith.constant 0 : i32
    %c0_i32_1 = arith.constant 0 : i32
    %c0_i32_2 = arith.constant 0 : i32
    return %c0_i32, %c0_i32_0, %c0_i32_1 : i32, i32, i32
  }
  func.func @transform_1(%arg0: i32) -> (i32, i32) {
    %c0_i32 = arith.constant 0 : i32
    %c0_i32_0 = arith.constant 0 : i32
    %c0_i32_1 = arith.constant 0 : i32
    return %c0_i32, %c0_i32_0 : i32, i32
  }
  func.func @transform_2(%arg0: i32) -> (i32, i32) {
    %c0_i32 = arith.constant 0 : i32
    %c0_i32_0 = arith.constant 0 : i32
    %c0_i32_1 = arith.constant 0 : i32
    return %c0_i32, %c0_i32_0 : i32, i32
  }
  func.func @transform_3(%arg0: i32) -> (i32, i32) {
    %c0_i32 = arith.constant 0 : i32
    %c0_i32_0 = arith.constant 0 : i32
    %c0_i32_1 = arith.constant 0 : i32
    return %c0_i32, %c0_i32_0 : i32, i32
  }
  func.func @transform_4(%arg0: i32) -> (i32, i32) {
    %c0_i32 = arith.constant 0 : i32
    %c0_i32_0 = arith.constant 0 : i32
    %c0_i32_1 = arith.constant 0 : i32
    return %c0_i32, %c0_i32_0 : i32, i32
  }
  func.func @transform_5(%arg0: i32) -> (i32, i32) {
    %c0_i32 = arith.constant 0 : i32
    %c0_i32_0 = arith.constant 0 : i32
    %c0_i32_1 = arith.constant 0 : i32
    return %c0_i32, %c0_i32_0 : i32, i32
  }
  func.func @transform_6(%arg0: i32) -> (i32, i32) {
    %c0_i32 = arith.constant 0 : i32
    %c0_i32_0 = arith.constant 0 : i32
    %c0_i32_1 = arith.constant 0 : i32
    return %c0_i32, %c0_i32_0 : i32, i32
  }
  func.func @transform_7(%arg0: i32) -> (i32, i32) {
    %c0_i32 = arith.constant 0 : i32
    %c0_i32_0 = arith.constant 0 : i32
    %c0_i32_1 = arith.constant 0 : i32
    return %c0_i32, %c0_i32_0 : i32, i32
  }
  func.func @transform_8(%arg0: i32) -> (i32, i32) {
    %c0_i32 = arith.constant 0 : i32
    %c0_i32_0 = arith.constant 0 : i32
    %c0_i32_1 = arith.constant 0 : i32
    return %c0_i32, %c0_i32_0 : i32, i32
  }
}

module attributes {stable_mosaic.version = 11 : i64} {
  func.func @_decoder_kernel(%arg0: i32, %arg1: memref<2x8xf32, #tpu.memory_space<vmem>>, %arg2: memref<1x8x128xf32, #tpu.memory_space<vmem>>, %arg3: memref<1x32x128xf32, #tpu.memory_space<vmem>>, %arg4: memref<1x1x128xf32, #tpu.memory_space<vmem>>, %arg5: memref<1x64x128xf32, #tpu.memory_space<vmem>>, %arg6: memref<1x1x128xf32, #tpu.memory_space<vmem>>, %arg7: memref<48x64xf32, #tpu.memory_space<vmem>>, %arg8: memref<1x64xf32, #tpu.memory_space<vmem>>, %arg9: memref<32x64xf32, #tpu.memory_space<vmem>>, %arg10: memref<1x64xf32, #tpu.memory_space<vmem>>, %arg11: memref<1x8x2x16xf32, #tpu.memory_space<vmem>>) attributes {dimension_semantics = [#tpu.dimension_semantics<parallel>], iteration_bounds = array<i64: 2>, scalar_prefetch = 0 : i64, scratch_operands = 0 : i64, tpu.core_type = #tpu.core_type<tc>, window_params = [{pipeline_mode = #tpu.pipeline_mode<synchronous>, transform_indices = @transform_0, window_bounds = array<i64: 2, 8>}, {transform_indices = @transform_1, window_bounds = array<i64: 1, 8, 128>}, {transform_indices = @transform_2, window_bounds = array<i64: 1, 32, 128>}, {transform_indices = @transform_3, window_bounds = array<i64: 1, 1, 128>}, {transform_indices = @transform_4, window_bounds = array<i64: 1, 64, 128>}, {transform_indices = @transform_5, window_bounds = array<i64: 1, 1, 128>}, {pipeline_mode = #tpu.pipeline_mode<synchronous>, transform_indices = @transform_6, window_bounds = array<i64: 48, 64>}, {pipeline_mode = #tpu.pipeline_mode<synchronous>, transform_indices = @transform_7, window_bounds = array<i64: 1, 64>}, {pipeline_mode = #tpu.pipeline_mode<synchronous>, transform_indices = @transform_8, window_bounds = array<i64: 32, 64>}, {pipeline_mode = #tpu.pipeline_mode<synchronous>, transform_indices = @transform_9, window_bounds = array<i64: 1, 64>}, {transform_indices = @transform_10, window_bounds = array<i64: 1, 8, 2, 16>}]} {
    %c0 = arith.constant 0 : index
    %c0_0 = arith.constant 0 : index
    %c0_1 = arith.constant 0 : index
    %0 = vector.load %arg3[%c0, %c0_0, %c0_1] : memref<1x32x128xf32, #tpu.memory_space<vmem>>, vector<1x32x128xf32>
    %1 = vector.shape_cast %0 : vector<1x32x128xf32> to vector<32x128xf32>
    %c0_2 = arith.constant 0 : index
    %c0_3 = arith.constant 0 : index
    %c0_4 = arith.constant 0 : index
    %2 = vector.load %arg5[%c0_2, %c0_3, %c0_4] : memref<1x64x128xf32, #tpu.memory_space<vmem>>, vector<1x64x128xf32>
    %3 = vector.shape_cast %2 : vector<1x64x128xf32> to vector<64x128xf32>
    %c0_5 = arith.constant 0 : index
    %c0_6 = arith.constant 0 : index
    %4 = vector.load %arg7[%c0_5, %c0_6] : memref<48x64xf32, #tpu.memory_space<vmem>>, vector<48x64xf32>
    %c0_7 = arith.constant 0 : index
    %c0_8 = arith.constant 0 : index
    %5 = vector.load %arg9[%c0_7, %c0_8] : memref<32x64xf32, #tpu.memory_space<vmem>>, vector<32x64xf32>
    %c0_9 = arith.constant 0 : index
    %c0_10 = arith.constant 0 : index
    %c0_11 = arith.constant 0 : index
    %6 = vector.load %arg6[%c0_9, %c0_10, %c0_11] : memref<1x1x128xf32, #tpu.memory_space<vmem>>, vector<1x1x128xf32>
    %7 = vector.shape_cast %6 : vector<1x1x128xf32> to vector<1x128xf32>
    %8 = vector.shape_cast %7 : vector<1x128xf32> to vector<1x128xf32>
    %9 = vector.broadcast %8 : vector<1x128xf32> to vector<2x128xf32>
    %c0_12 = arith.constant 0 : index
    %c0_13 = arith.constant 0 : index
    %10 = vector.load %arg8[%c0_12, %c0_13] : memref<1x64xf32, #tpu.memory_space<vmem>>, vector<1x64xf32>
    %11 = vector.shape_cast %10 : vector<1x64xf32> to vector<1x64xf32>
    %12 = vector.broadcast %11 : vector<1x64xf32> to vector<2x64xf32>
    %c0_14 = arith.constant 0 : index
    %c0_15 = arith.constant 0 : index
    %13 = vector.load %arg10[%c0_14, %c0_15] : memref<1x64xf32, #tpu.memory_space<vmem>>, vector<1x64xf32>
    %14 = vector.shape_cast %13 : vector<1x64xf32> to vector<1x64xf32>
    %15 = vector.broadcast %14 : vector<1x64xf32> to vector<2x64xf32>
    %c0_16 = arith.constant 0 : index
    %c0_17 = arith.constant 0 : index
    %16 = vector.load %arg1[%c0_16, %c0_17] : memref<2x8xf32, #tpu.memory_space<vmem>>, vector<2x8xf32>
    %c0_18 = arith.constant 0 : index
    %c0_19 = arith.constant 0 : index
    %c0_20 = arith.constant 0 : index
    %17 = vector.load %arg2[%c0_18, %c0_19, %c0_20] : memref<1x8x128xf32, #tpu.memory_space<vmem>>, vector<1x8x128xf32>
    %18 = vector.shape_cast %17 : vector<1x8x128xf32> to vector<8x128xf32>
    %cst = arith.constant dense<0.000000e+00> : vector<2x128xf32>
    %19 = tpu.matmul %16, %18, %cst {dimension_numbers = #tpu.dot_dimension_numbers<[1], [0], [0], [1], [0, 0, 1, 1], [], []>} : vector<2x8xf32>, vector<8x128xf32>, vector<2x128xf32> -> vector<2x128xf32>
    %c0_21 = arith.constant 0 : index
    %c0_22 = arith.constant 0 : index
    %c0_23 = arith.constant 0 : index
    %20 = vector.load %arg4[%c0_21, %c0_22, %c0_23] : memref<1x1x128xf32, #tpu.memory_space<vmem>>, vector<1x1x128xf32>
    %21 = vector.shape_cast %20 : vector<1x1x128xf32> to vector<1x128xf32>
    %22 = vector.shape_cast %21 : vector<1x128xf32> to vector<1x128xf32>
    %23 = vector.broadcast %22 : vector<1x128xf32> to vector<2x128xf32>
    %24 = arith.addf %19, %23 : vector<2x128xf32>
    %cst_24 = arith.constant 0.000000e+00 : f32
    %25 = vector.broadcast %cst_24 : f32 to vector<2x32xf32>
    %cst_25 = arith.constant 0.000000e+00 : f32
    %26 = vector.broadcast %cst_25 : f32 to vector<2x16xf32>
    %c0_i32 = arith.constant 0 : i32
    %cst_26 = arith.constant dense<0.000000e+00> : vector<2x128xf32>
    %27 = tpu.matmul %25, %1, %cst_26 {dimension_numbers = #tpu.dot_dimension_numbers<[1], [0], [0], [1], [0, 0, 1, 1], [], []>} : vector<2x32xf32>, vector<32x128xf32>, vector<2x128xf32> -> vector<2x128xf32>
    %28 = arith.addf %24, %27 : vector<2x128xf32>
    %29 = vector.extract_strided_slice %28 {offsets = [0, 0], sizes = [2, 96], strides = [1, 1]} : vector<2x128xf32> to vector<2x96xf32>
    %30 = arith.negf %29 : vector<2x96xf32>
    %31 = math.exp %30 : vector<2x96xf32>
    %cst_27 = arith.constant 1.000000e+00 : f32
    %32 = vector.broadcast %cst_27 : f32 to vector<2x96xf32>
    %33 = arith.addf %32, %31 : vector<2x96xf32>
    %34 = arith.divf %32, %33 : vector<2x96xf32>
    %35 = vector.extract_strided_slice %34 {offsets = [0, 0], sizes = [2, 32], strides = [1, 1]} : vector<2x96xf32> to vector<2x32xf32>
    %36 = vector.extract_strided_slice %34 {offsets = [0, 32], sizes = [2, 32], strides = [1, 1]} : vector<2x96xf32> to vector<2x32xf32>
    %37 = vector.extract_strided_slice %34 {offsets = [0, 64], sizes = [2, 32], strides = [1, 1]} : vector<2x96xf32> to vector<2x32xf32>
    %38 = vector.extract_strided_slice %28 {offsets = [0, 96], sizes = [2, 32], strides = [1, 1]} : vector<2x128xf32> to vector<2x32xf32>
    %39 = math.tanh %38 : vector<2x32xf32>
    %40 = arith.mulf %36, %25 : vector<2x32xf32>
    %41 = arith.mulf %35, %39 : vector<2x32xf32>
    %42 = arith.addf %40, %41 : vector<2x32xf32>
    %43 = math.tanh %42 : vector<2x32xf32>
    %44 = arith.mulf %37, %43 : vector<2x32xf32>
    %45 = tpu.concatenate %44, %25 in 1 : vector<2x32xf32>, vector<2x32xf32> -> vector<2x64xf32>
    %cst_28 = arith.constant dense<0.000000e+00> : vector<2x128xf32>
    %46 = tpu.matmul %45, %3, %cst_28 {dimension_numbers = #tpu.dot_dimension_numbers<[1], [0], [0], [1], [0, 0, 1, 1], [], []>} : vector<2x64xf32>, vector<64x128xf32>, vector<2x128xf32> -> vector<2x128xf32>
    %47 = arith.addf %46, %9 : vector<2x128xf32>
    %48 = vector.extract_strided_slice %47 {offsets = [0, 0], sizes = [2, 96], strides = [1, 1]} : vector<2x128xf32> to vector<2x96xf32>
    %49 = arith.negf %48 : vector<2x96xf32>
    %50 = math.exp %49 : vector<2x96xf32>
    %cst_29 = arith.constant 1.000000e+00 : f32
    %51 = vector.broadcast %cst_29 : f32 to vector<2x96xf32>
    %52 = arith.addf %51, %50 : vector<2x96xf32>
    %53 = arith.divf %51, %52 : vector<2x96xf32>
    %54 = vector.extract_strided_slice %53 {offsets = [0, 0], sizes = [2, 32], strides = [1, 1]} : vector<2x96xf32> to vector<2x32xf32>
    %55 = vector.extract_strided_slice %53 {offsets = [0, 32], sizes = [2, 32], strides = [1, 1]} : vector<2x96xf32> to vector<2x32xf32>
    %56 = vector.extract_strided_slice %53 {offsets = [0, 64], sizes = [2, 32], strides = [1, 1]} : vector<2x96xf32> to vector<2x32xf32>
    %57 = vector.extract_strided_slice %47 {offsets = [0, 96], sizes = [2, 32], strides = [1, 1]} : vector<2x128xf32> to vector<2x32xf32>
    %58 = math.tanh %57 : vector<2x32xf32>
    %59 = arith.mulf %55, %25 : vector<2x32xf32>
    %60 = arith.mulf %54, %58 : vector<2x32xf32>
    %61 = arith.addf %59, %60 : vector<2x32xf32>
    %62 = math.tanh %61 : vector<2x32xf32>
    %63 = arith.mulf %56, %62 : vector<2x32xf32>
    %64 = math.tanh %63 : vector<2x32xf32>
    %65 = tpu.concatenate %64, %26 in 1 : vector<2x32xf32>, vector<2x16xf32> -> vector<2x48xf32>
    %cst_30 = arith.constant dense<0.000000e+00> : vector<2x64xf32>
    %66 = tpu.matmul %65, %4, %cst_30 {dimension_numbers = #tpu.dot_dimension_numbers<[1], [0], [0], [1], [0, 0, 1, 1], [], []>} : vector<2x48xf32>, vector<48x64xf32>, vector<2x64xf32> -> vector<2x64xf32>
    %67 = arith.addf %66, %12 : vector<2x64xf32>
    %68 = vector.extract_strided_slice %67 {offsets = [0, 0], sizes = [2, 48], strides = [1, 1]} : vector<2x64xf32> to vector<2x48xf32>
    %69 = arith.negf %68 : vector<2x48xf32>
    %70 = math.exp %69 : vector<2x48xf32>
    %cst_31 = arith.constant 1.000000e+00 : f32
    %71 = vector.broadcast %cst_31 : f32 to vector<2x48xf32>
    %72 = arith.addf %71, %70 : vector<2x48xf32>
    %73 = arith.divf %71, %72 : vector<2x48xf32>
    %74 = vector.extract_strided_slice %73 {offsets = [0, 0], sizes = [2, 16], strides = [1, 1]} : vector<2x48xf32> to vector<2x16xf32>
    %75 = vector.extract_strided_slice %73 {offsets = [0, 16], sizes = [2, 16], strides = [1, 1]} : vector<2x48xf32> to vector<2x16xf32>
    %76 = vector.extract_strided_slice %73 {offsets = [0, 32], sizes = [2, 16], strides = [1, 1]} : vector<2x48xf32> to vector<2x16xf32>
    %77 = vector.extract_strided_slice %67 {offsets = [0, 48], sizes = [2, 16], strides = [1, 1]} : vector<2x64xf32> to vector<2x16xf32>
    %78 = math.tanh %77 : vector<2x16xf32>
    %79 = arith.mulf %75, %26 : vector<2x16xf32>
    %80 = arith.mulf %74, %78 : vector<2x16xf32>
    %81 = arith.addf %79, %80 : vector<2x16xf32>
    %82 = math.tanh %81 : vector<2x16xf32>
    %83 = arith.mulf %76, %82 : vector<2x16xf32>
    %84 = tpu.concatenate %83, %26 in 1 : vector<2x16xf32>, vector<2x16xf32> -> vector<2x32xf32>
    %cst_32 = arith.constant dense<0.000000e+00> : vector<2x64xf32>
    %85 = tpu.matmul %84, %5, %cst_32 {dimension_numbers = #tpu.dot_dimension_numbers<[1], [0], [0], [1], [0, 0, 1, 1], [], []>} : vector<2x32xf32>, vector<32x64xf32>, vector<2x64xf32> -> vector<2x64xf32>
    %86 = arith.addf %85, %15 : vector<2x64xf32>
    %87 = vector.extract_strided_slice %86 {offsets = [0, 0], sizes = [2, 48], strides = [1, 1]} : vector<2x64xf32> to vector<2x48xf32>
    %88 = arith.negf %87 : vector<2x48xf32>
    %89 = math.exp %88 : vector<2x48xf32>
    %cst_33 = arith.constant 1.000000e+00 : f32
    %90 = vector.broadcast %cst_33 : f32 to vector<2x48xf32>
    %91 = arith.addf %90, %89 : vector<2x48xf32>
    %92 = arith.divf %90, %91 : vector<2x48xf32>
    %93 = vector.extract_strided_slice %92 {offsets = [0, 0], sizes = [2, 16], strides = [1, 1]} : vector<2x48xf32> to vector<2x16xf32>
    %94 = vector.extract_strided_slice %92 {offsets = [0, 16], sizes = [2, 16], strides = [1, 1]} : vector<2x48xf32> to vector<2x16xf32>
    %95 = vector.extract_strided_slice %92 {offsets = [0, 32], sizes = [2, 16], strides = [1, 1]} : vector<2x48xf32> to vector<2x16xf32>
    %96 = vector.extract_strided_slice %86 {offsets = [0, 48], sizes = [2, 16], strides = [1, 1]} : vector<2x64xf32> to vector<2x16xf32>
    %97 = math.tanh %96 : vector<2x16xf32>
    %98 = arith.mulf %94, %26 : vector<2x16xf32>
    %99 = arith.mulf %93, %97 : vector<2x16xf32>
    %100 = arith.addf %98, %99 : vector<2x16xf32>
    %101 = math.tanh %100 : vector<2x16xf32>
    %102 = arith.mulf %95, %101 : vector<2x16xf32>
    %103 = math.tanh %102 : vector<2x16xf32>
    %c0_34 = arith.constant 0 : index
    %104 = arith.index_cast %c0_i32 : i32 to index
    %c0_35 = arith.constant 0 : index
    %c0_36 = arith.constant 0 : index
    %105 = vector.load %arg11[%c0_34, %104, %c0_35, %c0_36] : memref<1x8x2x16xf32, #tpu.memory_space<vmem>>, vector<1x1x2x16xf32>
    %106 = vector.shape_cast %105 : vector<1x1x2x16xf32> to vector<2x16xf32>
    %107 = vector.shape_cast %103 : vector<2x16xf32> to vector<1x1x2x16xf32>
    tpu.vector_store %arg11[%c0_34, %104, %c0_35, %c0_36], %107 {strides = array<i32>} : memref<1x8x2x16xf32, #tpu.memory_space<vmem>>, vector<1x1x2x16xf32>,
    %c1_i32 = arith.constant 1 : i32
    %cst_37 = arith.constant dense<0.000000e+00> : vector<2x128xf32>
    %108 = tpu.matmul %44, %1, %cst_37 {dimension_numbers = #tpu.dot_dimension_numbers<[1], [0], [0], [1], [0, 0, 1, 1], [], []>} : vector<2x32xf32>, vector<32x128xf32>, vector<2x128xf32> -> vector<2x128xf32>
    %109 = arith.addf %24, %108 : vector<2x128xf32>
    %110 = vector.extract_strided_slice %109 {offsets = [0, 0], sizes = [2, 96], strides = [1, 1]} : vector<2x128xf32> to vector<2x96xf32>
    %111 = arith.negf %110 : vector<2x96xf32>
    %112 = math.exp %111 : vector<2x96xf32>
    %cst_38 = arith.constant 1.000000e+00 : f32
    %113 = vector.broadcast %cst_38 : f32 to vector<2x96xf32>
    %114 = arith.addf %113, %112 : vector<2x96xf32>
    %115 = arith.divf %113, %114 : vector<2x96xf32>
    %116 = vector.extract_strided_slice %115 {offsets = [0, 0], sizes = [2, 32], strides = [1, 1]} : vector<2x96xf32> to vector<2x32xf32>
    %117 = vector.extract_strided_slice %115 {offsets = [0, 32], sizes = [2, 32], strides = [1, 1]} : vector<2x96xf32> to vector<2x32xf32>
    %118 = vector.extract_strided_slice %115 {offsets = [0, 64], sizes = [2, 32], strides = [1, 1]} : vector<2x96xf32> to vector<2x32xf32>
    %119 = vector.extract_strided_slice %109 {offsets = [0, 96], sizes = [2, 32], strides = [1, 1]} : vector<2x128xf32> to vector<2x32xf32>
    %120 = math.tanh %119 : vector<2x32xf32>
    %121 = arith.mulf %117, %42 : vector<2x32xf32>
    %122 = arith.mulf %116, %120 : vector<2x32xf32>
    %123 = arith.addf %121, %122 : vector<2x32xf32>
    %124 = math.tanh %123 : vector<2x32xf32>
    %125 = arith.mulf %118, %124 : vector<2x32xf32>
    %126 = tpu.concatenate %125, %63 in 1 : vector<2x32xf32>, vector<2x32xf32> -> vector<2x64xf32>
    %cst_39 = arith.constant dense<0.000000e+00> : vector<2x128xf32>
    %127 = tpu.matmul %126, %3, %cst_39 {dimension_numbers = #tpu.dot_dimension_numbers<[1], [0], [0], [1], [0, 0, 1, 1], [], []>} : vector<2x64xf32>, vector<64x128xf32>, vector<2x128xf32> -> vector<2x128xf32>
    %128 = arith.addf %127, %9 : vector<2x128xf32>
    %129 = vector.extract_strided_slice %128 {offsets = [0, 0], sizes = [2, 96], strides = [1, 1]} : vector<2x128xf32> to vector<2x96xf32>
    %130 = arith.negf %129 : vector<2x96xf32>
    %131 = math.exp %130 : vector<2x96xf32>
    %cst_40 = arith.constant 1.000000e+00 : f32
    %132 = vector.broadcast %cst_40 : f32 to vector<2x96xf32>
    %133 = arith.addf %132, %131 : vector<2x96xf32>
    %134 = arith.divf %132, %133 : vector<2x96xf32>
    %135 = vector.extract_strided_slice %134 {offsets = [0, 0], sizes = [2, 32], strides = [1, 1]} : vector<2x96xf32> to vector<2x32xf32>
    %136 = vector.extract_strided_slice %134 {offsets = [0, 32], sizes = [2, 32], strides = [1, 1]} : vector<2x96xf32> to vector<2x32xf32>
    %137 = vector.extract_strided_slice %134 {offsets = [0, 64], sizes = [2, 32], strides = [1, 1]} : vector<2x96xf32> to vector<2x32xf32>
    %138 = vector.extract_strided_slice %128 {offsets = [0, 96], sizes = [2, 32], strides = [1, 1]} : vector<2x128xf32> to vector<2x32xf32>
    %139 = math.tanh %138 : vector<2x32xf32>
    %140 = arith.mulf %136, %61 : vector<2x32xf32>
    %141 = arith.mulf %135, %139 : vector<2x32xf32>
    %142 = arith.addf %140, %141 : vector<2x32xf32>
    %143 = math.tanh %142 : vector<2x32xf32>
    %144 = arith.mulf %137, %143 : vector<2x32xf32>
    %145 = math.tanh %144 : vector<2x32xf32>
    %146 = tpu.concatenate %145, %83 in 1 : vector<2x32xf32>, vector<2x16xf32> -> vector<2x48xf32>
    %cst_41 = arith.constant dense<0.000000e+00> : vector<2x64xf32>
    %147 = tpu.matmul %146, %4, %cst_41 {dimension_numbers = #tpu.dot_dimension_numbers<[1], [0], [0], [1], [0, 0, 1, 1], [], []>} : vector<2x48xf32>, vector<48x64xf32>, vector<2x64xf32> -> vector<2x64xf32>
    %148 = arith.addf %147, %12 : vector<2x64xf32>
    %149 = vector.extract_strided_slice %148 {offsets = [0, 0], sizes = [2, 48], strides = [1, 1]} : vector<2x64xf32> to vector<2x48xf32>
    %150 = arith.negf %149 : vector<2x48xf32>
    %151 = math.exp %150 : vector<2x48xf32>
    %cst_42 = arith.constant 1.000000e+00 : f32
    %152 = vector.broadcast %cst_42 : f32 to vector<2x48xf32>
    %153 = arith.addf %152, %151 : vector<2x48xf32>
    %154 = arith.divf %152, %153 : vector<2x48xf32>
    %155 = vector.extract_strided_slice %154 {offsets = [0, 0], sizes = [2, 16], strides = [1, 1]} : vector<2x48xf32> to vector<2x16xf32>
    %156 = vector.extract_strided_slice %154 {offsets = [0, 16], sizes = [2, 16], strides = [1, 1]} : vector<2x48xf32> to vector<2x16xf32>
    %157 = vector.extract_strided_slice %154 {offsets = [0, 32], sizes = [2, 16], strides = [1, 1]} : vector<2x48xf32> to vector<2x16xf32>
    %158 = vector.extract_strided_slice %148 {offsets = [0, 48], sizes = [2, 16], strides = [1, 1]} : vector<2x64xf32> to vector<2x16xf32>
    %159 = math.tanh %158 : vector<2x16xf32>
    %160 = arith.mulf %156, %81 : vector<2x16xf32>
    %161 = arith.mulf %155, %159 : vector<2x16xf32>
    %162 = arith.addf %160, %161 : vector<2x16xf32>
    %163 = math.tanh %162 : vector<2x16xf32>
    %164 = arith.mulf %157, %163 : vector<2x16xf32>
    %165 = tpu.concatenate %164, %102 in 1 : vector<2x16xf32>, vector<2x16xf32> -> vector<2x32xf32>
    %cst_43 = arith.constant dense<0.000000e+00> : vector<2x64xf32>
    %166 = tpu.matmul %165, %5, %cst_43 {dimension_numbers = #tpu.dot_dimension_numbers<[1], [0], [0], [1], [0, 0, 1, 1], [], []>} : vector<2x32xf32>, vector<32x64xf32>, vector<2x64xf32> -> vector<2x64xf32>
    %167 = arith.addf %166, %15 : vector<2x64xf32>
    %168 = vector.extract_strided_slice %167 {offsets = [0, 0], sizes = [2, 48], strides = [1, 1]} : vector<2x64xf32> to vector<2x48xf32>
    %169 = arith.negf %168 : vector<2x48xf32>
    %170 = math.exp %169 : vector<2x48xf32>
    %cst_44 = arith.constant 1.000000e+00 : f32
    %171 = vector.broadcast %cst_44 : f32 to vector<2x48xf32>
    %172 = arith.addf %171, %170 : vector<2x48xf32>
    %173 = arith.divf %171, %172 : vector<2x48xf32>
    %174 = vector.extract_strided_slice %173 {offsets = [0, 0], sizes = [2, 16], strides = [1, 1]} : vector<2x48xf32> to vector<2x16xf32>
    %175 = vector.extract_strided_slice %173 {offsets = [0, 16], sizes = [2, 16], strides = [1, 1]} : vector<2x48xf32> to vector<2x16xf32>
    %176 = vector.extract_strided_slice %173 {offsets = [0, 32], sizes = [2, 16], strides = [1, 1]} : vector<2x48xf32> to vector<2x16xf32>
    %177 = vector.extract_strided_slice %167 {offsets = [0, 48], sizes = [2, 16], strides = [1, 1]} : vector<2x64xf32> to vector<2x16xf32>
    %178 = math.tanh %177 : vector<2x16xf32>
    %179 = arith.mulf %175, %100 : vector<2x16xf32>
    %180 = arith.mulf %174, %178 : vector<2x16xf32>
    %181 = arith.addf %179, %180 : vector<2x16xf32>
    %182 = math.tanh %181 : vector<2x16xf32>
    %183 = arith.mulf %176, %182 : vector<2x16xf32>
    %184 = math.tanh %183 : vector<2x16xf32>
    %c0_45 = arith.constant 0 : index
    %185 = arith.index_cast %c1_i32 : i32 to index
    %c0_46 = arith.constant 0 : index
    %c0_47 = arith.constant 0 : index
    %186 = vector.load %arg11[%c0_45, %185, %c0_46, %c0_47] : memref<1x8x2x16xf32, #tpu.memory_space<vmem>>, vector<1x1x2x16xf32>
    %187 = vector.shape_cast %186 : vector<1x1x2x16xf32> to vector<2x16xf32>
    %188 = vector.shape_cast %184 : vector<2x16xf32> to vector<1x1x2x16xf32>
    tpu.vector_store %arg11[%c0_45, %185, %c0_46, %c0_47], %188 {strides = array<i32>} : memref<1x8x2x16xf32, #tpu.memory_space<vmem>>, vector<1x1x2x16xf32>,
    %c2_i32 = arith.constant 2 : i32
    %cst_48 = arith.constant dense<0.000000e+00> : vector<2x128xf32>
    %189 = tpu.matmul %125, %1, %cst_48 {dimension_numbers = #tpu.dot_dimension_numbers<[1], [0], [0], [1], [0, 0, 1, 1], [], []>} : vector<2x32xf32>, vector<32x128xf32>, vector<2x128xf32> -> vector<2x128xf32>
    %190 = arith.addf %24, %189 : vector<2x128xf32>
    %191 = vector.extract_strided_slice %190 {offsets = [0, 0], sizes = [2, 96], strides = [1, 1]} : vector<2x128xf32> to vector<2x96xf32>
    %192 = arith.negf %191 : vector<2x96xf32>
    %193 = math.exp %192 : vector<2x96xf32>
    %cst_49 = arith.constant 1.000000e+00 : f32
    %194 = vector.broadcast %cst_49 : f32 to vector<2x96xf32>
    %195 = arith.addf %194, %193 : vector<2x96xf32>
    %196 = arith.divf %194, %195 : vector<2x96xf32>
    %197 = vector.extract_strided_slice %196 {offsets = [0, 0], sizes = [2, 32], strides = [1, 1]} : vector<2x96xf32> to vector<2x32xf32>
    %198 = vector.extract_strided_slice %196 {offsets = [0, 32], sizes = [2, 32], strides = [1, 1]} : vector<2x96xf32> to vector<2x32xf32>
    %199 = vector.extract_strided_slice %196 {offsets = [0, 64], sizes = [2, 32], strides = [1, 1]} : vector<2x96xf32> to vector<2x32xf32>
    %200 = vector.extract_strided_slice %190 {offsets = [0, 96], sizes = [2, 32], strides = [1, 1]} : vector<2x128xf32> to vector<2x32xf32>
    %201 = math.tanh %200 : vector<2x32xf32>
    %202 = arith.mulf %198, %123 : vector<2x32xf32>
    %203 = arith.mulf %197, %201 : vector<2x32xf32>
    %204 = arith.addf %202, %203 : vector<2x32xf32>
    %205 = math.tanh %204 : vector<2x32xf32>
    %206 = arith.mulf %199, %205 : vector<2x32xf32>
    %207 = tpu.concatenate %206, %144 in 1 : vector<2x32xf32>, vector<2x32xf32> -> vector<2x64xf32>
    %cst_50 = arith.constant dense<0.000000e+00> : vector<2x128xf32>
    %208 = tpu.matmul %207, %3, %cst_50 {dimension_numbers = #tpu.dot_dimension_numbers<[1], [0], [0], [1], [0, 0, 1, 1], [], []>} : vector<2x64xf32>, vector<64x128xf32>, vector<2x128xf32> -> vector<2x128xf32>
    %209 = arith.addf %208, %9 : vector<2x128xf32>
    %210 = vector.extract_strided_slice %209 {offsets = [0, 0], sizes = [2, 96], strides = [1, 1]} : vector<2x128xf32> to vector<2x96xf32>
    %211 = arith.negf %210 : vector<2x96xf32>
    %212 = math.exp %211 : vector<2x96xf32>
    %cst_51 = arith.constant 1.000000e+00 : f32
    %213 = vector.broadcast %cst_51 : f32 to vector<2x96xf32>
    %214 = arith.addf %213, %212 : vector<2x96xf32>
    %215 = arith.divf %213, %214 : vector<2x96xf32>
    %216 = vector.extract_strided_slice %215 {offsets = [0, 0], sizes = [2, 32], strides = [1, 1]} : vector<2x96xf32> to vector<2x32xf32>
    %217 = vector.extract_strided_slice %215 {offsets = [0, 32], sizes = [2, 32], strides = [1, 1]} : vector<2x96xf32> to vector<2x32xf32>
    %218 = vector.extract_strided_slice %215 {offsets = [0, 64], sizes = [2, 32], strides = [1, 1]} : vector<2x96xf32> to vector<2x32xf32>
    %219 = vector.extract_strided_slice %209 {offsets = [0, 96], sizes = [2, 32], strides = [1, 1]} : vector<2x128xf32> to vector<2x32xf32>
    %220 = math.tanh %219 : vector<2x32xf32>
    %221 = arith.mulf %217, %142 : vector<2x32xf32>
    %222 = arith.mulf %216, %220 : vector<2x32xf32>
    %223 = arith.addf %221, %222 : vector<2x32xf32>
    %224 = math.tanh %223 : vector<2x32xf32>
    %225 = arith.mulf %218, %224 : vector<2x32xf32>
    %226 = math.tanh %225 : vector<2x32xf32>
    %227 = tpu.concatenate %226, %164 in 1 : vector<2x32xf32>, vector<2x16xf32> -> vector<2x48xf32>
    %cst_52 = arith.constant dense<0.000000e+00> : vector<2x64xf32>
    %228 = tpu.matmul %227, %4, %cst_52 {dimension_numbers = #tpu.dot_dimension_numbers<[1], [0], [0], [1], [0, 0, 1, 1], [], []>} : vector<2x48xf32>, vector<48x64xf32>, vector<2x64xf32> -> vector<2x64xf32>
    %229 = arith.addf %228, %12 : vector<2x64xf32>
    %230 = vector.extract_strided_slice %229 {offsets = [0, 0], sizes = [2, 48], strides = [1, 1]} : vector<2x64xf32> to vector<2x48xf32>
    %231 = arith.negf %230 : vector<2x48xf32>
    %232 = math.exp %231 : vector<2x48xf32>
    %cst_53 = arith.constant 1.000000e+00 : f32
    %233 = vector.broadcast %cst_53 : f32 to vector<2x48xf32>
    %234 = arith.addf %233, %232 : vector<2x48xf32>
    %235 = arith.divf %233, %234 : vector<2x48xf32>
    %236 = vector.extract_strided_slice %235 {offsets = [0, 0], sizes = [2, 16], strides = [1, 1]} : vector<2x48xf32> to vector<2x16xf32>
    %237 = vector.extract_strided_slice %235 {offsets = [0, 16], sizes = [2, 16], strides = [1, 1]} : vector<2x48xf32> to vector<2x16xf32>
    %238 = vector.extract_strided_slice %235 {offsets = [0, 32], sizes = [2, 16], strides = [1, 1]} : vector<2x48xf32> to vector<2x16xf32>
    %239 = vector.extract_strided_slice %229 {offsets = [0, 48], sizes = [2, 16], strides = [1, 1]} : vector<2x64xf32> to vector<2x16xf32>
    %240 = math.tanh %239 : vector<2x16xf32>
    %241 = arith.mulf %237, %162 : vector<2x16xf32>
    %242 = arith.mulf %236, %240 : vector<2x16xf32>
    %243 = arith.addf %241, %242 : vector<2x16xf32>
    %244 = math.tanh %243 : vector<2x16xf32>
    %245 = arith.mulf %238, %244 : vector<2x16xf32>
    %246 = tpu.concatenate %245, %183 in 1 : vector<2x16xf32>, vector<2x16xf32> -> vector<2x32xf32>
    %cst_54 = arith.constant dense<0.000000e+00> : vector<2x64xf32>
    %247 = tpu.matmul %246, %5, %cst_54 {dimension_numbers = #tpu.dot_dimension_numbers<[1], [0], [0], [1], [0, 0, 1, 1], [], []>} : vector<2x32xf32>, vector<32x64xf32>, vector<2x64xf32> -> vector<2x64xf32>
    %248 = arith.addf %247, %15 : vector<2x64xf32>
    %249 = vector.extract_strided_slice %248 {offsets = [0, 0], sizes = [2, 48], strides = [1, 1]} : vector<2x64xf32> to vector<2x48xf32>
    %250 = arith.negf %249 : vector<2x48xf32>
    %251 = math.exp %250 : vector<2x48xf32>
    %cst_55 = arith.constant 1.000000e+00 : f32
    %252 = vector.broadcast %cst_55 : f32 to vector<2x48xf32>
    %253 = arith.addf %252, %251 : vector<2x48xf32>
    %254 = arith.divf %252, %253 : vector<2x48xf32>
    %255 = vector.extract_strided_slice %254 {offsets = [0, 0], sizes = [2, 16], strides = [1, 1]} : vector<2x48xf32> to vector<2x16xf32>
    %256 = vector.extract_strided_slice %254 {offsets = [0, 16], sizes = [2, 16], strides = [1, 1]} : vector<2x48xf32> to vector<2x16xf32>
    %257 = vector.extract_strided_slice %254 {offsets = [0, 32], sizes = [2, 16], strides = [1, 1]} : vector<2x48xf32> to vector<2x16xf32>
    %258 = vector.extract_strided_slice %248 {offsets = [0, 48], sizes = [2, 16], strides = [1, 1]} : vector<2x64xf32> to vector<2x16xf32>
    %259 = math.tanh %258 : vector<2x16xf32>
    %260 = arith.mulf %256, %181 : vector<2x16xf32>
    %261 = arith.mulf %255, %259 : vector<2x16xf32>
    %262 = arith.addf %260, %261 : vector<2x16xf32>
    %263 = math.tanh %262 : vector<2x16xf32>
    %264 = arith.mulf %257, %263 : vector<2x16xf32>
    %265 = math.tanh %264 : vector<2x16xf32>
    %c0_56 = arith.constant 0 : index
    %266 = arith.index_cast %c2_i32 : i32 to index
    %c0_57 = arith.constant 0 : index
    %c0_58 = arith.constant 0 : index
    %267 = vector.load %arg11[%c0_56, %266, %c0_57, %c0_58] : memref<1x8x2x16xf32, #tpu.memory_space<vmem>>, vector<1x1x2x16xf32>
    %268 = vector.shape_cast %267 : vector<1x1x2x16xf32> to vector<2x16xf32>
    %269 = vector.shape_cast %265 : vector<2x16xf32> to vector<1x1x2x16xf32>
    tpu.vector_store %arg11[%c0_56, %266, %c0_57, %c0_58], %269 {strides = array<i32>} : memref<1x8x2x16xf32, #tpu.memory_space<vmem>>, vector<1x1x2x16xf32>,
    %c3_i32 = arith.constant 3 : i32
    %cst_59 = arith.constant dense<0.000000e+00> : vector<2x128xf32>
    %270 = tpu.matmul %206, %1, %cst_59 {dimension_numbers = #tpu.dot_dimension_numbers<[1], [0], [0], [1], [0, 0, 1, 1], [], []>} : vector<2x32xf32>, vector<32x128xf32>, vector<2x128xf32> -> vector<2x128xf32>
    %271 = arith.addf %24, %270 : vector<2x128xf32>
    %272 = vector.extract_strided_slice %271 {offsets = [0, 0], sizes = [2, 96], strides = [1, 1]} : vector<2x128xf32> to vector<2x96xf32>
    %273 = arith.negf %272 : vector<2x96xf32>
    %274 = math.exp %273 : vector<2x96xf32>
    %cst_60 = arith.constant 1.000000e+00 : f32
    %275 = vector.broadcast %cst_60 : f32 to vector<2x96xf32>
    %276 = arith.addf %275, %274 : vector<2x96xf32>
    %277 = arith.divf %275, %276 : vector<2x96xf32>
    %278 = vector.extract_strided_slice %277 {offsets = [0, 0], sizes = [2, 32], strides = [1, 1]} : vector<2x96xf32> to vector<2x32xf32>
    %279 = vector.extract_strided_slice %277 {offsets = [0, 32], sizes = [2, 32], strides = [1, 1]} : vector<2x96xf32> to vector<2x32xf32>
    %280 = vector.extract_strided_slice %277 {offsets = [0, 64], sizes = [2, 32], strides = [1, 1]} : vector<2x96xf32> to vector<2x32xf32>
    %281 = vector.extract_strided_slice %271 {offsets = [0, 96], sizes = [2, 32], strides = [1, 1]} : vector<2x128xf32> to vector<2x32xf32>
    %282 = math.tanh %281 : vector<2x32xf32>
    %283 = arith.mulf %279, %204 : vector<2x32xf32>
    %284 = arith.mulf %278, %282 : vector<2x32xf32>
    %285 = arith.addf %283, %284 : vector<2x32xf32>
    %286 = math.tanh %285 : vector<2x32xf32>
    %287 = arith.mulf %280, %286 : vector<2x32xf32>
    %288 = tpu.concatenate %287, %225 in 1 : vector<2x32xf32>, vector<2x32xf32> -> vector<2x64xf32>
    %cst_61 = arith.constant dense<0.000000e+00> : vector<2x128xf32>
    %289 = tpu.matmul %288, %3, %cst_61 {dimension_numbers = #tpu.dot_dimension_numbers<[1], [0], [0], [1], [0, 0, 1, 1], [], []>} : vector<2x64xf32>, vector<64x128xf32>, vector<2x128xf32> -> vector<2x128xf32>
    %290 = arith.addf %289, %9 : vector<2x128xf32>
    %291 = vector.extract_strided_slice %290 {offsets = [0, 0], sizes = [2, 96], strides = [1, 1]} : vector<2x128xf32> to vector<2x96xf32>
    %292 = arith.negf %291 : vector<2x96xf32>
    %293 = math.exp %292 : vector<2x96xf32>
    %cst_62 = arith.constant 1.000000e+00 : f32
    %294 = vector.broadcast %cst_62 : f32 to vector<2x96xf32>
    %295 = arith.addf %294, %293 : vector<2x96xf32>
    %296 = arith.divf %294, %295 : vector<2x96xf32>
    %297 = vector.extract_strided_slice %296 {offsets = [0, 0], sizes = [2, 32], strides = [1, 1]} : vector<2x96xf32> to vector<2x32xf32>
    %298 = vector.extract_strided_slice %296 {offsets = [0, 32], sizes = [2, 32], strides = [1, 1]} : vector<2x96xf32> to vector<2x32xf32>
    %299 = vector.extract_strided_slice %296 {offsets = [0, 64], sizes = [2, 32], strides = [1, 1]} : vector<2x96xf32> to vector<2x32xf32>
    %300 = vector.extract_strided_slice %290 {offsets = [0, 96], sizes = [2, 32], strides = [1, 1]} : vector<2x128xf32> to vector<2x32xf32>
    %301 = math.tanh %300 : vector<2x32xf32>
    %302 = arith.mulf %298, %223 : vector<2x32xf32>
    %303 = arith.mulf %297, %301 : vector<2x32xf32>
    %304 = arith.addf %302, %303 : vector<2x32xf32>
    %305 = math.tanh %304 : vector<2x32xf32>
    %306 = arith.mulf %299, %305 : vector<2x32xf32>
    %307 = math.tanh %306 : vector<2x32xf32>
    %308 = tpu.concatenate %307, %245 in 1 : vector<2x32xf32>, vector<2x16xf32> -> vector<2x48xf32>
    %cst_63 = arith.constant dense<0.000000e+00> : vector<2x64xf32>
    %309 = tpu.matmul %308, %4, %cst_63 {dimension_numbers = #tpu.dot_dimension_numbers<[1], [0], [0], [1], [0, 0, 1, 1], [], []>} : vector<2x48xf32>, vector<48x64xf32>, vector<2x64xf32> -> vector<2x64xf32>
    %310 = arith.addf %309, %12 : vector<2x64xf32>
    %311 = vector.extract_strided_slice %310 {offsets = [0, 0], sizes = [2, 48], strides = [1, 1]} : vector<2x64xf32> to vector<2x48xf32>
    %312 = arith.negf %311 : vector<2x48xf32>
    %313 = math.exp %312 : vector<2x48xf32>
    %cst_64 = arith.constant 1.000000e+00 : f32
    %314 = vector.broadcast %cst_64 : f32 to vector<2x48xf32>
    %315 = arith.addf %314, %313 : vector<2x48xf32>
    %316 = arith.divf %314, %315 : vector<2x48xf32>
    %317 = vector.extract_strided_slice %316 {offsets = [0, 0], sizes = [2, 16], strides = [1, 1]} : vector<2x48xf32> to vector<2x16xf32>
    %318 = vector.extract_strided_slice %316 {offsets = [0, 16], sizes = [2, 16], strides = [1, 1]} : vector<2x48xf32> to vector<2x16xf32>
    %319 = vector.extract_strided_slice %316 {offsets = [0, 32], sizes = [2, 16], strides = [1, 1]} : vector<2x48xf32> to vector<2x16xf32>
    %320 = vector.extract_strided_slice %310 {offsets = [0, 48], sizes = [2, 16], strides = [1, 1]} : vector<2x64xf32> to vector<2x16xf32>
    %321 = math.tanh %320 : vector<2x16xf32>
    %322 = arith.mulf %318, %243 : vector<2x16xf32>
    %323 = arith.mulf %317, %321 : vector<2x16xf32>
    %324 = arith.addf %322, %323 : vector<2x16xf32>
    %325 = math.tanh %324 : vector<2x16xf32>
    %326 = arith.mulf %319, %325 : vector<2x16xf32>
    %327 = tpu.concatenate %326, %264 in 1 : vector<2x16xf32>, vector<2x16xf32> -> vector<2x32xf32>
    %cst_65 = arith.constant dense<0.000000e+00> : vector<2x64xf32>
    %328 = tpu.matmul %327, %5, %cst_65 {dimension_numbers = #tpu.dot_dimension_numbers<[1], [0], [0], [1], [0, 0, 1, 1], [], []>} : vector<2x32xf32>, vector<32x64xf32>, vector<2x64xf32> -> vector<2x64xf32>
    %329 = arith.addf %328, %15 : vector<2x64xf32>
    %330 = vector.extract_strided_slice %329 {offsets = [0, 0], sizes = [2, 48], strides = [1, 1]} : vector<2x64xf32> to vector<2x48xf32>
    %331 = arith.negf %330 : vector<2x48xf32>
    %332 = math.exp %331 : vector<2x48xf32>
    %cst_66 = arith.constant 1.000000e+00 : f32
    %333 = vector.broadcast %cst_66 : f32 to vector<2x48xf32>
    %334 = arith.addf %333, %332 : vector<2x48xf32>
    %335 = arith.divf %333, %334 : vector<2x48xf32>
    %336 = vector.extract_strided_slice %335 {offsets = [0, 0], sizes = [2, 16], strides = [1, 1]} : vector<2x48xf32> to vector<2x16xf32>
    %337 = vector.extract_strided_slice %335 {offsets = [0, 16], sizes = [2, 16], strides = [1, 1]} : vector<2x48xf32> to vector<2x16xf32>
    %338 = vector.extract_strided_slice %335 {offsets = [0, 32], sizes = [2, 16], strides = [1, 1]} : vector<2x48xf32> to vector<2x16xf32>
    %339 = vector.extract_strided_slice %329 {offsets = [0, 48], sizes = [2, 16], strides = [1, 1]} : vector<2x64xf32> to vector<2x16xf32>
    %340 = math.tanh %339 : vector<2x16xf32>
    %341 = arith.mulf %337, %262 : vector<2x16xf32>
    %342 = arith.mulf %336, %340 : vector<2x16xf32>
    %343 = arith.addf %341, %342 : vector<2x16xf32>
    %344 = math.tanh %343 : vector<2x16xf32>
    %345 = arith.mulf %338, %344 : vector<2x16xf32>
    %346 = math.tanh %345 : vector<2x16xf32>
    %c0_67 = arith.constant 0 : index
    %347 = arith.index_cast %c3_i32 : i32 to index
    %c0_68 = arith.constant 0 : index
    %c0_69 = arith.constant 0 : index
    %348 = vector.load %arg11[%c0_67, %347, %c0_68, %c0_69] : memref<1x8x2x16xf32, #tpu.memory_space<vmem>>, vector<1x1x2x16xf32>
    %349 = vector.shape_cast %348 : vector<1x1x2x16xf32> to vector<2x16xf32>
    %350 = vector.shape_cast %346 : vector<2x16xf32> to vector<1x1x2x16xf32>
    tpu.vector_store %arg11[%c0_67, %347, %c0_68, %c0_69], %350 {strides = array<i32>} : memref<1x8x2x16xf32, #tpu.memory_space<vmem>>, vector<1x1x2x16xf32>,
    %c4_i32 = arith.constant 4 : i32
    %cst_70 = arith.constant dense<0.000000e+00> : vector<2x128xf32>
    %351 = tpu.matmul %287, %1, %cst_70 {dimension_numbers = #tpu.dot_dimension_numbers<[1], [0], [0], [1], [0, 0, 1, 1], [], []>} : vector<2x32xf32>, vector<32x128xf32>, vector<2x128xf32> -> vector<2x128xf32>
    %352 = arith.addf %24, %351 : vector<2x128xf32>
    %353 = vector.extract_strided_slice %352 {offsets = [0, 0], sizes = [2, 96], strides = [1, 1]} : vector<2x128xf32> to vector<2x96xf32>
    %354 = arith.negf %353 : vector<2x96xf32>
    %355 = math.exp %354 : vector<2x96xf32>
    %cst_71 = arith.constant 1.000000e+00 : f32
    %356 = vector.broadcast %cst_71 : f32 to vector<2x96xf32>
    %357 = arith.addf %356, %355 : vector<2x96xf32>
    %358 = arith.divf %356, %357 : vector<2x96xf32>
    %359 = vector.extract_strided_slice %358 {offsets = [0, 0], sizes = [2, 32], strides = [1, 1]} : vector<2x96xf32> to vector<2x32xf32>
    %360 = vector.extract_strided_slice %358 {offsets = [0, 32], sizes = [2, 32], strides = [1, 1]} : vector<2x96xf32> to vector<2x32xf32>
    %361 = vector.extract_strided_slice %358 {offsets = [0, 64], sizes = [2, 32], strides = [1, 1]} : vector<2x96xf32> to vector<2x32xf32>
    %362 = vector.extract_strided_slice %352 {offsets = [0, 96], sizes = [2, 32], strides = [1, 1]} : vector<2x128xf32> to vector<2x32xf32>
    %363 = math.tanh %362 : vector<2x32xf32>
    %364 = arith.mulf %360, %285 : vector<2x32xf32>
    %365 = arith.mulf %359, %363 : vector<2x32xf32>
    %366 = arith.addf %364, %365 : vector<2x32xf32>
    %367 = math.tanh %366 : vector<2x32xf32>
    %368 = arith.mulf %361, %367 : vector<2x32xf32>
    %369 = tpu.concatenate %368, %306 in 1 : vector<2x32xf32>, vector<2x32xf32> -> vector<2x64xf32>
    %cst_72 = arith.constant dense<0.000000e+00> : vector<2x128xf32>
    %370 = tpu.matmul %369, %3, %cst_72 {dimension_numbers = #tpu.dot_dimension_numbers<[1], [0], [0], [1], [0, 0, 1, 1], [], []>} : vector<2x64xf32>, vector<64x128xf32>, vector<2x128xf32> -> vector<2x128xf32>
    %371 = arith.addf %370, %9 : vector<2x128xf32>
    %372 = vector.extract_strided_slice %371 {offsets = [0, 0], sizes = [2, 96], strides = [1, 1]} : vector<2x128xf32> to vector<2x96xf32>
    %373 = arith.negf %372 : vector<2x96xf32>
    %374 = math.exp %373 : vector<2x96xf32>
    %cst_73 = arith.constant 1.000000e+00 : f32
    %375 = vector.broadcast %cst_73 : f32 to vector<2x96xf32>
    %376 = arith.addf %375, %374 : vector<2x96xf32>
    %377 = arith.divf %375, %376 : vector<2x96xf32>
    %378 = vector.extract_strided_slice %377 {offsets = [0, 0], sizes = [2, 32], strides = [1, 1]} : vector<2x96xf32> to vector<2x32xf32>
    %379 = vector.extract_strided_slice %377 {offsets = [0, 32], sizes = [2, 32], strides = [1, 1]} : vector<2x96xf32> to vector<2x32xf32>
    %380 = vector.extract_strided_slice %377 {offsets = [0, 64], sizes = [2, 32], strides = [1, 1]} : vector<2x96xf32> to vector<2x32xf32>
    %381 = vector.extract_strided_slice %371 {offsets = [0, 96], sizes = [2, 32], strides = [1, 1]} : vector<2x128xf32> to vector<2x32xf32>
    %382 = math.tanh %381 : vector<2x32xf32>
    %383 = arith.mulf %379, %304 : vector<2x32xf32>
    %384 = arith.mulf %378, %382 : vector<2x32xf32>
    %385 = arith.addf %383, %384 : vector<2x32xf32>
    %386 = math.tanh %385 : vector<2x32xf32>
    %387 = arith.mulf %380, %386 : vector<2x32xf32>
    %388 = math.tanh %387 : vector<2x32xf32>
    %389 = tpu.concatenate %388, %326 in 1 : vector<2x32xf32>, vector<2x16xf32> -> vector<2x48xf32>
    %cst_74 = arith.constant dense<0.000000e+00> : vector<2x64xf32>
    %390 = tpu.matmul %389, %4, %cst_74 {dimension_numbers = #tpu.dot_dimension_numbers<[1], [0], [0], [1], [0, 0, 1, 1], [], []>} : vector<2x48xf32>, vector<48x64xf32>, vector<2x64xf32> -> vector<2x64xf32>
    %391 = arith.addf %390, %12 : vector<2x64xf32>
    %392 = vector.extract_strided_slice %391 {offsets = [0, 0], sizes = [2, 48], strides = [1, 1]} : vector<2x64xf32> to vector<2x48xf32>
    %393 = arith.negf %392 : vector<2x48xf32>
    %394 = math.exp %393 : vector<2x48xf32>
    %cst_75 = arith.constant 1.000000e+00 : f32
    %395 = vector.broadcast %cst_75 : f32 to vector<2x48xf32>
    %396 = arith.addf %395, %394 : vector<2x48xf32>
    %397 = arith.divf %395, %396 : vector<2x48xf32>
    %398 = vector.extract_strided_slice %397 {offsets = [0, 0], sizes = [2, 16], strides = [1, 1]} : vector<2x48xf32> to vector<2x16xf32>
    %399 = vector.extract_strided_slice %397 {offsets = [0, 16], sizes = [2, 16], strides = [1, 1]} : vector<2x48xf32> to vector<2x16xf32>
    %400 = vector.extract_strided_slice %397 {offsets = [0, 32], sizes = [2, 16], strides = [1, 1]} : vector<2x48xf32> to vector<2x16xf32>
    %401 = vector.extract_strided_slice %391 {offsets = [0, 48], sizes = [2, 16], strides = [1, 1]} : vector<2x64xf32> to vector<2x16xf32>
    %402 = math.tanh %401 : vector<2x16xf32>
    %403 = arith.mulf %399, %324 : vector<2x16xf32>
    %404 = arith.mulf %398, %402 : vector<2x16xf32>
    %405 = arith.addf %403, %404 : vector<2x16xf32>
    %406 = math.tanh %405 : vector<2x16xf32>
    %407 = arith.mulf %400, %406 : vector<2x16xf32>
    %408 = tpu.concatenate %407, %345 in 1 : vector<2x16xf32>, vector<2x16xf32> -> vector<2x32xf32>
    %cst_76 = arith.constant dense<0.000000e+00> : vector<2x64xf32>
    %409 = tpu.matmul %408, %5, %cst_76 {dimension_numbers = #tpu.dot_dimension_numbers<[1], [0], [0], [1], [0, 0, 1, 1], [], []>} : vector<2x32xf32>, vector<32x64xf32>, vector<2x64xf32> -> vector<2x64xf32>
    %410 = arith.addf %409, %15 : vector<2x64xf32>
    %411 = vector.extract_strided_slice %410 {offsets = [0, 0], sizes = [2, 48], strides = [1, 1]} : vector<2x64xf32> to vector<2x48xf32>
    %412 = arith.negf %411 : vector<2x48xf32>
    %413 = math.exp %412 : vector<2x48xf32>
    %cst_77 = arith.constant 1.000000e+00 : f32
    %414 = vector.broadcast %cst_77 : f32 to vector<2x48xf32>
    %415 = arith.addf %414, %413 : vector<2x48xf32>
    %416 = arith.divf %414, %415 : vector<2x48xf32>
    %417 = vector.extract_strided_slice %416 {offsets = [0, 0], sizes = [2, 16], strides = [1, 1]} : vector<2x48xf32> to vector<2x16xf32>
    %418 = vector.extract_strided_slice %416 {offsets = [0, 16], sizes = [2, 16], strides = [1, 1]} : vector<2x48xf32> to vector<2x16xf32>
    %419 = vector.extract_strided_slice %416 {offsets = [0, 32], sizes = [2, 16], strides = [1, 1]} : vector<2x48xf32> to vector<2x16xf32>
    %420 = vector.extract_strided_slice %410 {offsets = [0, 48], sizes = [2, 16], strides = [1, 1]} : vector<2x64xf32> to vector<2x16xf32>
    %421 = math.tanh %420 : vector<2x16xf32>
    %422 = arith.mulf %418, %343 : vector<2x16xf32>
    %423 = arith.mulf %417, %421 : vector<2x16xf32>
    %424 = arith.addf %422, %423 : vector<2x16xf32>
    %425 = math.tanh %424 : vector<2x16xf32>
    %426 = arith.mulf %419, %425 : vector<2x16xf32>
    %427 = math.tanh %426 : vector<2x16xf32>
    %c0_78 = arith.constant 0 : index
    %428 = arith.index_cast %c4_i32 : i32 to index
    %c0_79 = arith.constant 0 : index
    %c0_80 = arith.constant 0 : index
    %429 = vector.load %arg11[%c0_78, %428, %c0_79, %c0_80] : memref<1x8x2x16xf32, #tpu.memory_space<vmem>>, vector<1x1x2x16xf32>
    %430 = vector.shape_cast %429 : vector<1x1x2x16xf32> to vector<2x16xf32>
    %431 = vector.shape_cast %427 : vector<2x16xf32> to vector<1x1x2x16xf32>
    tpu.vector_store %arg11[%c0_78, %428, %c0_79, %c0_80], %431 {strides = array<i32>} : memref<1x8x2x16xf32, #tpu.memory_space<vmem>>, vector<1x1x2x16xf32>,
    %c5_i32 = arith.constant 5 : i32
    %cst_81 = arith.constant dense<0.000000e+00> : vector<2x128xf32>
    %432 = tpu.matmul %368, %1, %cst_81 {dimension_numbers = #tpu.dot_dimension_numbers<[1], [0], [0], [1], [0, 0, 1, 1], [], []>} : vector<2x32xf32>, vector<32x128xf32>, vector<2x128xf32> -> vector<2x128xf32>
    %433 = arith.addf %24, %432 : vector<2x128xf32>
    %434 = vector.extract_strided_slice %433 {offsets = [0, 0], sizes = [2, 96], strides = [1, 1]} : vector<2x128xf32> to vector<2x96xf32>
    %435 = arith.negf %434 : vector<2x96xf32>
    %436 = math.exp %435 : vector<2x96xf32>
    %cst_82 = arith.constant 1.000000e+00 : f32
    %437 = vector.broadcast %cst_82 : f32 to vector<2x96xf32>
    %438 = arith.addf %437, %436 : vector<2x96xf32>
    %439 = arith.divf %437, %438 : vector<2x96xf32>
    %440 = vector.extract_strided_slice %439 {offsets = [0, 0], sizes = [2, 32], strides = [1, 1]} : vector<2x96xf32> to vector<2x32xf32>
    %441 = vector.extract_strided_slice %439 {offsets = [0, 32], sizes = [2, 32], strides = [1, 1]} : vector<2x96xf32> to vector<2x32xf32>
    %442 = vector.extract_strided_slice %439 {offsets = [0, 64], sizes = [2, 32], strides = [1, 1]} : vector<2x96xf32> to vector<2x32xf32>
    %443 = vector.extract_strided_slice %433 {offsets = [0, 96], sizes = [2, 32], strides = [1, 1]} : vector<2x128xf32> to vector<2x32xf32>
    %444 = math.tanh %443 : vector<2x32xf32>
    %445 = arith.mulf %441, %366 : vector<2x32xf32>
    %446 = arith.mulf %440, %444 : vector<2x32xf32>
    %447 = arith.addf %445, %446 : vector<2x32xf32>
    %448 = math.tanh %447 : vector<2x32xf32>
    %449 = arith.mulf %442, %448 : vector<2x32xf32>
    %450 = tpu.concatenate %449, %387 in 1 : vector<2x32xf32>, vector<2x32xf32> -> vector<2x64xf32>
    %cst_83 = arith.constant dense<0.000000e+00> : vector<2x128xf32>
    %451 = tpu.matmul %450, %3, %cst_83 {dimension_numbers = #tpu.dot_dimension_numbers<[1], [0], [0], [1], [0, 0, 1, 1], [], []>} : vector<2x64xf32>, vector<64x128xf32>, vector<2x128xf32> -> vector<2x128xf32>
    %452 = arith.addf %451, %9 : vector<2x128xf32>
    %453 = vector.extract_strided_slice %452 {offsets = [0, 0], sizes = [2, 96], strides = [1, 1]} : vector<2x128xf32> to vector<2x96xf32>
    %454 = arith.negf %453 : vector<2x96xf32>
    %455 = math.exp %454 : vector<2x96xf32>
    %cst_84 = arith.constant 1.000000e+00 : f32
    %456 = vector.broadcast %cst_84 : f32 to vector<2x96xf32>
    %457 = arith.addf %456, %455 : vector<2x96xf32>
    %458 = arith.divf %456, %457 : vector<2x96xf32>
    %459 = vector.extract_strided_slice %458 {offsets = [0, 0], sizes = [2, 32], strides = [1, 1]} : vector<2x96xf32> to vector<2x32xf32>
    %460 = vector.extract_strided_slice %458 {offsets = [0, 32], sizes = [2, 32], strides = [1, 1]} : vector<2x96xf32> to vector<2x32xf32>
    %461 = vector.extract_strided_slice %458 {offsets = [0, 64], sizes = [2, 32], strides = [1, 1]} : vector<2x96xf32> to vector<2x32xf32>
    %462 = vector.extract_strided_slice %452 {offsets = [0, 96], sizes = [2, 32], strides = [1, 1]} : vector<2x128xf32> to vector<2x32xf32>
    %463 = math.tanh %462 : vector<2x32xf32>
    %464 = arith.mulf %460, %385 : vector<2x32xf32>
    %465 = arith.mulf %459, %463 : vector<2x32xf32>
    %466 = arith.addf %464, %465 : vector<2x32xf32>
    %467 = math.tanh %466 : vector<2x32xf32>
    %468 = arith.mulf %461, %467 : vector<2x32xf32>
    %469 = math.tanh %468 : vector<2x32xf32>
    %470 = tpu.concatenate %469, %407 in 1 : vector<2x32xf32>, vector<2x16xf32> -> vector<2x48xf32>
    %cst_85 = arith.constant dense<0.000000e+00> : vector<2x64xf32>
    %471 = tpu.matmul %470, %4, %cst_85 {dimension_numbers = #tpu.dot_dimension_numbers<[1], [0], [0], [1], [0, 0, 1, 1], [], []>} : vector<2x48xf32>, vector<48x64xf32>, vector<2x64xf32> -> vector<2x64xf32>
    %472 = arith.addf %471, %12 : vector<2x64xf32>
    %473 = vector.extract_strided_slice %472 {offsets = [0, 0], sizes = [2, 48], strides = [1, 1]} : vector<2x64xf32> to vector<2x48xf32>
    %474 = arith.negf %473 : vector<2x48xf32>
    %475 = math.exp %474 : vector<2x48xf32>
    %cst_86 = arith.constant 1.000000e+00 : f32
    %476 = vector.broadcast %cst_86 : f32 to vector<2x48xf32>
    %477 = arith.addf %476, %475 : vector<2x48xf32>
    %478 = arith.divf %476, %477 : vector<2x48xf32>
    %479 = vector.extract_strided_slice %478 {offsets = [0, 0], sizes = [2, 16], strides = [1, 1]} : vector<2x48xf32> to vector<2x16xf32>
    %480 = vector.extract_strided_slice %478 {offsets = [0, 16], sizes = [2, 16], strides = [1, 1]} : vector<2x48xf32> to vector<2x16xf32>
    %481 = vector.extract_strided_slice %478 {offsets = [0, 32], sizes = [2, 16], strides = [1, 1]} : vector<2x48xf32> to vector<2x16xf32>
    %482 = vector.extract_strided_slice %472 {offsets = [0, 48], sizes = [2, 16], strides = [1, 1]} : vector<2x64xf32> to vector<2x16xf32>
    %483 = math.tanh %482 : vector<2x16xf32>
    %484 = arith.mulf %480, %405 : vector<2x16xf32>
    %485 = arith.mulf %479, %483 : vector<2x16xf32>
    %486 = arith.addf %484, %485 : vector<2x16xf32>
    %487 = math.tanh %486 : vector<2x16xf32>
    %488 = arith.mulf %481, %487 : vector<2x16xf32>
    %489 = tpu.concatenate %488, %426 in 1 : vector<2x16xf32>, vector<2x16xf32> -> vector<2x32xf32>
    %cst_87 = arith.constant dense<0.000000e+00> : vector<2x64xf32>
    %490 = tpu.matmul %489, %5, %cst_87 {dimension_numbers = #tpu.dot_dimension_numbers<[1], [0], [0], [1], [0, 0, 1, 1], [], []>} : vector<2x32xf32>, vector<32x64xf32>, vector<2x64xf32> -> vector<2x64xf32>
    %491 = arith.addf %490, %15 : vector<2x64xf32>
    %492 = vector.extract_strided_slice %491 {offsets = [0, 0], sizes = [2, 48], strides = [1, 1]} : vector<2x64xf32> to vector<2x48xf32>
    %493 = arith.negf %492 : vector<2x48xf32>
    %494 = math.exp %493 : vector<2x48xf32>
    %cst_88 = arith.constant 1.000000e+00 : f32
    %495 = vector.broadcast %cst_88 : f32 to vector<2x48xf32>
    %496 = arith.addf %495, %494 : vector<2x48xf32>
    %497 = arith.divf %495, %496 : vector<2x48xf32>
    %498 = vector.extract_strided_slice %497 {offsets = [0, 0], sizes = [2, 16], strides = [1, 1]} : vector<2x48xf32> to vector<2x16xf32>
    %499 = vector.extract_strided_slice %497 {offsets = [0, 16], sizes = [2, 16], strides = [1, 1]} : vector<2x48xf32> to vector<2x16xf32>
    %500 = vector.extract_strided_slice %497 {offsets = [0, 32], sizes = [2, 16], strides = [1, 1]} : vector<2x48xf32> to vector<2x16xf32>
    %501 = vector.extract_strided_slice %491 {offsets = [0, 48], sizes = [2, 16], strides = [1, 1]} : vector<2x64xf32> to vector<2x16xf32>
    %502 = math.tanh %501 : vector<2x16xf32>
    %503 = arith.mulf %499, %424 : vector<2x16xf32>
    %504 = arith.mulf %498, %502 : vector<2x16xf32>
    %505 = arith.addf %503, %504 : vector<2x16xf32>
    %506 = math.tanh %505 : vector<2x16xf32>
    %507 = arith.mulf %500, %506 : vector<2x16xf32>
    %508 = math.tanh %507 : vector<2x16xf32>
    %c0_89 = arith.constant 0 : index
    %509 = arith.index_cast %c5_i32 : i32 to index
    %c0_90 = arith.constant 0 : index
    %c0_91 = arith.constant 0 : index
    %510 = vector.load %arg11[%c0_89, %509, %c0_90, %c0_91] : memref<1x8x2x16xf32, #tpu.memory_space<vmem>>, vector<1x1x2x16xf32>
    %511 = vector.shape_cast %510 : vector<1x1x2x16xf32> to vector<2x16xf32>
    %512 = vector.shape_cast %508 : vector<2x16xf32> to vector<1x1x2x16xf32>
    tpu.vector_store %arg11[%c0_89, %509, %c0_90, %c0_91], %512 {strides = array<i32>} : memref<1x8x2x16xf32, #tpu.memory_space<vmem>>, vector<1x1x2x16xf32>,
    %c6_i32 = arith.constant 6 : i32
    %cst_92 = arith.constant dense<0.000000e+00> : vector<2x128xf32>
    %513 = tpu.matmul %449, %1, %cst_92 {dimension_numbers = #tpu.dot_dimension_numbers<[1], [0], [0], [1], [0, 0, 1, 1], [], []>} : vector<2x32xf32>, vector<32x128xf32>, vector<2x128xf32> -> vector<2x128xf32>
    %514 = arith.addf %24, %513 : vector<2x128xf32>
    %515 = vector.extract_strided_slice %514 {offsets = [0, 0], sizes = [2, 96], strides = [1, 1]} : vector<2x128xf32> to vector<2x96xf32>
    %516 = arith.negf %515 : vector<2x96xf32>
    %517 = math.exp %516 : vector<2x96xf32>
    %cst_93 = arith.constant 1.000000e+00 : f32
    %518 = vector.broadcast %cst_93 : f32 to vector<2x96xf32>
    %519 = arith.addf %518, %517 : vector<2x96xf32>
    %520 = arith.divf %518, %519 : vector<2x96xf32>
    %521 = vector.extract_strided_slice %520 {offsets = [0, 0], sizes = [2, 32], strides = [1, 1]} : vector<2x96xf32> to vector<2x32xf32>
    %522 = vector.extract_strided_slice %520 {offsets = [0, 32], sizes = [2, 32], strides = [1, 1]} : vector<2x96xf32> to vector<2x32xf32>
    %523 = vector.extract_strided_slice %520 {offsets = [0, 64], sizes = [2, 32], strides = [1, 1]} : vector<2x96xf32> to vector<2x32xf32>
    %524 = vector.extract_strided_slice %514 {offsets = [0, 96], sizes = [2, 32], strides = [1, 1]} : vector<2x128xf32> to vector<2x32xf32>
    %525 = math.tanh %524 : vector<2x32xf32>
    %526 = arith.mulf %522, %447 : vector<2x32xf32>
    %527 = arith.mulf %521, %525 : vector<2x32xf32>
    %528 = arith.addf %526, %527 : vector<2x32xf32>
    %529 = math.tanh %528 : vector<2x32xf32>
    %530 = arith.mulf %523, %529 : vector<2x32xf32>
    %531 = tpu.concatenate %530, %468 in 1 : vector<2x32xf32>, vector<2x32xf32> -> vector<2x64xf32>
    %cst_94 = arith.constant dense<0.000000e+00> : vector<2x128xf32>
    %532 = tpu.matmul %531, %3, %cst_94 {dimension_numbers = #tpu.dot_dimension_numbers<[1], [0], [0], [1], [0, 0, 1, 1], [], []>} : vector<2x64xf32>, vector<64x128xf32>, vector<2x128xf32> -> vector<2x128xf32>
    %533 = arith.addf %532, %9 : vector<2x128xf32>
    %534 = vector.extract_strided_slice %533 {offsets = [0, 0], sizes = [2, 96], strides = [1, 1]} : vector<2x128xf32> to vector<2x96xf32>
    %535 = arith.negf %534 : vector<2x96xf32>
    %536 = math.exp %535 : vector<2x96xf32>
    %cst_95 = arith.constant 1.000000e+00 : f32
    %537 = vector.broadcast %cst_95 : f32 to vector<2x96xf32>
    %538 = arith.addf %537, %536 : vector<2x96xf32>
    %539 = arith.divf %537, %538 : vector<2x96xf32>
    %540 = vector.extract_strided_slice %539 {offsets = [0, 0], sizes = [2, 32], strides = [1, 1]} : vector<2x96xf32> to vector<2x32xf32>
    %541 = vector.extract_strided_slice %539 {offsets = [0, 32], sizes = [2, 32], strides = [1, 1]} : vector<2x96xf32> to vector<2x32xf32>
    %542 = vector.extract_strided_slice %539 {offsets = [0, 64], sizes = [2, 32], strides = [1, 1]} : vector<2x96xf32> to vector<2x32xf32>
    %543 = vector.extract_strided_slice %533 {offsets = [0, 96], sizes = [2, 32], strides = [1, 1]} : vector<2x128xf32> to vector<2x32xf32>
    %544 = math.tanh %543 : vector<2x32xf32>
    %545 = arith.mulf %541, %466 : vector<2x32xf32>
    %546 = arith.mulf %540, %544 : vector<2x32xf32>
    %547 = arith.addf %545, %546 : vector<2x32xf32>
    %548 = math.tanh %547 : vector<2x32xf32>
    %549 = arith.mulf %542, %548 : vector<2x32xf32>
    %550 = math.tanh %549 : vector<2x32xf32>
    %551 = tpu.concatenate %550, %488 in 1 : vector<2x32xf32>, vector<2x16xf32> -> vector<2x48xf32>
    %cst_96 = arith.constant dense<0.000000e+00> : vector<2x64xf32>
    %552 = tpu.matmul %551, %4, %cst_96 {dimension_numbers = #tpu.dot_dimension_numbers<[1], [0], [0], [1], [0, 0, 1, 1], [], []>} : vector<2x48xf32>, vector<48x64xf32>, vector<2x64xf32> -> vector<2x64xf32>
    %553 = arith.addf %552, %12 : vector<2x64xf32>
    %554 = vector.extract_strided_slice %553 {offsets = [0, 0], sizes = [2, 48], strides = [1, 1]} : vector<2x64xf32> to vector<2x48xf32>
    %555 = arith.negf %554 : vector<2x48xf32>
    %556 = math.exp %555 : vector<2x48xf32>
    %cst_97 = arith.constant 1.000000e+00 : f32
    %557 = vector.broadcast %cst_97 : f32 to vector<2x48xf32>
    %558 = arith.addf %557, %556 : vector<2x48xf32>
    %559 = arith.divf %557, %558 : vector<2x48xf32>
    %560 = vector.extract_strided_slice %559 {offsets = [0, 0], sizes = [2, 16], strides = [1, 1]} : vector<2x48xf32> to vector<2x16xf32>
    %561 = vector.extract_strided_slice %559 {offsets = [0, 16], sizes = [2, 16], strides = [1, 1]} : vector<2x48xf32> to vector<2x16xf32>
    %562 = vector.extract_strided_slice %559 {offsets = [0, 32], sizes = [2, 16], strides = [1, 1]} : vector<2x48xf32> to vector<2x16xf32>
    %563 = vector.extract_strided_slice %553 {offsets = [0, 48], sizes = [2, 16], strides = [1, 1]} : vector<2x64xf32> to vector<2x16xf32>
    %564 = math.tanh %563 : vector<2x16xf32>
    %565 = arith.mulf %561, %486 : vector<2x16xf32>
    %566 = arith.mulf %560, %564 : vector<2x16xf32>
    %567 = arith.addf %565, %566 : vector<2x16xf32>
    %568 = math.tanh %567 : vector<2x16xf32>
    %569 = arith.mulf %562, %568 : vector<2x16xf32>
    %570 = tpu.concatenate %569, %507 in 1 : vector<2x16xf32>, vector<2x16xf32> -> vector<2x32xf32>
    %cst_98 = arith.constant dense<0.000000e+00> : vector<2x64xf32>
    %571 = tpu.matmul %570, %5, %cst_98 {dimension_numbers = #tpu.dot_dimension_numbers<[1], [0], [0], [1], [0, 0, 1, 1], [], []>} : vector<2x32xf32>, vector<32x64xf32>, vector<2x64xf32> -> vector<2x64xf32>
    %572 = arith.addf %571, %15 : vector<2x64xf32>
    %573 = vector.extract_strided_slice %572 {offsets = [0, 0], sizes = [2, 48], strides = [1, 1]} : vector<2x64xf32> to vector<2x48xf32>
    %574 = arith.negf %573 : vector<2x48xf32>
    %575 = math.exp %574 : vector<2x48xf32>
    %cst_99 = arith.constant 1.000000e+00 : f32
    %576 = vector.broadcast %cst_99 : f32 to vector<2x48xf32>
    %577 = arith.addf %576, %575 : vector<2x48xf32>
    %578 = arith.divf %576, %577 : vector<2x48xf32>
    %579 = vector.extract_strided_slice %578 {offsets = [0, 0], sizes = [2, 16], strides = [1, 1]} : vector<2x48xf32> to vector<2x16xf32>
    %580 = vector.extract_strided_slice %578 {offsets = [0, 16], sizes = [2, 16], strides = [1, 1]} : vector<2x48xf32> to vector<2x16xf32>
    %581 = vector.extract_strided_slice %578 {offsets = [0, 32], sizes = [2, 16], strides = [1, 1]} : vector<2x48xf32> to vector<2x16xf32>
    %582 = vector.extract_strided_slice %572 {offsets = [0, 48], sizes = [2, 16], strides = [1, 1]} : vector<2x64xf32> to vector<2x16xf32>
    %583 = math.tanh %582 : vector<2x16xf32>
    %584 = arith.mulf %580, %505 : vector<2x16xf32>
    %585 = arith.mulf %579, %583 : vector<2x16xf32>
    %586 = arith.addf %584, %585 : vector<2x16xf32>
    %587 = math.tanh %586 : vector<2x16xf32>
    %588 = arith.mulf %581, %587 : vector<2x16xf32>
    %589 = math.tanh %588 : vector<2x16xf32>
    %c0_100 = arith.constant 0 : index
    %590 = arith.index_cast %c6_i32 : i32 to index
    %c0_101 = arith.constant 0 : index
    %c0_102 = arith.constant 0 : index
    %591 = vector.load %arg11[%c0_100, %590, %c0_101, %c0_102] : memref<1x8x2x16xf32, #tpu.memory_space<vmem>>, vector<1x1x2x16xf32>
    %592 = vector.shape_cast %591 : vector<1x1x2x16xf32> to vector<2x16xf32>
    %593 = vector.shape_cast %589 : vector<2x16xf32> to vector<1x1x2x16xf32>
    tpu.vector_store %arg11[%c0_100, %590, %c0_101, %c0_102], %593 {strides = array<i32>} : memref<1x8x2x16xf32, #tpu.memory_space<vmem>>, vector<1x1x2x16xf32>,
    %c7_i32 = arith.constant 7 : i32
    %cst_103 = arith.constant dense<0.000000e+00> : vector<2x128xf32>
    %594 = tpu.matmul %530, %1, %cst_103 {dimension_numbers = #tpu.dot_dimension_numbers<[1], [0], [0], [1], [0, 0, 1, 1], [], []>} : vector<2x32xf32>, vector<32x128xf32>, vector<2x128xf32> -> vector<2x128xf32>
    %595 = arith.addf %24, %594 : vector<2x128xf32>
    %596 = vector.extract_strided_slice %595 {offsets = [0, 0], sizes = [2, 96], strides = [1, 1]} : vector<2x128xf32> to vector<2x96xf32>
    %597 = arith.negf %596 : vector<2x96xf32>
    %598 = math.exp %597 : vector<2x96xf32>
    %cst_104 = arith.constant 1.000000e+00 : f32
    %599 = vector.broadcast %cst_104 : f32 to vector<2x96xf32>
    %600 = arith.addf %599, %598 : vector<2x96xf32>
    %601 = arith.divf %599, %600 : vector<2x96xf32>
    %602 = vector.extract_strided_slice %601 {offsets = [0, 0], sizes = [2, 32], strides = [1, 1]} : vector<2x96xf32> to vector<2x32xf32>
    %603 = vector.extract_strided_slice %601 {offsets = [0, 32], sizes = [2, 32], strides = [1, 1]} : vector<2x96xf32> to vector<2x32xf32>
    %604 = vector.extract_strided_slice %601 {offsets = [0, 64], sizes = [2, 32], strides = [1, 1]} : vector<2x96xf32> to vector<2x32xf32>
    %605 = vector.extract_strided_slice %595 {offsets = [0, 96], sizes = [2, 32], strides = [1, 1]} : vector<2x128xf32> to vector<2x32xf32>
    %606 = math.tanh %605 : vector<2x32xf32>
    %607 = arith.mulf %603, %528 : vector<2x32xf32>
    %608 = arith.mulf %602, %606 : vector<2x32xf32>
    %609 = arith.addf %607, %608 : vector<2x32xf32>
    %610 = math.tanh %609 : vector<2x32xf32>
    %611 = arith.mulf %604, %610 : vector<2x32xf32>
    %612 = tpu.concatenate %611, %549 in 1 : vector<2x32xf32>, vector<2x32xf32> -> vector<2x64xf32>
    %cst_105 = arith.constant dense<0.000000e+00> : vector<2x128xf32>
    %613 = tpu.matmul %612, %3, %cst_105 {dimension_numbers = #tpu.dot_dimension_numbers<[1], [0], [0], [1], [0, 0, 1, 1], [], []>} : vector<2x64xf32>, vector<64x128xf32>, vector<2x128xf32> -> vector<2x128xf32>
    %614 = arith.addf %613, %9 : vector<2x128xf32>
    %615 = vector.extract_strided_slice %614 {offsets = [0, 0], sizes = [2, 96], strides = [1, 1]} : vector<2x128xf32> to vector<2x96xf32>
    %616 = arith.negf %615 : vector<2x96xf32>
    %617 = math.exp %616 : vector<2x96xf32>
    %cst_106 = arith.constant 1.000000e+00 : f32
    %618 = vector.broadcast %cst_106 : f32 to vector<2x96xf32>
    %619 = arith.addf %618, %617 : vector<2x96xf32>
    %620 = arith.divf %618, %619 : vector<2x96xf32>
    %621 = vector.extract_strided_slice %620 {offsets = [0, 0], sizes = [2, 32], strides = [1, 1]} : vector<2x96xf32> to vector<2x32xf32>
    %622 = vector.extract_strided_slice %620 {offsets = [0, 32], sizes = [2, 32], strides = [1, 1]} : vector<2x96xf32> to vector<2x32xf32>
    %623 = vector.extract_strided_slice %620 {offsets = [0, 64], sizes = [2, 32], strides = [1, 1]} : vector<2x96xf32> to vector<2x32xf32>
    %624 = vector.extract_strided_slice %614 {offsets = [0, 96], sizes = [2, 32], strides = [1, 1]} : vector<2x128xf32> to vector<2x32xf32>
    %625 = math.tanh %624 : vector<2x32xf32>
    %626 = arith.mulf %622, %547 : vector<2x32xf32>
    %627 = arith.mulf %621, %625 : vector<2x32xf32>
    %628 = arith.addf %626, %627 : vector<2x32xf32>
    %629 = math.tanh %628 : vector<2x32xf32>
    %630 = arith.mulf %623, %629 : vector<2x32xf32>
    %631 = math.tanh %630 : vector<2x32xf32>
    %632 = tpu.concatenate %631, %569 in 1 : vector<2x32xf32>, vector<2x16xf32> -> vector<2x48xf32>
    %cst_107 = arith.constant dense<0.000000e+00> : vector<2x64xf32>
    %633 = tpu.matmul %632, %4, %cst_107 {dimension_numbers = #tpu.dot_dimension_numbers<[1], [0], [0], [1], [0, 0, 1, 1], [], []>} : vector<2x48xf32>, vector<48x64xf32>, vector<2x64xf32> -> vector<2x64xf32>
    %634 = arith.addf %633, %12 : vector<2x64xf32>
    %635 = vector.extract_strided_slice %634 {offsets = [0, 0], sizes = [2, 48], strides = [1, 1]} : vector<2x64xf32> to vector<2x48xf32>
    %636 = arith.negf %635 : vector<2x48xf32>
    %637 = math.exp %636 : vector<2x48xf32>
    %cst_108 = arith.constant 1.000000e+00 : f32
    %638 = vector.broadcast %cst_108 : f32 to vector<2x48xf32>
    %639 = arith.addf %638, %637 : vector<2x48xf32>
    %640 = arith.divf %638, %639 : vector<2x48xf32>
    %641 = vector.extract_strided_slice %640 {offsets = [0, 0], sizes = [2, 16], strides = [1, 1]} : vector<2x48xf32> to vector<2x16xf32>
    %642 = vector.extract_strided_slice %640 {offsets = [0, 16], sizes = [2, 16], strides = [1, 1]} : vector<2x48xf32> to vector<2x16xf32>
    %643 = vector.extract_strided_slice %640 {offsets = [0, 32], sizes = [2, 16], strides = [1, 1]} : vector<2x48xf32> to vector<2x16xf32>
    %644 = vector.extract_strided_slice %634 {offsets = [0, 48], sizes = [2, 16], strides = [1, 1]} : vector<2x64xf32> to vector<2x16xf32>
    %645 = math.tanh %644 : vector<2x16xf32>
    %646 = arith.mulf %642, %567 : vector<2x16xf32>
    %647 = arith.mulf %641, %645 : vector<2x16xf32>
    %648 = arith.addf %646, %647 : vector<2x16xf32>
    %649 = math.tanh %648 : vector<2x16xf32>
    %650 = arith.mulf %643, %649 : vector<2x16xf32>
    %651 = tpu.concatenate %650, %588 in 1 : vector<2x16xf32>, vector<2x16xf32> -> vector<2x32xf32>
    %cst_109 = arith.constant dense<0.000000e+00> : vector<2x64xf32>
    %652 = tpu.matmul %651, %5, %cst_109 {dimension_numbers = #tpu.dot_dimension_numbers<[1], [0], [0], [1], [0, 0, 1, 1], [], []>} : vector<2x32xf32>, vector<32x64xf32>, vector<2x64xf32> -> vector<2x64xf32>
    %653 = arith.addf %652, %15 : vector<2x64xf32>
    %654 = vector.extract_strided_slice %653 {offsets = [0, 0], sizes = [2, 48], strides = [1, 1]} : vector<2x64xf32> to vector<2x48xf32>
    %655 = arith.negf %654 : vector<2x48xf32>
    %656 = math.exp %655 : vector<2x48xf32>
    %cst_110 = arith.constant 1.000000e+00 : f32
    %657 = vector.broadcast %cst_110 : f32 to vector<2x48xf32>
    %658 = arith.addf %657, %656 : vector<2x48xf32>
    %659 = arith.divf %657, %658 : vector<2x48xf32>
    %660 = vector.extract_strided_slice %659 {offsets = [0, 0], sizes = [2, 16], strides = [1, 1]} : vector<2x48xf32> to vector<2x16xf32>
    %661 = vector.extract_strided_slice %659 {offsets = [0, 16], sizes = [2, 16], strides = [1, 1]} : vector<2x48xf32> to vector<2x16xf32>
    %662 = vector.extract_strided_slice %659 {offsets = [0, 32], sizes = [2, 16], strides = [1, 1]} : vector<2x48xf32> to vector<2x16xf32>
    %663 = vector.extract_strided_slice %653 {offsets = [0, 48], sizes = [2, 16], strides = [1, 1]} : vector<2x64xf32> to vector<2x16xf32>
    %664 = math.tanh %663 : vector<2x16xf32>
    %665 = arith.mulf %661, %586 : vector<2x16xf32>
    %666 = arith.mulf %660, %664 : vector<2x16xf32>
    %667 = arith.addf %665, %666 : vector<2x16xf32>
    %668 = math.tanh %667 : vector<2x16xf32>
    %669 = arith.mulf %662, %668 : vector<2x16xf32>
    %670 = math.tanh %669 : vector<2x16xf32>
    %c0_111 = arith.constant 0 : index
    %671 = arith.index_cast %c7_i32 : i32 to index
    %c0_112 = arith.constant 0 : index
    %c0_113 = arith.constant 0 : index
    %672 = vector.load %arg11[%c0_111, %671, %c0_112, %c0_113] : memref<1x8x2x16xf32, #tpu.memory_space<vmem>>, vector<1x1x2x16xf32>
    %673 = vector.shape_cast %672 : vector<1x1x2x16xf32> to vector<2x16xf32>
    %674 = vector.shape_cast %670 : vector<2x16xf32> to vector<1x1x2x16xf32>
    tpu.vector_store %arg11[%c0_111, %671, %c0_112, %c0_113], %674 {strides = array<i32>} : memref<1x8x2x16xf32, #tpu.memory_space<vmem>>, vector<1x1x2x16xf32>,
    %c8_i32 = arith.constant 8 : i32
    return
  }
  func.func @transform_0(%arg0: i32) -> (i32, i32) {
    %c0_i32 = arith.constant 0 : i32
    %c0_i32_0 = arith.constant 0 : i32
    %c0_i32_1 = arith.constant 0 : i32
    return %c0_i32, %c0_i32_0 : i32, i32
  }
  func.func @transform_1(%arg0: i32) -> (i32, i32, i32) {
    %c0_i32 = arith.constant 0 : i32
    %c0_i32_0 = arith.constant 0 : i32
    %c0_i32_1 = arith.constant 0 : i32
    return %arg0, %c0_i32, %c0_i32_0 : i32, i32, i32
  }
  func.func @transform_2(%arg0: i32) -> (i32, i32, i32) {
    %c0_i32 = arith.constant 0 : i32
    %c0_i32_0 = arith.constant 0 : i32
    %c0_i32_1 = arith.constant 0 : i32
    return %arg0, %c0_i32, %c0_i32_0 : i32, i32, i32
  }
  func.func @transform_3(%arg0: i32) -> (i32, i32, i32) {
    %c0_i32 = arith.constant 0 : i32
    %c0_i32_0 = arith.constant 0 : i32
    %c0_i32_1 = arith.constant 0 : i32
    return %arg0, %c0_i32, %c0_i32_0 : i32, i32, i32
  }
  func.func @transform_4(%arg0: i32) -> (i32, i32, i32) {
    %c0_i32 = arith.constant 0 : i32
    %c0_i32_0 = arith.constant 0 : i32
    %c0_i32_1 = arith.constant 0 : i32
    return %arg0, %c0_i32, %c0_i32_0 : i32, i32, i32
  }
  func.func @transform_5(%arg0: i32) -> (i32, i32, i32) {
    %c0_i32 = arith.constant 0 : i32
    %c0_i32_0 = arith.constant 0 : i32
    %c0_i32_1 = arith.constant 0 : i32
    return %arg0, %c0_i32, %c0_i32_0 : i32, i32, i32
  }
  func.func @transform_6(%arg0: i32) -> (i32, i32) {
    %c0_i32 = arith.constant 0 : i32
    %c0_i32_0 = arith.constant 0 : i32
    %c0_i32_1 = arith.constant 0 : i32
    return %c0_i32, %c0_i32_0 : i32, i32
  }
  func.func @transform_7(%arg0: i32) -> (i32, i32) {
    %c0_i32 = arith.constant 0 : i32
    %c0_i32_0 = arith.constant 0 : i32
    %c0_i32_1 = arith.constant 0 : i32
    return %c0_i32, %c0_i32_0 : i32, i32
  }
  func.func @transform_8(%arg0: i32) -> (i32, i32) {
    %c0_i32 = arith.constant 0 : i32
    %c0_i32_0 = arith.constant 0 : i32
    %c0_i32_1 = arith.constant 0 : i32
    return %c0_i32, %c0_i32_0 : i32, i32
  }
  func.func @transform_9(%arg0: i32) -> (i32, i32) {
    %c0_i32 = arith.constant 0 : i32
    %c0_i32_0 = arith.constant 0 : i32
    %c0_i32_1 = arith.constant 0 : i32
    return %c0_i32, %c0_i32_0 : i32, i32
  }
  func.func @transform_10(%arg0: i32) -> (i32, i32, i32, i32) {
    %c0_i32 = arith.constant 0 : i32
    %c0_i32_0 = arith.constant 0 : i32
    %c0_i32_1 = arith.constant 0 : i32
    %c0_i32_2 = arith.constant 0 : i32
    return %arg0, %c0_i32, %c0_i32_0, %c0_i32_1 : i32, i32, i32, i32
  }
}

</mosaic_0001>

<bundles_post_ra>
// kernel: div_lstm_vae_forward.2
= control target key start
LH: loop header
LB: loop body
LE: loop exit
PB: predicated region body
PF: predicated region fallthrough
CT: control target
= control target key end

     0   :  { %13 = vsyncpa [#allocation3], 0  ;;  %s1409_s30 = smov [#allocation2]   ;;  %s1410_s10 = smov 128   ;;  %s1858_s0 = inlined_call_operand.vmem [shape: f32[8,2,8], index: 0, kind: input, shape index: {}]   ;;  %s1859_s1 = inlined_call_operand.hbm [shape: f32[40,128], index: 1, kind: input, shape index: {}]   ;;  %s1860_s2 = inlined_call_operand.vmem [shape: f32[1,128], index: 2, kind: input, shape index: {}]   ;;  %s1861_s3 = inlined_call_operand.vmem [shape: f32[64,128], index: 3, kind: input, shape index: {}]   ;;  %s1862_s4 = inlined_call_operand.vmem [shape: f32[1,128], index: 4, kind: input, shape index: {}]   ;;  %s1863_s5 = inlined_call_operand.vmem [shape: f32[32,16], index: 5, kind: input, shape index: {}]   ;;  %s1864_s6 = inlined_call_operand.vmem [shape: f32[1,16], index: 6, kind: input, shape index: {}]   ;;  %s1865_s7 = inlined_call_operand.vmem [shape: f32[2,8], index: 7, kind: input, shape index: {}]   ;;  %s1866_s8 = inlined_call_operand.vmem [shape: f32[2,8], index: 8, kind: output, shape index: {}]  }
   0x1   :  { %s20_s29 = sshll.u32 %s1859_s1, 4  ;;  %s22_s9 = sshll.u32 %s1409_s30, 4  ;;  %s21_s29 = int_to_ptr.hbm [resolvable:$true] %s20_s29  ;;  %s23_s9 = int_to_ptr.vmem [resolvable:$true] %s22_s9 }
   0x2   :  { %s1411_s11 = smov 8  }
   0x3   :  { %28 = dma.hbm_to_vmem [thread:$0]  %s21_s29, 640, %s23_s9, [#allocation3], %s1410_s10, %s1410_s10, %s1411_s11  }
   0x4   :  { %1407 = dma.done.wait [#allocation3], 640  }
   0x5   :  { %1408 = vsyncadd [#allocation3], 4294966656  ;;  %v1466_v0 = vld [vmem:[#allocation2 + $0x20] sm:$0xff]  ;;  %v1468_v1 = vld [vmem:[#allocation2 + $0x18] sm:$0xff]  ;;  %vm67_vm0 = vcmask 64512   ;;  %vm69_vm1 = vcmask 326656  }
   0x6   :  { %84 = vmatpush.msra.mxu0 %v1466_v0  ;;  %217 = vmatpush.msra.mxu2 %v1466_v0  ;;  %v1472_v2 = vld [vmem:[#allocation2 + $0x10] sm:$0xff]  ;;  %v1476_v3 = vld [vmem:[#allocation2 + $0x8] sm:$0xff]  ;;  %v66_v4 = vld [vmem:[%s1858_s0] sm:$0x3]  ;;  %s1412_s15 = smov 32   ;;  %s1413_s30 = smov 64  }
   0x7   :  { %v1483_v5 = vld [vmem:[#allocation2] sm:$0xff]  ;;  %v68_v6 = vsel %vm67_vm0, %v66_v4, 0.0  ;;  %v1516_v30 = vld [vmem:[%s1861_s3 + $0x38] sm:$0xff]  ;;  %v1521_v31 = vld [vmem:[%s1861_s3 + $0x30] sm:$0xff]  ;;  %s1414_s9 = smov 72   ;;  %vm134_vm6 = vcmask 261120  }
   0x8   :  { %85 = vmatpush.msra.mxu0 %v1468_v1  ;;  %218 = vmatpush.msra.mxu2 %v1468_v1  ;;  %v1504_v7 = vld [vmem:[%s1860_s2] ss:$0 sm:$0xff]  ;;  %v1528_v32 = vld [vmem:[%s1861_s3 + $0x28] sm:$0xff]  ;;  %v1544_v34 = vld [vmem:[%s1861_s3 + $0x18] sm:$0xff]  ;;  %vm136_vm7 = vcmask 523264   ;;  %s1415_s16 = smov 96  }
   0x9   :  { %148 = vmatpush.msra.mxu1 %v1516_v30  ;;  %283 = vmatpush.msra.mxu3 %v1516_v30  ;;  %v1536_v33 = vld [vmem:[%s1861_s3 + $0x20] sm:$0xff]  ;;  %v1552_v35 = vld [vmem:[%s1861_s3 + $0x10] sm:$0xff]  ;;  %v1560_v36 = vld [vmem:[%s1861_s3 + $0x8] sm:$0xff] }
   0xa   :  { %86 = vmatpush.msra.mxu0 %v1472_v2  ;;  %219 = vmatpush.msra.mxu2 %v1472_v2  ;;  %v1574_v39 = vld [vmem:[%s1861_s3] sm:$0xff] }
   0xb   :  { %149 = vmatpush.msra.mxu1 %v1521_v31  ;;  %284 = vmatpush.msra.mxu3 %v1521_v31  ;;  %v1202_v42 = vld [vmem:[%s1858_s0 + $0x2] sm:$0x3]  ;;  %v1615_v45 = vld [vmem:[%s1862_s4] ss:$0 sm:$0xff] }
   0xc   :  { %87 = vmatpush.msra.mxu0 %v1476_v3  ;;  %220 = vmatpush.msra.mxu2 %v1476_v3 }
   0xd   :  { %150 = vmatpush.msra.mxu1 %v1528_v32  ;;  %285 = vmatpush.msra.mxu3 %v1528_v32 }
   0xe   :  { %88 = vmatpush.msra.mxu0 %v1483_v5  ;;  %221 = vmatpush.msra.mxu2 %v1483_v5 }
   0xf   :  { %1198 = vmatmul.msk.f32.vlgmr.msra.gmra.mxu0 %vm69_vm1, %v68_v6  ;;  %151 = vmatpush.msra.mxu1 %v1536_v33 }
  0x10   :  { %352 = vmatpush.msrb.mxu0 %v1466_v0  ;;  %418 = vmatpush.msrb.mxu2 %v1516_v30 }
  0x11   :  { %286 = vmatpush.msra.mxu3 %v1536_v33  ;;  %152 = vmatpush.msra.mxu1 %v1544_v34 }
  0x12   :  { %353 = vmatpush.msrb.mxu0 %v1468_v1  ;;  %419 = vmatpush.msrb.mxu2 %v1521_v31 }
  0x13   :  { %287 = vmatpush.msra.mxu3 %v1544_v34  ;;  %153 = vmatpush.msra.mxu1 %v1552_v35 }
  0x14   :  { %354 = vmatpush.msrb.mxu0 %v1472_v2  ;;  %420 = vmatpush.msrb.mxu2 %v1528_v32 }
  0x15   :  { %288 = vmatpush.msra.mxu3 %v1552_v35  ;;  %154 = vmatpush.msra.mxu1 %v1560_v36 }
  0x16   :  { %355 = vmatpush.msrb.mxu0 %v1476_v3  ;;  %421 = vmatpush.msrb.mxu2 %v1536_v33 }
  0x17   :  { %289 = vmatpush.msra.mxu3 %v1560_v36  ;;  %155 = vmatpush.msra.mxu1 %v1574_v39 }
  0x18   :  { %356 = vmatpush.msrb.mxu0 %v1483_v5  ;;  %422 = vmatpush.msrb.mxu2 %v1544_v34 }
  0x19   :  { %290 = vmatpush.msra.mxu3 %v1574_v39  ;;  %487 = vmatpush.msrb.mxu1 %v1466_v0 }
  0x1a   :  { %622 = vmatpush.msra.mxu0 %v1466_v0  ;;  %423 = vmatpush.msrb.mxu2 %v1552_v35 }
  0x1b   :  { %553 = vmatpush.msrb.mxu3 %v1516_v30  ;;  %488 = vmatpush.msrb.mxu1 %v1468_v1 }
  0x1c   :  { %623 = vmatpush.msra.mxu0 %v1468_v1  ;;  %424 = vmatpush.msrb.mxu2 %v1560_v36 }
  0x1d   :  { %554 = vmatpush.msrb.mxu3 %v1521_v31  ;;  %489 = vmatpush.msrb.mxu1 %v1472_v2 }
  0x1e   :  { %624 = vmatpush.msra.mxu0 %v1472_v2  ;;  %425 = vmatpush.msrb.mxu2 %v1574_v39 }
  0x1f   :  { %555 = vmatpush.msrb.mxu3 %v1528_v32  ;;  %490 = vmatpush.msrb.mxu1 %v1476_v3 }
  0x20   :  { %625 = vmatpush.msra.mxu0 %v1476_v3 }
  0x21   :  { %556 = vmatpush.msrb.mxu3 %v1536_v33  ;;  %491 = vmatpush.msrb.mxu1 %v1483_v5 }
  0x22   :  { %626 = vmatpush.msra.mxu0 %v1483_v5 }
  0x23   :  { %557 = vmatpush.msrb.mxu3 %v1544_v34 }
  0x25   :  { %558 = vmatpush.msrb.mxu3 %v1552_v35 }
  0x27   :  { %559 = vmatpush.msrb.mxu3 %v1560_v36 }
  0x29   :  { %560 = vmatpush.msrb.mxu3 %v1574_v39 }
  0x8c   :  { %v90_v8 = vpop.f32.mrf.mxu0 }
  0x8d   :  { %v91_v9 = vadd.f32 %v1504_v7, %v90_v8 }
  0x8f   :  { %1249 = vtanh.f32 %v91_v9  ;;  %v1199_v11 = vmul.f32 -1.442695, %v91_v9 }
  0x91   :  { %1251 = vpow2.f32 %v1199_v11 }
  0x95   :  { %v1250_v10 = vpop.eup %1249 }
  0x96   :  { %115 = vrot.lane.b32.xlu0 %v1250_v10, %s1412_s15 }
  0x97   :  { %v1252_v12 = vpop.eup %1251 }
  0x98   :  { %v96_v13 = vadd.f32 1.0, %v1252_v12 }
  0x9a   :  { %1253 = vrcp.f32 %v96_v13  ;;  %v108_v19 = vand.u32 2147483648, %v96_v13  ;;  %vm102_vm3 = vweird.f32 %v96_v13  ;;  %v106_v20 = vand.u32 2147483647, %v96_v13 }
  0x9c   :  { %v109_v22 = vor.u32 1.1754944e-38, %v108_v19  ;;  %vm107_vm5 = vcmp.eq.f32.partialorder %v106_v20, 8.507059e+37 }
  0xa0   :  { %v1254_v14 = vpop.eup %1253 }
  0xa1   :  { %v98_v15 = vmul.f32 %v1254_v14, %v96_v13  ;;  %vm103_vm2 = vweird.f32 %v1254_v14 }
  0xa2   :  { %vm104_vm4 = vmor %vm102_vm3, %vm103_vm2 }
  0xa3   :  { %v99_v16 = vsub.f32 1.0, %v98_v15 }
  0xa5   :  { %v100_v17 = vmul.f32 %v1254_v14, %v99_v16 }
  0xa7   :  { %v101_v18 = vadd.f32 %v1254_v14, %v100_v17 }
  0xa9   :  { %v105_v21 = vsel %vm104_vm4, %v1254_v14, %v101_v18 }
  0xaa   :  { %v110_v24 = vsel %vm107_vm5, %v109_v22, %v105_v21 }
  0xab   :  { %v113_v26 = vmul.f32 0.0, %v110_v24 }
 0x108   :  { %v116_v23 = vpop.permute.xlu0 %115 }
 0x109   :  { %v118_v25 = vmul.f32 %v116_v23, %v110_v24 }
 0x10b   :  { %120 = vrot.lane.b32.xlu0 %v118_v25, %s1412_s15 }
 0x17d   :  { %v121_v27 = vpop.permute.xlu0 %120 }
 0x17e   :  { %v1509_v28 = vadd.f32 %v121_v27, %v113_v26 }
 0x180   :  { %1255 = vtanh.f32 %v1509_v28 }
 0x186   :  { %v1256_v29 = vpop.eup %1255 }
 0x187   :  { %126 = vrot.lane.b32.xlu1 %v1256_v29, %s1412_s15 }
 0x1f9   :  { %v127_v37 = vpop.permute.xlu1 %126 }
 0x1fa   :  { %v129_v38 = vmul.f32 %v127_v37, %v110_v24 }
 0x1fc   :  { %131 = vrot.lane.b32.xlu2 %v129_v38, %s1413_s30  ;;  %199 = vrot.lane.b32.xlu1 %v129_v38, %s1414_s9 }
 0x256   :  { %v132_v40 = vpop.permute.xlu2 %131 }
 0x257   :  { %v135_v41 = vsel %vm134_vm6, %v132_v40, 0.0 }
 0x258   :  { %1200 = vmatmul.msk.f32.vlgmr.msra.gmra.mxu1 %vm136_vm7, %v135_v41 }
 0x259   :  { %688 = vmatpush.msra.mxu1 %v1516_v30 }
 0x25b   :  { %689 = vmatpush.msra.mxu1 %v1521_v31 }
 0x25d   :  { %690 = vmatpush.msra.mxu1 %v1528_v32 }
 0x25f   :  { %691 = vmatpush.msra.mxu1 %v1536_v33 }
 0x261   :  { %692 = vmatpush.msra.mxu1 %v1544_v34 }
 0x263   :  { %693 = vmatpush.msra.mxu1 %v1552_v35 }
 0x265   :  { %694 = vmatpush.msra.mxu1 %v1560_v36 }
 0x267   :  { %695 = vmatpush.msra.mxu1 %v1574_v39 }
 0x26e   :  { %v200_v43 = vpop.permute.xlu1 %199 }
 0x26f   :  { %v202_v44 = vsel %vm67_vm0, %v1202_v42, %v200_v43 }
 0x270   :  { %1203 = vmatmul.msk.f32.vlgmr.msra.gmra.mxu2 %vm69_vm1, %v202_v44 }
 0x271   :  { %757 = vmatpush.msra.mxu2 %v1466_v0 }
 0x273   :  { %758 = vmatpush.msra.mxu2 %v1468_v1 }
 0x275   :  { %759 = vmatpush.msra.mxu2 %v1472_v2 }
 0x277   :  { %760 = vmatpush.msra.mxu2 %v1476_v3 }
 0x279   :  { %761 = vmatpush.msra.mxu2 %v1483_v5 }
 0x2d5   :  { %v157_v46 = vpop.f32.mrf.mxu1 }
 0x2d6   :  { %v158_v47 = vadd.f32 %v1615_v45, %v157_v46 }
 0x2d8   :  { %1257 = vtanh.f32 %v158_v47  ;;  %v1201_v52 = vmul.f32 -1.442695, %v158_v47 }
 0x2de   :  { %v1258_v48 = vpop.eup %1257 }
 0x2df   :  { %182 = vrot.lane.b32.xlu2 %v1258_v48, %s1412_s15  ;;  %v1207_v48 = vld [vmem:[%s1858_s0 + $0x4] sm:$0x3] }
 0x2f3   :  { %v223_v49 = vpop.f32.mrf.mxu2 }
 0x2f4   :  { %v224_v50 = vadd.f32 %v1504_v7, %v223_v49 }
 0x2f6   :  { %1259 = vtanh.f32 %v224_v50  ;;  %v1204_v9 = vmul.f32 -1.442695, %v224_v50 }
 0x2f7   :  { %1261 = vpow2.f32 %v1201_v52 }
 0x2fc   :  { %v1260_v51 = vpop.eup %1259 }
 0x2fd   :  { %248 = vrot.lane.b32.xlu0 %v1260_v51, %s1412_s15  ;;  %v1262_v53 = vpop.eup %1261 }
 0x2fe   :  { %v163_v54 = vadd.f32 1.0, %v1262_v53 }
 0x300   :  { %1263 = vrcp.f32 %v163_v54  ;;  %v175_v60 = vand.u32 2147483648, %v163_v54  ;;  %vm169_vm9 = vweird.f32 %v163_v54  ;;  %v173_v61 = vand.u32 2147483647, %v163_v54 }
 0x301   :  { %1265 = vpow2.f32 %v1204_v9 }
 0x302   :  { %v176_v63 = vor.u32 1.1754944e-38, %v175_v60  ;;  %vm174_vm11 = vcmp.eq.f32.partialorder %v173_v61, 8.507059e+37 }
 0x306   :  { %v1264_v55 = vpop.eup %1263 }
 0x307   :  { %v165_v56 = vmul.f32 %v1264_v55, %v163_v54  ;;  %vm170_vm8 = vweird.f32 %v1264_v55  ;;  %v1266_v10 = vpop.eup %1265 }
 0x308   :  { %vm171_vm10 = vmor %vm169_vm9, %vm170_vm8  ;;  %v229_v11 = vadd.f32 1.0, %v1266_v10 }
 0x309   :  { %v166_v57 = vsub.f32 1.0, %v165_v56 }
 0x30a   :  { %1267 = vrcp.f32 %v229_v11  ;;  %v241_v17 = vand.u32 2147483648, %v229_v11  ;;  %vm235_vm13 = vweird.f32 %v229_v11  ;;  %v239_v18 = vand.u32 2147483647, %v229_v11 }
 0x30b   :  { %v167_v58 = vmul.f32 %v1264_v55, %v166_v57 }
 0x30c   :  { %v242_v20 = vor.u32 1.1754944e-38, %v241_v17  ;;  %vm240_vm15 = vcmp.eq.f32.partialorder %v239_v18, 8.507059e+37 }
 0x30d   :  { %v168_v59 = vadd.f32 %v1264_v55, %v167_v58 }
 0x30f   :  { %v172_v62 = vsel %vm171_vm10, %v1264_v55, %v168_v59 }
 0x310   :  { %v177_v6 = vsel %vm174_vm11, %v176_v63, %v172_v62  ;;  %v1268_v12 = vpop.eup %1267 }
 0x311   :  { %v231_v13 = vmul.f32 %v1268_v12, %v229_v11  ;;  %vm236_vm12 = vweird.f32 %v1268_v12  ;;  %v180_v24 = vmul.f32 0.0, %v177_v6 }
 0x312   :  { %vm237_vm14 = vmor %vm235_vm13, %vm236_vm12 }
 0x313   :  { %v232_v14 = vsub.f32 1.0, %v231_v13 }
 0x315   :  { %v233_v15 = vmul.f32 %v1268_v12, %v232_v14 }
 0x317   :  { %v234_v16 = vadd.f32 %v1268_v12, %v233_v15 }
 0x319   :  { %v238_v19 = vsel %vm237_vm14, %v1268_v12, %v234_v16 }
 0x31a   :  { %v243_v22 = vsel %vm240_vm15, %v242_v20, %v238_v19 }
 0x31b   :  { %v246_v29 = vmul.f32 %v243_v22, %v1509_v28 }
 0x339   :  { %v183_v4 = vpop.permute.xlu2 %182 }
 0x33a   :  { %v185_v8 = vmul.f32 %v183_v4, %v177_v6 }
 0x33c   :  { %187 = vrot.lane.b32.xlu1 %v185_v8, %s1412_s15 }
 0x36f   :  { %v249_v21 = vpop.permute.xlu0 %248 }
 0x370   :  { %v251_v23 = vmul.f32 %v249_v21, %v243_v22 }
 0x372   :  { %253 = vrot.lane.b32.xlu2 %v251_v23, %s1412_s15 }
 0x3ae   :  { %v188_v25 = vpop.permute.xlu1 %187 }
 0x3af   :  { %v1623_v26 = vadd.f32 %v188_v25, %v180_v24 }
 0x3b1   :  { %1269 = vtanh.f32 %v1623_v26 }
 0x3b7   :  { %v1270_v27 = vpop.eup %1269 }
 0x3b8   :  { %193 = vrot.lane.b32.xlu0 %v1270_v27, %s1412_s15 }
 0x3cc   :  { %v254_v37 = vpop.permute.xlu2 %253 }
 0x3cd   :  { %v1628_v38 = vadd.f32 %v254_v37, %v246_v29 }
 0x3cf   :  { %1271 = vtanh.f32 %v1628_v38 }
 0x3d5   :  { %v1272_v40 = vpop.eup %1271 }
 0x3d6   :  { %259 = vrot.lane.b32.xlu1 %v1272_v40, %s1412_s15 }
 0x42a   :  { %v194_v41 = vpop.permute.xlu0 %193 }
 0x42b   :  { %v196_v42 = vmul.f32 %v194_v41, %v177_v6 }
 0x42d   :  { %268 = vrot.lane.b32.xlu0 %v196_v42, %s1415_s16 }
 0x448   :  { %v260_v43 = vpop.permute.xlu1 %259 }
 0x449   :  { %v262_v44 = vmul.f32 %v260_v43, %v243_v22 }
 0x44b   :  { %334 = vrot.lane.b32.xlu1 %v262_v44, %s1414_s9  ;;  %264 = vrot.lane.b32.xlu2 %v262_v44, %s1413_s30 }
 0x49f   :  { %v269_v28 = vpop.permute.xlu0 %268 }
 0x4a5   :  { %v265_v46 = vpop.permute.xlu2 %264 }
 0x4a6   :  { %v271_v47 = vsel %vm134_vm6, %v265_v46, %v269_v28 }
 0x4a7   :  { %1205 = vmatmul.msk.f32.vlgmr.msra.gmra.mxu3 %vm136_vm7, %v271_v47 }
 0x4a8   :  { %892 = vmatpush.msra.mxu3 %v1466_v0 }
 0x4aa   :  { %893 = vmatpush.msra.mxu3 %v1468_v1 }
 0x4ac   :  { %894 = vmatpush.msra.mxu3 %v1472_v2 }
 0x4ae   :  { %895 = vmatpush.msra.mxu3 %v1476_v3 }
 0x4b0   :  { %896 = vmatpush.msra.mxu3 %v1483_v5 }
 0x4bd   :  { %v335_v49 = vpop.permute.xlu1 %334 }
 0x4be   :  { %v337_v50 = vsel %vm67_vm0, %v1207_v48, %v335_v49 }
 0x4bf   :  { %1208 = vmatmul.msk.f32.vlgmr.msrb.gmra.mxu0 %vm69_vm1, %v337_v50 }
 0x4c0   :  { %823 = vmatpush.msrb.mxu0 %v1516_v30 }
 0x4c2   :  { %824 = vmatpush.msrb.mxu0 %v1521_v31 }
 0x4c4   :  { %825 = vmatpush.msrb.mxu0 %v1528_v32 }
 0x4c6   :  { %826 = vmatpush.msrb.mxu0 %v1536_v33 }
 0x4c8   :  { %827 = vmatpush.msrb.mxu0 %v1544_v34 }
 0x4ca   :  { %828 = vmatpush.msrb.mxu0 %v1552_v35 }
 0x4cc   :  { %829 = vmatpush.msrb.mxu0 %v1560_v36 }
 0x4ce   :  { %830 = vmatpush.msrb.mxu0 %v1574_v39 }
 0x52a   :  { %v292_v51 = vpop.f32.mrf.mxu3 }
 0x52b   :  { %v293_v52 = vadd.f32 %v1615_v45, %v292_v51 }
 0x52d   :  { %1273 = vtanh.f32 %v293_v52  ;;  %v1206_v57 = vmul.f32 -1.442695, %v293_v52 }
 0x533   :  { %v1274_v53 = vpop.eup %1273 }
 0x534   :  { %317 = vrot.lane.b32.xlu2 %v1274_v53, %s1412_s15  ;;  %v1212_v53 = vld [vmem:[%s1858_s0 + $0x6] sm:$0x3] }
 0x53c   :  { %v358_v54 = vpop.f32.mrf.mxu0 }
 0x53d   :  { %v359_v55 = vadd.f32 %v1504_v7, %v358_v54 }
 0x53f   :  { %1275 = vtanh.f32 %v359_v55  ;;  %v1209_v9 = vmul.f32 -1.442695, %v359_v55 }
 0x540   :  { %1277 = vpow2.f32 %v1206_v57 }
 0x545   :  { %v1276_v56 = vpop.eup %1275 }
 0x546   :  { %383 = vrot.lane.b32.xlu0 %v1276_v56, %s1412_s15  ;;  %v1278_v58 = vpop.eup %1277 }
 0x547   :  { %v298_v59 = vadd.f32 1.0, %v1278_v58 }
 0x549   :  { %1279 = vrcp.f32 %v298_v59  ;;  %v310_v6 = vand.u32 2147483648, %v298_v59  ;;  %vm304_vm3 = vweird.f32 %v298_v59  ;;  %v308_v8 = vand.u32 2147483647, %v298_v59 }
 0x54a   :  { %1281 = vpow2.f32 %v1209_v9 }
 0x54b   :  { %v311_v11 = vor.u32 1.1754944e-38, %v310_v6  ;;  %vm309_vm5 = vcmp.eq.f32.partialorder %v308_v8, 8.507059e+37 }
 0x54f   :  { %v1280_v60 = vpop.eup %1279 }
 0x550   :  { %v300_v61 = vmul.f32 %v1280_v60, %v298_v59  ;;  %vm305_vm2 = vweird.f32 %v1280_v60  ;;  %v1282_v15 = vpop.eup %1281 }
 0x551   :  { %vm306_vm4 = vmor %vm304_vm3, %vm305_vm2  ;;  %v364_v16 = vadd.f32 1.0, %v1282_v15 }
 0x552   :  { %v301_v62 = vsub.f32 1.0, %v300_v61 }
 0x553   :  { %1283 = vrcp.f32 %v364_v16  ;;  %v376_v22 = vand.u32 2147483648, %v364_v16  ;;  %vm370_vm9 = vweird.f32 %v364_v16  ;;  %v374_v23 = vand.u32 2147483647, %v364_v16 }
 0x554   :  { %v302_v63 = vmul.f32 %v1280_v60, %v301_v62 }
 0x555   :  { %v377_v25 = vor.u32 1.1754944e-38, %v376_v22  ;;  %vm375_vm11 = vcmp.eq.f32.partialorder %v374_v23, 8.507059e+37 }
 0x556   :  { %v303_v4 = vadd.f32 %v1280_v60, %v302_v63 }
 0x558   :  { %v307_v10 = vsel %vm306_vm4, %v1280_v60, %v303_v4 }
 0x559   :  { %v312_v13 = vsel %vm309_vm5, %v311_v11, %v307_v10  ;;  %v1284_v17 = vpop.eup %1283 }
 0x55a   :  { %v366_v18 = vmul.f32 %v1284_v17, %v364_v16  ;;  %vm371_vm8 = vweird.f32 %v1284_v17  ;;  %v315_v40 = vmul.f32 %v312_v13, %v1623_v26 }
 0x55b   :  { %vm372_vm10 = vmor %vm370_vm9, %vm371_vm8 }
 0x55c   :  { %v367_v19 = vsub.f32 1.0, %v366_v18 }
 0x55e   :  { %v368_v20 = vmul.f32 %v1284_v17, %v367_v19 }
 0x560   :  { %v369_v21 = vadd.f32 %v1284_v17, %v368_v20 }
 0x562   :  { %v373_v24 = vsel %vm372_vm10, %v1284_v17, %v369_v21 }
 0x563   :  { %v378_v29 = vsel %vm375_vm11, %v377_v25, %v373_v24 }
 0x564   :  { %v381_v44 = vmul.f32 %v378_v29, %v1628_v38 }
 0x58e   :  { %v318_v12 = vpop.permute.xlu2 %317 }
 0x58f   :  { %v320_v14 = vmul.f32 %v318_v12, %v312_v13 }
 0x591   :  { %322 = vrot.lane.b32.xlu1 %v320_v14, %s1412_s15 }
 0x5b8   :  { %v384_v27 = vpop.permute.xlu0 %383 }
 0x5b9   :  { %v386_v37 = vmul.f32 %v384_v27, %v378_v29 }
 0x5bb   :  { %388 = vrot.lane.b32.xlu2 %v386_v37, %s1412_s15 }
 0x603   :  { %v323_v41 = vpop.permute.xlu1 %322 }
 0x604   :  { %v1662_v42 = vadd.f32 %v323_v41, %v315_v40 }
 0x606   :  { %1285 = vtanh.f32 %v1662_v42 }
 0x60c   :  { %v1286_v43 = vpop.eup %1285 }
 0x60d   :  { %328 = vrot.lane.b32.xlu0 %v1286_v43, %s1412_s15 }
 0x615   :  { %v389_v28 = vpop.permute.xlu2 %388 }
 0x616   :  { %v1667_v46 = vadd.f32 %v389_v28, %v381_v44 }
 0x618   :  { %1287 = vtanh.f32 %v1667_v46 }
 0x61e   :  { %v1288_v47 = vpop.eup %1287 }
 0x61f   :  { %394 = vrot.lane.b32.xlu1 %v1288_v47, %s1412_s15 }
 0x67f   :  { %v329_v48 = vpop.permute.xlu0 %328 }
 0x680   :  { %v331_v26 = vmul.f32 %v329_v48, %v312_v13 }
 0x682   :  { %403 = vrot.lane.b32.xlu0 %v331_v26, %s1415_s16 }
 0x691   :  { %v395_v49 = vpop.permute.xlu1 %394 }
 0x692   :  { %v397_v50 = vmul.f32 %v395_v49, %v378_v29 }
 0x694   :  { %469 = vrot.lane.b32.xlu1 %v397_v50, %s1414_s9  ;;  %399 = vrot.lane.b32.xlu2 %v397_v50, %s1413_s30 }
 0x6ee   :  { %v400_v51 = vpop.permute.xlu2 %399 }
 0x6f4   :  { %v404_v38 = vpop.permute.xlu0 %403 }
 0x6f5   :  { %v406_v52 = vsel %vm134_vm6, %v400_v51, %v404_v38 }
 0x6f6   :  { %1210 = vmatmul.msk.f32.vlgmr.msrb.gmra.mxu2 %vm136_vm7, %v406_v52 }
 0x6f7   :  { %958 = vmatpush.msrb.mxu2 %v1516_v30 }
 0x6f9   :  { %959 = vmatpush.msrb.mxu2 %v1521_v31 }
 0x6fb   :  { %960 = vmatpush.msrb.mxu2 %v1528_v32 }
 0x6fd   :  { %961 = vmatpush.msrb.mxu2 %v1536_v33 }
 0x6ff   :  { %962 = vmatpush.msrb.mxu2 %v1544_v34 }
 0x701   :  { %963 = vmatpush.msrb.mxu2 %v1552_v35 }
 0x703   :  { %964 = vmatpush.msrb.mxu2 %v1560_v36 }
 0x705   :  { %965 = vmatpush.msrb.mxu2 %v1574_v39 }
 0x706   :  { %v470_v54 = vpop.permute.xlu1 %469 }
 0x707   :  { %v472_v55 = vsel %vm67_vm0, %v1212_v53, %v470_v54 }
 0x708   :  { %1213 = vmatmul.msk.f32.vlgmr.msrb.gmra.mxu1 %vm69_vm1, %v472_v55 }
 0x709   :  { %1027 = vmatpush.msrb.mxu1 %v1466_v0 }
 0x70b   :  { %1028 = vmatpush.msrb.mxu1 %v1468_v1 }
 0x70d   :  { %1029 = vmatpush.msrb.mxu1 %v1472_v2 }
 0x70f   :  { %1030 = vmatpush.msrb.mxu1 %v1476_v3 }
 0x711   :  { %1031 = vmatpush.msrb.mxu1 %v1483_v5 }
 0x779   :  { %v427_v56 = vpop.f32.mrf.mxu2 }
 0x77a   :  { %v428_v57 = vadd.f32 %v1615_v45, %v427_v56 }
 0x77c   :  { %1289 = vtanh.f32 %v428_v57  ;;  %v1211_v3 = vmul.f32 -1.442695, %v428_v57 }
 0x782   :  { %v1290_v58 = vpop.eup %1289 }
 0x783   :  { %452 = vrot.lane.b32.xlu0 %v1290_v58, %s1412_s15 }
 0x785   :  { %v493_v59 = vpop.f32.mrf.mxu1 }
 0x786   :  { %v494_v60 = vadd.f32 %v1504_v7, %v493_v59 }
 0x788   :  { %1291 = vtanh.f32 %v494_v60  ;;  %v1214_v1 = vmul.f32 -1.442695, %v494_v60 }
 0x78a   :  { %1293 = vpow2.f32 %v1214_v1 }
 0x78b   :  { %1295 = vpow2.f32 %v1211_v3 }
 0x78e   :  { %v1292_v0 = vpop.eup %1291 }
 0x78f   :  { %518 = vrot.lane.b32.xlu2 %v1292_v0, %s1412_s15 }
 0x790   :  { %v1294_v2 = vpop.eup %1293 }
 0x791   :  { %v499_v61 = vadd.f32 1.0, %v1294_v2  ;;  %v1296_v5 = vpop.eup %1295 }
 0x792   :  { %v433_v63 = vadd.f32 1.0, %v1296_v5 }
 0x793   :  { %1297 = vrcp.f32 %v499_v61  ;;  %v511_v12 = vand.u32 2147483648, %v499_v61  ;;  %vm505_vm13 = vweird.f32 %v499_v61  ;;  %v509_v13 = vand.u32 2147483647, %v499_v61 }
 0x794   :  { %1299 = vrcp.f32 %v433_v63  ;;  %v445_v22 = vand.u32 2147483648, %v433_v63  ;;  %vm439_vm3 = vweird.f32 %v433_v63  ;;  %v443_v23 = vand.u32 2147483647, %v433_v63 }
 0x795   :  { %v512_v16 = vor.u32 1.1754944e-38, %v511_v12  ;;  %vm510_vm15 = vcmp.eq.f32.partialorder %v509_v13, 8.507059e+37 }
 0x796   :  { %v446_v25 = vor.u32 1.1754944e-38, %v445_v22  ;;  %vm444_vm5 = vcmp.eq.f32.partialorder %v443_v23, 8.507059e+37 }
 0x799   :  { %v1298_v62 = vpop.eup %1297 }
 0x79a   :  { %v501_v4 = vmul.f32 %v1298_v62, %v499_v61  ;;  %v1300_v9 = vpop.eup %1299  ;;  %vm506_vm12 = vweird.f32 %v1298_v62 }
 0x79b   :  { %v435_v11 = vmul.f32 %v1300_v9, %v433_v63  ;;  %vm507_vm14 = vmor %vm505_vm13, %vm506_vm12  ;;  %vm440_vm2 = vweird.f32 %v1300_v9 }
 0x79c   :  { %v502_v6 = vsub.f32 1.0, %v501_v4  ;;  %vm441_vm4 = vmor %vm439_vm3, %vm440_vm2 }
 0x79d   :  { %v436_v15 = vsub.f32 1.0, %v435_v11 }
 0x79e   :  { %v503_v8 = vmul.f32 %v1298_v62, %v502_v6 }
 0x79f   :  { %v437_v20 = vmul.f32 %v1300_v9, %v436_v15 }
 0x7a0   :  { %v504_v10 = vadd.f32 %v1298_v62, %v503_v8 }
 0x7a1   :  { %v438_v21 = vadd.f32 %v1300_v9, %v437_v20 }
 0x7a2   :  { %v508_v14 = vsel %vm507_vm14, %v1298_v62, %v504_v10 }
 0x7a3   :  { %v513_v17 = vsel %vm510_vm15, %v512_v16, %v508_v14  ;;  %v442_v24 = vsel %vm441_vm4, %v1300_v9, %v438_v21 }
 0x7a4   :  { %v447_v29 = vsel %vm444_vm5, %v446_v25, %v442_v24  ;;  %v516_v28 = vmul.f32 %v513_v17, %v1667_v46  ;;  %v1217_v46 = vld [vmem:[%s1858_s0 + $0x8] sm:$0x3] }
 0x7a5   :  { %v450_v40 = vmul.f32 %v447_v29, %v1662_v42 }
 0x7e9   :  { %v519_v18 = vpop.permute.xlu2 %518 }
 0x7ea   :  { %v521_v19 = vmul.f32 %v519_v18, %v513_v17 }
 0x7ec   :  { %523 = vrot.lane.b32.xlu1 %v521_v19, %s1412_s15 }
 0x7f5   :  { %v453_v27 = vpop.permute.xlu0 %452 }
 0x7f6   :  { %v455_v37 = vmul.f32 %v453_v27, %v447_v29 }
 0x7f8   :  { %457 = vrot.lane.b32.xlu2 %v455_v37, %s1412_s15 }
 0x852   :  { %v458_v41 = vpop.permute.xlu2 %457 }
 0x853   :  { %v1701_v43 = vadd.f32 %v458_v41, %v450_v40 }
 0x855   :  { %1301 = vtanh.f32 %v1701_v43 }
 0x85b   :  { %v1302_v44 = vpop.eup %1301 }
 0x85c   :  { %463 = vrot.lane.b32.xlu1 %v1302_v44, %s1412_s15 }
 0x85e   :  { %v524_v47 = vpop.permute.xlu1 %523 }
 0x85f   :  { %v1706_v48 = vadd.f32 %v524_v47, %v516_v28 }
 0x861   :  { %1303 = vtanh.f32 %v1706_v48 }
 0x867   :  { %v1304_v26 = vpop.eup %1303 }
 0x868   :  { %529 = vrot.lane.b32.xlu0 %v1304_v26, %s1412_s15 }
 0x8ce   :  { %v464_v49 = vpop.permute.xlu1 %463 }
 0x8cf   :  { %v466_v42 = vmul.f32 %v464_v49, %v447_v29 }
 0x8d1   :  { %538 = vrot.lane.b32.xlu1 %v466_v42, %s1415_s16 }
 0x8da   :  { %v530_v50 = vpop.permute.xlu0 %529 }
 0x8db   :  { %v532_v51 = vmul.f32 %v530_v50, %v513_v17 }
 0x8dd   :  { %534 = vrot.lane.b32.xlu0 %v532_v51, %s1413_s30  ;;  %604 = vrot.lane.b32.xlu2 %v532_v51, %s1414_s9 }
 0x937   :  { %v605_v38 = vpop.permute.xlu2 %604 }
 0x938   :  { %v607_v52 = vsel %vm67_vm0, %v1217_v46, %v605_v38 }
 0x939   :  { %1218 = vmatmul.msk.f32.vlgmr.msra.gmra.mxu0 %vm69_vm1, %v607_v52 }
 0x943   :  { %v539_v53 = vpop.permute.xlu1 %538 }
 0x94f   :  { %v535_v54 = vpop.permute.xlu0 %534 }
 0x950   :  { %v541_v55 = vsel %vm134_vm6, %v535_v54, %v539_v53 }
 0x951   :  { %1215 = vmatmul.msk.f32.vlgmr.msrb.gmra.mxu3 %vm136_vm7, %v541_v55 }
 0x952   :  { %1093 = vmatpush.msrb.mxu3 %v1516_v30 }
 0x954   :  { %1094 = vmatpush.msrb.mxu3 %v1521_v31 }
 0x956   :  { %1095 = vmatpush.msrb.mxu3 %v1528_v32 }
 0x958   :  { %1096 = vmatpush.msrb.mxu3 %v1536_v33 }
 0x95a   :  { %1097 = vmatpush.msrb.mxu3 %v1544_v34 }
 0x95c   :  { %1098 = vmatpush.msrb.mxu3 %v1552_v35 }
 0x95e   :  { %1099 = vmatpush.msrb.mxu3 %v1560_v36 }
 0x960   :  { %1100 = vmatpush.msrb.mxu3 %v1574_v39 }
 0x9b6   :  { %v628_v56 = vpop.f32.mrf.mxu0 }
 0x9b7   :  { %v629_v57 = vadd.f32 %v1504_v7, %v628_v56 }
 0x9b9   :  { %1305 = vtanh.f32 %v629_v57  ;;  %v1219_v33 = vmul.f32 -1.442695, %v629_v57 }
 0x9bf   :  { %v1306_v58 = vpop.eup %1305 }
 0x9c0   :  { %653 = vrot.lane.b32.xlu2 %v1306_v58, %s1412_s15 }
 0x9d4   :  { %v562_v30 = vpop.f32.mrf.mxu3 }
 0x9d5   :  { %v563_v31 = vadd.f32 %v1615_v45, %v562_v30 }
 0x9d7   :  { %1307 = vtanh.f32 %v563_v31  ;;  %v1216_v4 = vmul.f32 -1.442695, %v563_v31 }
 0x9d8   :  { %1309 = vpow2.f32 %v1219_v33 }
 0x9dd   :  { %v1308_v32 = vpop.eup %1307 }
 0x9de   :  { %587 = vrot.lane.b32.xlu0 %v1308_v32, %s1412_s15  ;;  %v1310_v34 = vpop.eup %1309 }
 0x9df   :  { %v634_v35 = vadd.f32 1.0, %v1310_v34 }
 0x9e1   :  { %1311 = vrcp.f32 %v634_v35  ;;  %v646_v1 = vand.u32 2147483648, %v634_v35  ;;  %vm640_vm9 = vweird.f32 %v634_v35  ;;  %v644_v2 = vand.u32 2147483647, %v634_v35 }
 0x9e2   :  { %1313 = vpow2.f32 %v1216_v4 }
 0x9e3   :  { %v647_v61 = vor.u32 1.1754944e-38, %v646_v1  ;;  %vm645_vm11 = vcmp.eq.f32.partialorder %v644_v2, 8.507059e+37 }
 0x9e7   :  { %v1312_v36 = vpop.eup %1311 }
 0x9e8   :  { %v636_v39 = vmul.f32 %v1312_v36, %v634_v35  ;;  %vm641_vm8 = vweird.f32 %v1312_v36  ;;  %v1314_v6 = vpop.eup %1313 }
 0x9e9   :  { %vm642_vm10 = vmor %vm640_vm9, %vm641_vm8  ;;  %v568_v8 = vadd.f32 1.0, %v1314_v6 }
 0x9ea   :  { %v637_v59 = vsub.f32 1.0, %v636_v39 }
 0x9eb   :  { %1315 = vrcp.f32 %v568_v8  ;;  %v580_v14 = vand.u32 2147483648, %v568_v8  ;;  %vm574_vm13 = vweird.f32 %v568_v8  ;;  %v578_v15 = vand.u32 2147483647, %v568_v8 }
 0x9ec   :  { %v638_v60 = vmul.f32 %v1312_v36, %v637_v59 }
 0x9ed   :  { %v581_v17 = vor.u32 1.1754944e-38, %v580_v14  ;;  %vm579_vm15 = vcmp.eq.f32.partialorder %v578_v15, 8.507059e+37 }
 0x9ee   :  { %v639_v0 = vadd.f32 %v1312_v36, %v638_v60 }
 0x9f0   :  { %v643_v3 = vsel %vm642_vm10, %v1312_v36, %v639_v0 }
 0x9f1   :  { %v648_v62 = vsel %vm645_vm11, %v647_v61, %v643_v3  ;;  %v1316_v9 = vpop.eup %1315 }
 0x9f2   :  { %v570_v10 = vmul.f32 %v1316_v9, %v568_v8  ;;  %vm575_vm12 = vweird.f32 %v1316_v9  ;;  %v651_v21 = vmul.f32 %v648_v62, %v1706_v48 }
 0x9f3   :  { %vm576_vm14 = vmor %vm574_vm13, %vm575_vm12 }
 0x9f4   :  { %v571_v11 = vsub.f32 1.0, %v570_v10 }
 0x9f6   :  { %v572_v12 = vmul.f32 %v1316_v9, %v571_v11 }
 0x9f8   :  { %v573_v13 = vadd.f32 %v1316_v9, %v572_v12 }
 0x9fa   :  { %v577_v16 = vsel %vm576_vm14, %v1316_v9, %v573_v13 }
 0x9fb   :  { %v582_v19 = vsel %vm579_vm15, %v581_v17, %v577_v16 }
 0x9fc   :  { %v585_v25 = vmul.f32 %v582_v19, %v1701_v43  ;;  %v1222_v43 = vld [vmem:[%s1858_s0 + $0xa] sm:$0x3] }
 0xa1a   :  { %v654_v5 = vpop.permute.xlu2 %653 }
 0xa1b   :  { %v656_v63 = vmul.f32 %v654_v5, %v648_v62 }
 0xa1d   :  { %658 = vrot.lane.b32.xlu1 %v656_v63, %s1412_s15 }
 0xa50   :  { %v588_v18 = vpop.permute.xlu0 %587 }
 0xa51   :  { %v590_v20 = vmul.f32 %v588_v18, %v582_v19 }
 0xa53   :  { %592 = vrot.lane.b32.xlu2 %v590_v20, %s1412_s15 }
 0xa8f   :  { %v659_v22 = vpop.permute.xlu1 %658 }
 0xa90   :  { %v1735_v23 = vadd.f32 %v659_v22, %v651_v21 }
 0xa92   :  { %1317 = vtanh.f32 %v1735_v23 }
 0xa98   :  { %v1318_v24 = vpop.eup %1317 }
 0xa99   :  { %664 = vrot.lane.b32.xlu0 %v1318_v24, %s1412_s15  ;;  %v1227_v24 = vld [vmem:[%s1858_s0 + $0xc] sm:$0x3] }
 0xaad   :  { %v593_v27 = vpop.permute.xlu2 %592 }
 0xaae   :  { %v1740_v29 = vadd.f32 %v593_v27, %v585_v25 }
 0xab0   :  { %1319 = vtanh.f32 %v1740_v29 }
 0xab6   :  { %v1320_v37 = vpop.eup %1319 }
 0xab7   :  { %598 = vrot.lane.b32.xlu1 %v1320_v37, %s1412_s15 }
 0xb0b   :  { %v665_v40 = vpop.permute.xlu0 %664 }
 0xb0c   :  { %v667_v41 = vmul.f32 %v665_v40, %v648_v62 }
 0xb0e   :  { %669 = vrot.lane.b32.xlu0 %v667_v41, %s1413_s30  ;;  %739 = vrot.lane.b32.xlu2 %v667_v41, %s1414_s9 }
 0xb29   :  { %v599_v44 = vpop.permute.xlu1 %598 }
 0xb2a   :  { %v601_v28 = vmul.f32 %v599_v44, %v582_v19  ;;  %v1783_v44 = vld [vmem:[%s1860_s2] ss:$0 sm:$0xff] }
 0xb2c   :  { %673 = vrot.lane.b32.xlu1 %v601_v28, %s1415_s16 }
 0xb68   :  { %v740_v47 = vpop.permute.xlu2 %739 }
 0xb69   :  { %v742_v48 = vsel %vm67_vm0, %v1222_v43, %v740_v47 }
 0xb6a   :  { %1223 = vmatmul.msk.f32.vlgmr.msra.gmra.mxu2 %vm69_vm1, %v742_v48 }
 0xb80   :  { %v670_v26 = vpop.permute.xlu0 %669 }
 0xb9e   :  { %v674_v49 = vpop.permute.xlu1 %673 }
 0xb9f   :  { %v676_v42 = vsel %vm134_vm6, %v670_v26, %v674_v49 }
 0xba0   :  { %1220 = vmatmul.msk.f32.vlgmr.msra.gmra.mxu1 %vm136_vm7, %v676_v42 }
 0xbed   :  { %v763_v50 = vpop.f32.mrf.mxu2 }
 0xbee   :  { %v764_v51 = vadd.f32 %v1504_v7, %v763_v50 }
 0xbf0   :  { %1321 = vtanh.f32 %v764_v51  ;;  %v1224_v53 = vmul.f32 -1.442695, %v764_v51 }
 0xbf6   :  { %v1322_v46 = vpop.eup %1321 }
 0xbf7   :  { %788 = vrot.lane.b32.xlu2 %v1322_v46, %s1412_s15 }
 0xc1d   :  { %v697_v38 = vpop.f32.mrf.mxu1 }
 0xc1e   :  { %v698_v52 = vadd.f32 %v1615_v45, %v697_v38 }
 0xc20   :  { %1323 = vtanh.f32 %v698_v52  ;;  %v1221_v60 = vmul.f32 -1.442695, %v698_v52 }
 0xc21   :  { %1325 = vpow2.f32 %v1224_v53 }
 0xc26   :  { %v1324_v54 = vpop.eup %1323 }
 0xc27   :  { %722 = vrot.lane.b32.xlu0 %v1324_v54, %s1412_s15  ;;  %v1326_v55 = vpop.eup %1325 }
 0xc28   :  { %v769_v56 = vadd.f32 1.0, %v1326_v55 }
 0xc2a   :  { %1327 = vrcp.f32 %v769_v56  ;;  %v781_v32 = vand.u32 2147483648, %v769_v56  ;;  %vm775_vm3 = vweird.f32 %v769_v56  ;;  %v779_v33 = vand.u32 2147483647, %v769_v56 }
 0xc2b   :  { %1329 = vpow2.f32 %v1221_v60 }
 0xc2c   :  { %v782_v35 = vor.u32 1.1754944e-38, %v781_v32  ;;  %vm780_vm5 = vcmp.eq.f32.partialorder %v779_v33, 8.507059e+37 }
 0xc30   :  { %v1328_v57 = vpop.eup %1327 }
 0xc31   :  { %v771_v58 = vmul.f32 %v1328_v57, %v769_v56  ;;  %vm776_vm2 = vweird.f32 %v1328_v57  ;;  %v1330_v0 = vpop.eup %1329 }
 0xc32   :  { %vm777_vm4 = vmor %vm775_vm3, %vm776_vm2  ;;  %v703_v1 = vadd.f32 1.0, %v1330_v0 }
 0xc33   :  { %v772_v30 = vsub.f32 1.0, %v771_v58 }
 0xc34   :  { %1331 = vrcp.f32 %v703_v1  ;;  %v715_v63 = vand.u32 2147483648, %v703_v1  ;;  %vm709_vm9 = vweird.f32 %v703_v1  ;;  %v713_v4 = vand.u32 2147483647, %v703_v1 }
 0xc35   :  { %v773_v7 = vmul.f32 %v1328_v57, %v772_v30 }
 0xc36   :  { %v716_v8 = vor.u32 1.1754944e-38, %v715_v63  ;;  %vm714_vm11 = vcmp.eq.f32.partialorder %v713_v4, 8.507059e+37 }
 0xc37   :  { %v774_v31 = vadd.f32 %v1328_v57, %v773_v7 }
 0xc39   :  { %v778_v34 = vsel %vm777_vm4, %v1328_v57, %v774_v31 }
 0xc3a   :  { %v783_v39 = vsel %vm780_vm5, %v782_v35, %v778_v34  ;;  %v1332_v2 = vpop.eup %1331 }
 0xc3b   :  { %v705_v3 = vmul.f32 %v1332_v2, %v703_v1  ;;  %vm710_vm8 = vweird.f32 %v1332_v2  ;;  %v786_v12 = vmul.f32 %v783_v39, %v1735_v23 }
 0xc3c   :  { %vm711_vm10 = vmor %vm709_vm9, %vm710_vm8 }
 0xc3d   :  { %v706_v61 = vsub.f32 1.0, %v705_v3 }
 0xc3f   :  { %v707_v5 = vmul.f32 %v1332_v2, %v706_v61 }
 0xc41   :  { %v708_v62 = vadd.f32 %v1332_v2, %v707_v5 }
 0xc43   :  { %v712_v6 = vsel %vm711_vm10, %v1332_v2, %v708_v62 }
 0xc44   :  { %v717_v10 = vsel %vm714_vm11, %v716_v8, %v712_v6 }
 0xc45   :  { %v720_v16 = vmul.f32 %v717_v10, %v1740_v29 }
 0xc51   :  { %v789_v36 = vpop.permute.xlu2 %788 }
 0xc52   :  { %v791_v59 = vmul.f32 %v789_v36, %v783_v39 }
 0xc54   :  { %793 = vrot.lane.b32.xlu1 %v791_v59, %s1412_s15 }
 0xc99   :  { %v723_v9 = vpop.permute.xlu0 %722 }
 0xc9a   :  { %v725_v11 = vmul.f32 %v723_v9, %v717_v10 }
 0xc9c   :  { %727 = vrot.lane.b32.xlu2 %v725_v11, %s1412_s15 }
 0xcc6   :  { %v794_v13 = vpop.permute.xlu1 %793 }
 0xcc7   :  { %v1761_v14 = vadd.f32 %v794_v13, %v786_v12 }
 0xcc9   :  { %1333 = vtanh.f32 %v1761_v14 }
 0xccf   :  { %v1334_v15 = vpop.eup %1333 }
 0xcd0   :  { %799 = vrot.lane.b32.xlu0 %v1334_v15, %s1412_s15  ;;  %v1232_v15 = vld [vmem:[%s1858_s0 + $0xe] sm:$0x3] }
 0xcf6   :  { %v728_v17 = vpop.permute.xlu2 %727 }
 0xcf7   :  { %v1766_v18 = vadd.f32 %v728_v17, %v720_v16 }
 0xcf9   :  { %1335 = vtanh.f32 %v1766_v18 }
 0xcff   :  { %v1336_v19 = vpop.eup %1335 }
 0xd00   :  { %733 = vrot.lane.b32.xlu1 %v1336_v19, %s1412_s15 }
 0xd42   :  { %v800_v20 = vpop.permute.xlu0 %799 }
 0xd43   :  { %v802_v21 = vmul.f32 %v800_v20, %v783_v39 }
 0xd45   :  { %804 = vrot.lane.b32.xlu0 %v802_v21, %s1413_s30  ;;  %874 = vrot.lane.b32.xlu2 %v802_v21, %s1414_s9 }
 0xd72   :  { %v734_v22 = vpop.permute.xlu1 %733 }
 0xd73   :  { %v736_v23 = vmul.f32 %v734_v22, %v717_v10 }
 0xd75   :  { %808 = vrot.lane.b32.xlu1 %v736_v23, %s1415_s16 }
 0xd9f   :  { %v875_v25 = vpop.permute.xlu2 %874 }
 0xda0   :  { %v877_v27 = vsel %vm67_vm0, %v1227_v24, %v875_v25  ;;  %v1816_v25 = vld [vmem:[%s1862_s4] ss:$0 sm:$0xff] }
 0xda1   :  { %1228 = vmatmul.msk.f32.vlgmr.msra.gmra.mxu3 %vm69_vm1, %v877_v27 }
 0xdb7   :  { %v805_v29 = vpop.permute.xlu0 %804 }
 0xde7   :  { %v809_v37 = vpop.permute.xlu1 %808 }
 0xde8   :  { %v811_v40 = vsel %vm134_vm6, %v805_v29, %v809_v37 }
 0xde9   :  { %1225 = vmatmul.msk.f32.vlgmr.msrb.gmra.mxu0 %vm136_vm7, %v811_v40 }
 0xe24   :  { %v898_v41 = vpop.f32.mrf.mxu3 }
 0xe25   :  { %v899_v28 = vadd.f32 %v1783_v44, %v898_v41 }
 0xe27   :  { %1337 = vtanh.f32 %v899_v28  ;;  %v1229_v49 = vmul.f32 -1.442695, %v899_v28 }
 0xe2d   :  { %v1338_v43 = vpop.eup %1337 }
 0xe2e   :  { %923 = vrot.lane.b32.xlu0 %v1338_v43, %s1412_s15 }
 0xe66   :  { %v832_v47 = vpop.f32.mrf.mxu0 }
 0xe67   :  { %v833_v48 = vadd.f32 %v1615_v45, %v832_v47 }
 0xe69   :  { %1339 = vtanh.f32 %v833_v48  ;;  %v1226_v45 = vmul.f32 -1.442695, %v833_v48 }
 0xe6a   :  { %1341 = vpow2.f32 %v1229_v49 }
 0xe6f   :  { %v1340_v26 = vpop.eup %1339 }
 0xe70   :  { %857 = vrot.lane.b32.xlu2 %v1340_v26, %s1412_s15  ;;  %v1342_v42 = vpop.eup %1341 }
 0xe71   :  { %v904_v50 = vadd.f32 1.0, %v1342_v42 }
 0xe73   :  { %1343 = vrcp.f32 %v904_v50  ;;  %v916_v54 = vand.u32 2147483648, %v904_v50  ;;  %vm910_vm13 = vweird.f32 %v904_v50  ;;  %v914_v55 = vand.u32 2147483647, %v904_v50 }
 0xe74   :  { %1345 = vpow2.f32 %v1226_v45 }
 0xe75   :  { %v917_v57 = vor.u32 1.1754944e-38, %v916_v54  ;;  %vm915_vm15 = vcmp.eq.f32.partialorder %v914_v55, 8.507059e+37 }
 0xe79   :  { %v1344_v51 = vpop.eup %1343 }
 0xe7a   :  { %v906_v46 = vmul.f32 %v1344_v51, %v904_v50  ;;  %vm911_vm12 = vweird.f32 %v1344_v51  ;;  %v1346_v31 = vpop.eup %1345 }
 0xe7b   :  { %vm912_vm14 = vmor %vm910_vm13, %vm911_vm12  ;;  %v838_v32 = vadd.f32 1.0, %v1346_v31 }
 0xe7c   :  { %v907_v38 = vsub.f32 1.0, %v906_v46 }
 0xe7d   :  { %1347 = vrcp.f32 %v838_v32  ;;  %v850_v59 = vand.u32 2147483648, %v838_v32  ;;  %vm844_vm3 = vweird.f32 %v838_v32  ;;  %v848_v60 = vand.u32 2147483647, %v838_v32 }
 0xe7e   :  { %v908_v52 = vmul.f32 %v1344_v51, %v907_v38 }
 0xe7f   :  { %v851_v1 = vor.u32 1.1754944e-38, %v850_v59  ;;  %vm849_vm5 = vcmp.eq.f32.partialorder %v848_v60, 8.507059e+37 }
 0xe80   :  { %v909_v53 = vadd.f32 %v1344_v51, %v908_v52 }
 0xe82   :  { %v913_v56 = vsel %vm912_vm14, %v1344_v51, %v909_v53 }
 0xe83   :  { %v918_v30 = vsel %vm915_vm15, %v917_v57, %v913_v56  ;;  %v1348_v33 = vpop.eup %1347 }
 0xe84   :  { %v840_v34 = vmul.f32 %v1348_v33, %v838_v32  ;;  %vm845_vm2 = vweird.f32 %v1348_v33  ;;  %v921_v5 = vmul.f32 %v918_v30, %v1761_v14 }
 0xe85   :  { %vm846_vm4 = vmor %vm844_vm3, %vm845_vm2  ;;  %vm1191_vm3 = vcmask 58368  }
 0xe86   :  { %v841_v35 = vsub.f32 1.0, %v840_v34 }
 0xe88   :  { %v842_v36 = vmul.f32 %v1348_v33, %v841_v35 }
 0xe8a   :  { %v843_v39 = vadd.f32 %v1348_v33, %v842_v36 }
 0xe8c   :  { %v847_v0 = vsel %vm846_vm4, %v1348_v33, %v843_v39 }
 0xe8d   :  { %v852_v3 = vsel %vm849_vm5, %v851_v1, %v847_v0 }
 0xe8e   :  { %v855_v6 = vmul.f32 %v852_v3, %v1766_v18 }
 0xea0   :  { %v924_v58 = vpop.permute.xlu0 %923 }
 0xea1   :  { %v926_v7 = vmul.f32 %v924_v58, %v918_v30 }
 0xea3   :  { %928 = vrot.lane.b32.xlu2 %v926_v7, %s1412_s15 }
 0xeca   :  { %v858_v2 = vpop.permute.xlu2 %857 }
 0xecb   :  { %v860_v61 = vmul.f32 %v858_v2, %v852_v3 }
 0xecd   :  { %862 = vrot.lane.b32.xlu1 %v860_v61, %s1412_s15 }
 0xefd   :  { %v929_v62 = vpop.permute.xlu2 %928 }
 0xefe   :  { %v1792_v63 = vadd.f32 %v929_v62, %v921_v5 }
 0xf00   :  { %1349 = vtanh.f32 %v1792_v63 }
 0xf06   :  { %v1350_v4 = vpop.eup %1349 }
 0xf07   :  { %934 = vrot.lane.b32.xlu1 %v1350_v4, %s1412_s15 }
 0xf3f   :  { %v863_v8 = vpop.permute.xlu1 %862 }
 0xf40   :  { %v1797_v9 = vadd.f32 %v863_v8, %v855_v6 }
 0xf42   :  { %1351 = vtanh.f32 %v1797_v9 }
 0xf48   :  { %v1352_v10 = vpop.eup %1351 }
 0xf49   :  { %868 = vrot.lane.b32.xlu0 %v1352_v10, %s1412_s15 }
 0xf79   :  { %v935_v11 = vpop.permute.xlu1 %934 }
 0xf7a   :  { %v937_v12 = vmul.f32 %v935_v11, %v918_v30 }
 0xf7c   :  { %1009 = vrot.lane.b32.xlu1 %v937_v12, %s1414_s9  ;;  %939 = vrot.lane.b32.xlu2 %v937_v12, %s1413_s30 }
 0xfbb   :  { %v869_v13 = vpop.permute.xlu0 %868 }
 0xfbc   :  { %v871_v14 = vmul.f32 %v869_v13, %v852_v3 }
 0xfbe   :  { %943 = vrot.lane.b32.xlu0 %v871_v14, %s1415_s16 }
 0xfd6   :  { %v940_v18 = vpop.permute.xlu2 %939 }
 0xfee   :  { %v1010_v16 = vpop.permute.xlu1 %1009 }
 0xfef   :  { %v1012_v17 = vsel %vm67_vm0, %v1232_v15, %v1010_v16 }
 0xff0   :  { %1233 = vmatmul.msk.f32.vlgmr.msrb.gmra.mxu1 %vm69_vm1, %v1012_v17 }
0x1030   :  { %v944_v19 = vpop.permute.xlu0 %943 }
0x1031   :  { %v946_v20 = vsel %vm134_vm6, %v940_v18, %v944_v19 }
0x1032   :  { %1230 = vmatmul.msk.f32.vlgmr.msrb.gmra.mxu2 %vm136_vm7, %v946_v20 }
0x106d   :  { %v1033_v21 = vpop.f32.mrf.mxu1 }
0x106e   :  { %v1034_v22 = vadd.f32 %v1783_v44, %v1033_v21 }
0x1070   :  { %1353 = vtanh.f32 %v1034_v22  ;;  %v1234_v29 = vmul.f32 -1.442695, %v1034_v22 }
0x1076   :  { %v1354_v23 = vpop.eup %1353 }
0x1077   :  { %1058 = vrot.lane.b32.xlu0 %v1354_v23, %s1412_s15 }
0x10b5   :  { %v967_v24 = vpop.f32.mrf.mxu2 }
0x10b6   :  { %v968_v27 = vadd.f32 %v1816_v25, %v967_v24 }
0x10b8   :  { %1355 = vtanh.f32 %v968_v27  ;;  %v1231_v52 = vmul.f32 -1.442695, %v968_v27 }
0x10b9   :  { %1357 = vpow2.f32 %v1234_v29 }
0x10be   :  { %v1356_v37 = vpop.eup %1355 }
0x10bf   :  { %992 = vrot.lane.b32.xlu2 %v1356_v37, %s1412_s15  ;;  %v1358_v40 = vpop.eup %1357 }
0x10c0   :  { %v1039_v41 = vadd.f32 1.0, %v1358_v40 }
0x10c2   :  { %1359 = vrcp.f32 %v1039_v41  ;;  %v1051_v26 = vand.u32 2147483648, %v1039_v41  ;;  %vm1045_vm1 = vweird.f32 %v1039_v41  ;;  %v1049_v49 = vand.u32 2147483647, %v1039_v41 }
0x10c3   :  { %1361 = vpow2.f32 %v1231_v52 }
0x10c4   :  { %v1052_v50 = vor.u32 1.1754944e-38, %v1051_v26  ;;  %vm1050_vm9 = vcmp.eq.f32.partialorder %v1049_v49, 8.507059e+37 }
0x10c8   :  { %v1360_v44 = vpop.eup %1359 }
0x10c9   :  { %v1041_v28 = vmul.f32 %v1360_v44, %v1039_v41  ;;  %vm1046_vm0 = vweird.f32 %v1360_v44  ;;  %v1362_v53 = vpop.eup %1361 }
0x10ca   :  { %vm1047_vm8 = vmor %vm1045_vm1, %vm1046_vm0  ;;  %v973_v54 = vadd.f32 1.0, %v1362_v53 }
0x10cb   :  { %v1042_v43 = vsub.f32 1.0, %v1041_v28  ;;  %v1145_v28 = vld [vmem:[%s1863_s5 + $0x10] sm:$0xff] }
0x10cc   :  { %1363 = vrcp.f32 %v973_v54  ;;  %v985_v30 = vand.u32 2147483648, %v973_v54  ;;  %vm979_vm11 = vweird.f32 %v973_v54  ;;  %v983_v7 = vand.u32 2147483647, %v973_v54 }
0x10cd   :  { %v1043_v47 = vmul.f32 %v1360_v44, %v1042_v43  ;;  %v1144_v43 = vld [vmem:[%s1863_s5 + $0x8] sm:$0xff] }
0x10ce   :  { %v986_v32 = vor.u32 1.1754944e-38, %v985_v30  ;;  %vm984_vm13 = vcmp.eq.f32.partialorder %v983_v7, 8.507059e+37 }
0x10cf   :  { %v1044_v48 = vadd.f32 %v1360_v44, %v1043_v47  ;;  %v1143_v47 = vld [vmem:[%s1863_s5] sm:$0xff] }
0x10d1   :  { %v1048_v42 = vsel %vm1047_vm8, %v1360_v44, %v1044_v48  ;;  %v1146_v44 = vld [vmem:[%s1863_s5 + $0x18] sm:$0xff]  ;;  %s1416_s5 = smov 120  }
0x10d2   :  { %v1053_v51 = vsel %vm1050_vm9, %v1052_v50, %v1048_v42  ;;  %v1364_v55 = vpop.eup %1363  ;;  %1168 = vmatpush.msra.mxu0 %v1146_v44  ;;  %v1180_v42 = vld [vmem:[%s1865_s7] sm:$0x3] }
0x10d3   :  { %v975_v45 = vmul.f32 %v1364_v55, %v973_v54  ;;  %vm980_vm10 = vweird.f32 %v1364_v55  ;;  %v1056_v36 = vmul.f32 %v1053_v51, %v1792_v63 }
0x10d4   :  { %vm981_vm12 = vmor %vm979_vm11, %vm980_vm10  ;;  %1169 = vmatpush.msra.mxu0 %v1145_v28 }
0x10d5   :  { %v976_v56 = vsub.f32 1.0, %v975_v45 }
0x10d6   :  { %1170 = vmatpush.msra.mxu0 %v1144_v43 }
0x10d7   :  { %v977_v57 = vmul.f32 %v1364_v55, %v976_v56 }
0x10d8   :  { %1171 = vmatpush.msra.mxu0 %v1143_v47 }
0x10d9   :  { %v978_v58 = vadd.f32 %v1364_v55, %v977_v57 }
0x10db   :  { %v982_v31 = vsel %vm981_vm12, %v1364_v55, %v978_v58 }
0x10dc   :  { %v987_v34 = vsel %vm984_vm13, %v986_v32, %v982_v31 }
0x10dd   :  { %v990_v0 = vmul.f32 %v987_v34, %v1797_v9 }
0x10e9   :  { %v1059_v46 = vpop.permute.xlu0 %1058 }
0x10ea   :  { %v1061_v38 = vmul.f32 %v1059_v46, %v1053_v51 }
0x10ec   :  { %1063 = vrot.lane.b32.xlu2 %v1061_v38, %s1412_s15 }
0x1119   :  { %v993_v33 = vpop.permute.xlu2 %992 }
0x111a   :  { %v995_v35 = vmul.f32 %v993_v33, %v987_v34 }
0x111c   :  { %997 = vrot.lane.b32.xlu1 %v995_v35, %s1412_s15 }
0x1146   :  { %v1064_v39 = vpop.permute.xlu2 %1063 }
0x1147   :  { %v1066_v59 = vadd.f32 %v1064_v39, %v1056_v36 }
0x1149   :  { %1365 = vtanh.f32 %v1066_v59 }
0x114f   :  { %v1366_v60 = vpop.eup %1365 }
0x1150   :  { %1069 = vrot.lane.b32.xlu1 %v1366_v60, %s1412_s15 }
0x118e   :  { %v998_v1 = vpop.permute.xlu1 %997 }
0x118f   :  { %v1000_v2 = vadd.f32 %v998_v1, %v990_v0 }
0x1191   :  { %1367 = vtanh.f32 %v1000_v2 }
0x1197   :  { %v1368_v3 = vpop.eup %1367 }
0x1198   :  { %1003 = vrot.lane.b32.xlu0 %v1368_v3, %s1412_s15 }
0x11c2   :  { %v1070_v61 = vpop.permute.xlu1 %1069 }
0x11c3   :  { %v1072_v5 = vmul.f32 %v1070_v61, %v1053_v51  ;;  %v1248_v51 = vld [vmem:[%s1864_s6] ss:$0 sm:$0xff] }
0x11c5   :  { %1074 = vrot.lane.b32.xlu2 %v1072_v5, %s1413_s30 }
0x120a   :  { %v1004_v62 = vpop.permute.xlu0 %1003 }
0x120b   :  { %v1006_v63 = vmul.f32 %v1004_v62, %v987_v34 }
0x120d   :  { %1078 = vrot.lane.b32.xlu0 %v1006_v63, %s1415_s16 }
0x121f   :  { %v1075_v4 = vpop.permute.xlu2 %1074 }
0x127f   :  { %v1079_v6 = vpop.permute.xlu0 %1078 }
0x1280   :  { %v1081_v8 = vsel %vm134_vm6, %v1075_v4, %v1079_v6 }
0x1281   :  { %1235 = vmatmul.msk.f32.vlgmr.msrb.gmra.mxu3 %vm136_vm7, %v1081_v8 }
0x1304   :  { %v1102_v9 = vpop.f32.mrf.mxu3 }
0x1305   :  { %v1103_v10 = vadd.f32 %v1816_v25, %v1102_v9 }
0x1307   :  { %1369 = vtanh.f32 %v1103_v10  ;;  %v1236_v12 = vmul.f32 -1.442695, %v1103_v10 }
0x1309   :  { %1371 = vpow2.f32 %v1236_v12 }
0x130d   :  { %v1370_v11 = vpop.eup %1369 }
0x130e   :  { %1127 = vrot.lane.b32.xlu1 %v1370_v11, %s1412_s15 }
0x130f   :  { %v1372_v13 = vpop.eup %1371 }
0x1310   :  { %v1108_v14 = vadd.f32 1.0, %v1372_v13 }
0x1312   :  { %1373 = vrcp.f32 %v1108_v14  ;;  %v1120_v20 = vand.u32 2147483648, %v1108_v14  ;;  %vm1114_vm7 = vweird.f32 %v1108_v14  ;;  %v1118_v21 = vand.u32 2147483647, %v1108_v14 }
0x1314   :  { %v1121_v23 = vor.u32 1.1754944e-38, %v1120_v20  ;;  %vm1119_vm2 = vcmp.eq.f32.partialorder %v1118_v21, 8.507059e+37 }
0x1318   :  { %v1374_v15 = vpop.eup %1373 }
0x1319   :  { %v1110_v16 = vmul.f32 %v1374_v15, %v1108_v14  ;;  %vm1115_vm14 = vweird.f32 %v1374_v15 }
0x131a   :  { %vm1116_vm15 = vmor %vm1114_vm7, %vm1115_vm14 }
0x131b   :  { %v1111_v17 = vsub.f32 1.0, %v1110_v16 }
0x131d   :  { %v1112_v18 = vmul.f32 %v1374_v15, %v1111_v17 }
0x131f   :  { %v1113_v19 = vadd.f32 %v1374_v15, %v1112_v18 }
0x1321   :  { %v1117_v22 = vsel %vm1116_vm15, %v1374_v15, %v1113_v19 }
0x1322   :  { %v1122_v25 = vsel %vm1119_vm2, %v1121_v23, %v1117_v22 }
0x1323   :  { %v1125_v29 = vmul.f32 %v1122_v25, %v1000_v2 }
0x1380   :  { %v1128_v24 = vpop.permute.xlu1 %1127 }
0x1381   :  { %v1130_v27 = vmul.f32 %v1128_v24, %v1122_v25 }
0x1383   :  { %1132 = vrot.lane.b32.xlu2 %v1130_v27, %s1412_s15 }
0x138b   :  { %1182 = vrot.lane.b32.xlu2 %v1180_v42, %s1411_s11 }
0x13dd   :  { %v1133_v37 = vpop.permute.xlu2 %1132 }
0x13de   :  { %v1135_v40 = vadd.f32 %v1133_v37, %v1125_v29 }
0x13e0   :  { %1375 = vtanh.f32 %v1135_v40 }
0x13e5   :  { %v1183_v55 = vpop.permute.xlu2 %1182 }
0x13e6   :  { %v1376_v41 = vpop.eup %1375 }
0x13e7   :  { %1138 = vrot.lane.b32.xlu0 %v1376_v41, %s1412_s15 }
0x1459   :  { %v1139_v48 = vpop.permute.xlu0 %1138 }
0x145a   :  { %v1141_v26 = vmul.f32 %v1139_v48, %v1122_v25 }
0x145c   :  { %1377 = vtanh.f32 %v1141_v26 }
0x1462   :  { %v1378_v49 = vpop.eup %1377 }
0x1463   :  { %1152 = vrot.lane.b32.xlu1 %v1378_v49, %s1413_s30 }
0x14d5   :  { %v1153_v50 = vpop.permute.xlu1 %1152 }
0x14d6   :  { %1237 = vmatmul.msk.f32.vlgmr.msra.gmra.mxu0 %vm134_vm6, %v1153_v50 }
0x1553   :  { %v1173_v46 = vpop.f32.mrf.mxu0 }
0x1554   :  { %v1174_v38 = vadd.f32 %v1248_v51, %v1173_v46 }
0x1556   :  { %v1176_v52 = vmax.f32 %v1174_v38, 0.0 }
0x1558   :  { %v1177_v53 = vmul.f32 0.5, %v1176_v52 }
0x155a   :  { %v1178_v54 = vmul.f32 1.442695, %v1177_v53 }
0x155c   :  { %1379 = vpow2.f32 %v1178_v54 }
0x1562   :  { %v1380_v45 = vpop.eup %1379 }
0x1563   :  { %v1185_v56 = vmul.f32 %v1380_v45, %v1183_v55 }
0x1565   :  { %1187 = vrot.lane.b32.xlu0 %v1185_v56, %s1416_s5 }
0x15d7   :  { %v1188_v57 = vpop.permute.xlu0 %1187 }
0x15d8   :  { %v1190_v58 = vadd.f32 %v1188_v57, %v1176_v52 }
0x15da   :  { %1192 = vst.msk [vmem:[%s1866_s8] sm:$0x3] %vm1191_vm3, %v1190_v58 }
0x15db   :  { %1197 = vsyncpa [#allocation3], 1 }

// kernel: div_lstm_vae_forward.3
= control target key start
LH: loop header
LB: loop body
LE: loop exit
PB: predicated region body
PF: predicated region fallthrough
CT: control target
= control target key end

     0   :  { %s4565_s0 = inlined_call_operand.vmem [shape: f32[2,8], index: 0, kind: input, shape index: {}]   ;;  %s4566_s1 = inlined_call_operand.hbm [shape: f32[2,8,128], index: 1, kind: input, shape index: {}]   ;;  %s4567_s2 = inlined_call_operand.hbm [shape: f32[2,32,128], index: 2, kind: input, shape index: {}]   ;;  %s4568_s3 = inlined_call_operand.vmem [shape: f32[2,1,128], index: 3, kind: input, shape index: {}]   ;;  %s4569_s4 = inlined_call_operand.vmem [shape: f32[2,64,128], index: 4, kind: input, shape index: {}]   ;;  %s4570_s5 = inlined_call_operand.vmem [shape: f32[2,1,128], index: 5, kind: input, shape index: {}]   ;;  %s4571_s6 = inlined_call_operand.hbm [shape: f32[48,64], index: 6, kind: input, shape index: {}]   ;;  %s4572_s7 = inlined_call_operand.vmem [shape: f32[1,64], index: 7, kind: input, shape index: {}]   ;;  %s4573_s8 = inlined_call_operand.hbm [shape: f32[32,64], index: 8, kind: input, shape index: {}]   ;;  %s4574_s9 = inlined_call_operand.vmem [shape: f32[1,64], index: 9, kind: input, shape index: {}]   ;;  %s4575_s10 = inlined_call_operand.vmem [shape: f32[2,8,2,16], index: 10, kind: output, shape index: {}]  }
   0x1   :  { %4581 = sst [smem:[#allocation16_spill]] %s4571_s6 }
   0x2   :  { %4582 = sst [smem:[#allocation17_spill]] %s4573_s8 }
   0x3   :  { %15 = vsyncpa [#allocation3], 0 }
   0x4   :  { %17 = vsyncpa [#allocation3 + $0x1], 0 }
   0x5   :  { %18 = vsyncpa [#allocation5], 0 }
   0x6   :  { %20 = vsyncpa [#allocation5 + $0x1], 0 }
   0x7   :  { %21 = vsyncpa [#allocation8], 0  ;;  %s3593_s13 = smov 0   ;;  %s3595_s14 = smov 0  }
   0x8   :  { %s3597_s15 = smov 0   ;;  %s3599_s16 = smov 0  }
   0x9 LB: > { %4583 = sst [smem:[#allocation13_spill]] %s3521_s15  ;;  %s3617_s20 = sadd.s32 4294967295, %s3525_s16   ;;  %s3525_s16 = sphi %s3599_s16, %s4593_s16   ;;  %s3521_s15 = sphi %s3597_s15, %s4595_s15   ;;  %s3517_s14 = sphi %s3595_s14, %s4597_s14   ;;  %s3513_s13 = sphi %s3593_s13, %s4596_s13  }
   0xa   : > { %s4584_s6 = sld [smem:[#allocation16_spill]]  ;;  %p2871_p0 = scmp.ge.s32.totalorder %s3525_s16, 1 }
   0xb   : > { %p69_p1 = scmp.eq.s32.totalorder %s3617_s20, 0  ;;  %p293_p2 = scmp.lt.s32.totalorder %s3525_s16, 3 }
   0xc   : > { %s3527_s22 = smov [#allocation6]   ;;  %s4586_s8 = sld [smem:[#allocation17_spill]] }
   0xd   : > { %p3622_p3 = pnand %p2871_p0, %p293_p2  ;;  %s309_s23 = sshll.u32 %s3527_s22, 4  ;;  %s310_s23 = int_to_ptr.vmem [resolvable:$true] %s309_s23 }
   0xe   : > { %s3528_s27 = smov [#allocation7]   ;;  %s4576_s29 = smov 128  }
   0xf   : > { %p2977_p4 = pneg %p3622_p3  ;;  %s326_s28 = sshll.u32 %s3528_s27, 4  ;;  %s327_s28 = int_to_ptr.vmem [resolvable:$true] %s326_s28 }
  0x10   : > { %s307_s19 = sshll.u32 %s4584_s6, 4  ;;  %s4577_s30 = smov 8   ;;  %s308_s19 = int_to_ptr.hbm [resolvable:$true] %s307_s19 }
  0x11   : > { %p2978_p5 = pnand %p2977_p4, %p69_p1  ;;  %s3640_s11 = sadd.s32 1, %s3525_s16  }
  0x12   : > { %s324_s26 = sshll.u32 %s4586_s8, 4  ;;  %4587 = sst [smem:[#allocation14_spill]] %s3640_s11  ;;  %s325_s26 = int_to_ptr.hbm [resolvable:$true] %s324_s26 }
  0x13   : > { %2980 = dma.hbm_to_vmem [thread:$0]  (!%p2978_p5), %s308_s19, 768, %s310_s23, [#allocation5], %s4576_s29, %s4576_s29, %s4577_s30  }
  0x14   : > { %2983 = dma.hbm_to_vmem [thread:$0]  (!%p2978_p5), %s325_s26, 512, %s327_s28, [#allocation8], %s4576_s29, %s4576_s29, %s4577_s30  }
  0x15   : > { %s55_s12 = sadd.s32 1, %s3521_s15  ;;  %s52_s17 = ssub.s32 %s3525_s16, %s3640_s11 }
  0x16   : > { %p62_p6 = scmp.ne.s32.totalorder %s3521_s15, %s3517_s14  ;;  %p53_p7 = scmp.eq.s32.totalorder %s52_s17, 0 }
  0x17   : > { %p63_p8 = scmp.eq.s32.totalorder %s3525_s16, 0  ;;  %p68_p9 = scmp.ne.s32.totalorder %s3517_s14, %s3513_s13 }
  0x18   : > { %p2993_p10 = scmp.lt.s32.totalorder %s3525_s16, 2  ;;  %s3661_s22 = sand.u32 1, %s3521_s15  }
  0x19   : > { %s3652_s18 = scalar_select %p53_p7, %s3521_s15, %s55_s12  }
  0x1a   : > { %p64_p11 = por %p63_p8, %p62_p6  ;;  %p3656_p12 = por %p69_p1, %p68_p9 }
  0x1b   : > { %4588 = sst [smem:[#allocation15_spill]] %s3652_s18  ;;  %s2876_s23 = sshll.u32 %s3525_s16, 3 }
  0x1c   : > { %s2875_s24 = sshll.u32 %s3661_s22, 3  ;;  %s351_s13 = scalar_lea.hbm %s4566_s1, %s2876_s23 }
  0x1d   : > { %s353_s27 = sshll.u32 %s351_s13, 4  ;;  %s347_s28 = scalar_lea.vmem [#allocation2], %s2875_s24  ;;  %s354_s27 = int_to_ptr.hbm [resolvable:$true] %s353_s27 }
  0x1e   : > { %s355_s12 = sshll.u32 %s347_s28, 4  ;;  %p3670_p13 = pnand %p2993_p10, %p64_p11  ;;  %s356_s12 = int_to_ptr.vmem [resolvable:$true] %s355_s12 }
  0x1f   : > { %s2877_s29 = sshll.u32 %s3661_s22, 5  ;;  %s362_s30 = sand.u32 1, %s3525_s16  }
  0x20   : > { %s366_s6 = scalar_lea.vmem [#allocation4], %s2877_s29  ;;  %s344_s18 = scalar_lea.sflag [#allocation3], %s3661_s22 }
  0x21   : > { %s374_s8 = sshll.u32 %s366_s6, 4  ;;  %s3419_s15 = sshra.s32 %s354_s27, 4  ;;  %s3420_s15 = int_to_ptr.hbm [resolvable:$true] %s3419_s15  ;;  %s375_s8 = int_to_ptr.vmem [resolvable:$true] %s374_s8 }
  0x22   : > { %s3421_s23 = scalar_lea.hbm %s3420_s15, 8  ;;  %p3423_p2 = pneg %p3670_p13 }
  0x23   : > { %p3422_p0 = scmp.ne.s32.totalorder %s3420_s15, %s3421_s23  ;;  %s3426_s26 = scalar_lea.hbm %s4566_s1, 16 }
  0x24   : > { %p3427_p6 = scmp.lt.s32.totalorder %s3420_s15, %s4566_s1  ;;  %p3428_p7 = scmp.lt.s32.totalorder %s3426_s26, %s3421_s23 }
  0x25   : > { %p3424_p4 = pnand %p3423_p2, %p3422_p0 }
  0x26   : > { %p3429_p8 = por %p3428_p7, %p3427_p6 }
  0x27   : > { %p3425_p5 = pneg %p3424_p4 }
  0x29   : > { %p3430_p9 = pnand %p3429_p8, %p3425_p5 }
  0x2b   : > { %3433 = shalt.err (!%p3430_p9)
}
  0x2c   : > { %2987 = dma.hbm_to_vmem [thread:$0]  (!%p3670_p13), %s354_s27, 128, %s356_s12, %s344_s18  }
  0x2d   : > { %s2962_s6 = sshll.u32 %s3525_s16, 5  ;;  %s363_s11 = scalar_lea.sflag [#allocation5], %s362_s30 }
  0x2e   : > { %s371_s24 = scalar_lea.hbm %s4567_s2, %s2962_s6  ;;  %s3456_s18 = scalar_lea.hbm %s4567_s2, 64 }
  0x2f   : > { %s372_s25 = sshll.u32 %s371_s24, 4  ;;  %s373_s25 = int_to_ptr.hbm [resolvable:$true] %s372_s25 }
  0x30   : > { %s3449_s13 = sshra.s32 %s373_s25, 4  ;;  %s3450_s13 = int_to_ptr.hbm [resolvable:$true] %s3449_s13 }
  0x31   : > { %s3451_s15 = scalar_lea.hbm %s3450_s13, 32  ;;  %p3457_p4 = scmp.lt.s32.totalorder %s3450_s13, %s4567_s2 }
  0x32   : > { %p3452_p10 = scmp.ne.s32.totalorder %s3450_s13, %s3451_s15  ;;  %p3458_p5 = scmp.lt.s32.totalorder %s3456_s18, %s3451_s15 }
  0x34   : > { %p3454_p11 = pnand %p3452_p10, %p3423_p2  ;;  %p3459_p6 = por %p3458_p5, %p3457_p4 }
  0x36   : > { %p3455_p0 = pneg %p3454_p11 }
  0x38   : > { %p3460_p7 = pnand %p3459_p6, %p3455_p0 }
  0x3a   : > { %3463 = shalt.err (!%p3460_p7)
}
  0x3b   : > { %s4591_s30 = smov 8   ;;  %s4592_s12 = smov 128  }
  0x3c   : > { %2990 = dma.hbm_to_vmem [thread:$0]  (!%p3670_p13), %s373_s25, 512, %s375_s8, %s363_s11, %s4592_s12, %s4592_s12, %s4591_s30  }
  0x3d   : > { %406 = sbr.rel (%p3622_p3) target bundleno = 10649 (0x2999), region = 60  ;;  %s408_s28 = sand.u32 (!%p3622_p3), 1, %s3517_s14  }
  0x3e   : > { %s2881_s6 = sshll.u32 (!%p3622_p3), %s408_s28, 3  ;;  %s409_s29 = scalar_lea.sflag (!%p3622_p3), [#allocation3], %s408_s28 }
  0x3f   : > { %s412_s22 = scalar_lea.vmem (!%p3622_p3), [#allocation2], %s2881_s6 }
  0x42   : > { %3496 = dma.done.wait (%p3656_p12), %s409_s29, 128  }
  0x43   : > { %3498 = vsyncadd (%p3656_p12), %s409_s29, 4294967168  ;;  %s418_s17 = sand.u32 1, %s3617_s20   ;;  %s2882_s24 = sshll.u32 %s408_s28, 5 }
  0x44   : > { %s419_s13 = scalar_lea.sflag [#allocation5], %s418_s17  ;;  %s3716_s8 = scalar_lea.vmem [#allocation4], %s2882_s24 }
  0x45   : > { %3500 = dma.done.wait (%p3656_p12), %s419_s13, 512  }
  0x46   : > { %3502 = vsyncadd (%p3656_p12), %s419_s13, 4294966784 }
  0x47   : > { %3504 = dma.done.wait (%p69_p1), [#allocation5], 768  }
  0x48   : > { %3506 = vsyncadd (%p69_p1), [#allocation5], 4294966528 }
  0x49   : > { %3508 = dma.done.wait (%p69_p1), [#allocation8], 512  }
  0x4a   : > { %3510 = vsyncadd (%p69_p1), [#allocation8], 4294966784  ;;  %p486_p3 = scmp.lt.s32.totalorder %s3617_s20, 1  ;;  %vm542_vm0 = vcmask 64512   ;;  %v537_v0 = vld [vmem:[%s412_s22] sm:$0xff]  ;;  %v3757_v4 = vld [vmem:[%s3716_s8 + $0x8] sm:$0xff] }
  0x4b   : > { %v536_v1 = vld [vmem:[%s4565_s0] sm:$0x3]  ;;  %v3738_v2 = vld [vmem:[%s3716_s8 + $0x18] sm:$0xff]  ;;  %561 = vmatpush.msra.mxu0 %v537_v0  ;;  %v3762_v5 = vld [vmem:[%s3716_s8] sm:$0xff]  ;;  %v3531_v6 = vmov 0.0   ;;  %s3532_s16 = smov 32  }
  0x4c   : > { %s4599_s20 = smov (!%p486_p3, %s3617_s20), 1  ;;  %848 = vmatpush.msra.mxu1 %v3738_v2  ;;  %2889 = vmatmul.msk.f32.vlgmr.msra.gmra.mxu0 %vm542_vm0, %v536_v1  ;;  %v3752_v3 = vld [vmem:[%s3716_s8 + $0x10] sm:$0xff]  ;;  %s3533_s6 = smov 64   ;;  %vm566_vm5 = vcmask 261120   ;;  %vm633_vm6 = vcmask 523264   ;;  %vm700_vm11 = vcmask 392192  }
  0x4d   : > { %s488_s15 = scalar_lea.vmem %s4568_s3, %s4599_s20  ;;  %s3748_s18 = scalar_lea.vmem %s4570_s5, %s4599_s20  ;;  %582 = vmatpush.msrb.mxu0 %v3738_v2 }
  0x4e   : > { %849 = vmatpush.msra.mxu1 %v3752_v3  ;;  %v3040_v8 = vld [vmem:[%s488_s15] ss:$0 sm:$0xff]  ;;  %s2963_s27 = sshll.u32 %s4599_s20, 6  ;;  %s3534_s17 = smov 80  }
  0x4f   : > { %583 = vmatpush.msrb.mxu0 %v3752_v3  ;;  %s3780_s28 = scalar_lea.vmem %s4569_s4, %s2963_s27  ;;  %v3823_v44 = vld [vmem:[%s3748_s18] ss:$0 sm:$0xff]  ;;  %s3535_s24 = smov 16  }
  0x50   : > { %850 = vmatpush.msra.mxu1 %v3757_v4  ;;  %v3783_v32 = vld [vmem:[%s3780_s28 + $0x38] sm:$0xff]  ;;  %v3786_v33 = vld [vmem:[%s3780_s28 + $0x30] sm:$0xff]  ;;  %v3790_v34 = vld [vmem:[%s3780_s28 + $0x28] sm:$0xff]  ;;  %s3536_s13 = smov 96   ;;  %s3537_s19 = smov 112  }
  0x51   : > { %584 = vmatpush.msrb.mxu0 %v3757_v4  ;;  %645 = vmatpush.msra.mxu2 %v3783_v32  ;;  %v3794_v35 = vld [vmem:[%s3780_s28 + $0x20] sm:$0xff]  ;;  %v3798_v36 = vld [vmem:[%s3780_s28 + $0x18] sm:$0xff]  ;;  %v3802_v37 = vld [vmem:[%s3780_s28 + $0x10] sm:$0xff]  ;;  %s2964_s30 = sshll.u32 %s4599_s20, 4 }
  0x52   : > { %851 = vmatpush.msra.mxu1 %v3762_v5  ;;  %v3806_v38 = vld [vmem:[%s3780_s28 + $0x8] sm:$0xff]  ;;  %v3812_v41 = vld [vmem:[%s3780_s28] sm:$0xff] }
  0x53   : > { %585 = vmatpush.msrb.mxu0 %v3762_v5  ;;  %646 = vmatpush.msra.mxu2 %v3786_v33 }
  0x54   : > { %586 = vmatmul.f32.vlgmr.msrb.gmra.mxu0 %v3531_v6 }
  0x55   : > { %647 = vmatpush.msra.mxu2 %v3790_v34 }
  0x57   : > { %648 = vmatpush.msra.mxu2 %v3794_v35 }
  0x59   : > { %649 = vmatpush.msra.mxu2 %v3798_v36 }
  0x5b   : > { %650 = vmatpush.msra.mxu2 %v3802_v37 }
  0x5d   : > { %651 = vmatpush.msra.mxu2 %v3806_v38 }
  0x5f   : > { %652 = vmatpush.msra.mxu2 %v3812_v41 }
  0x61   : > { %1119 = vmatpush.msrb.mxu2 %v3738_v2 }
  0x63   : > { %1120 = vmatpush.msrb.mxu2 %v3752_v3 }
  0x65   : > { %1121 = vmatpush.msrb.mxu2 %v3757_v4 }
  0x67   : > { %1122 = vmatpush.msrb.mxu2 %v3762_v5 }
  0xc9   : > { %v563_v7 = vpop.f32.mrf.mxu0 }
  0xca   : > { %v3767_v9 = vadd.f32 %v3040_v8, %v563_v7 }
  0xd1   : > { %v587_v10 = vpop.f32.mrf.mxu0 }
  0xd2   : > { %v590_v11 = vadd.f32 %v587_v10, %v3767_v9 }
  0xd4   : > { %3043 = vtanh.f32 %v590_v11  ;;  %v2890_v13 = vmul.f32 -1.442695, %v590_v11  ;;  %v3834_v11 = vld [vmem:[#allocation6 + $0x28] sm:$0xff] }
  0xd5   : > { %714 = vmatpush.msra.mxu3 %v3834_v11 }
  0xd6   : > { %3045 = vpow2.f32 %v2890_v13  ;;  %v3840_v13 = vld [vmem:[#allocation6 + $0x18] sm:$0xff] }
  0xda   : > { %v3044_v12 = vpop.eup %3043 }
  0xdb   : > { %613 = vrot.lane.b32.xlu0 %v3044_v12, %s3532_s16  ;;  %v3836_v12 = vld [vmem:[#allocation6 + $0x20] sm:$0xff] }
  0xdc   : > { %v3046_v14 = vpop.eup %3045  ;;  %715 = vmatpush.msra.mxu3 %v3836_v12 }
  0xdd   : > { %v594_v15 = vadd.f32 1.0, %v3046_v14  ;;  %v3844_v14 = vld [vmem:[#allocation6 + $0x10] sm:$0xff] }
  0xde   : > { %716 = vmatpush.msra.mxu3 %v3840_v13 }
  0xdf   : > { %3047 = vrcp.f32 %v594_v15  ;;  %v606_v21 = vand.u32 2147483648, %v594_v15  ;;  %vm600_vm2 = vweird.f32 %v594_v15  ;;  %v604_v22 = vand.u32 2147483647, %v594_v15 }
  0xe0   : > { %717 = vmatpush.msra.mxu3 %v3844_v14 }
  0xe1   : > { %v607_v24 = vor.u32 1.1754944e-38, %v606_v21  ;;  %vm605_vm4 = vcmp.eq.f32.partialorder %v604_v22, 8.507059e+37 }
  0xe5   : > { %v3048_v16 = vpop.eup %3047 }
  0xe6   : > { %v596_v17 = vmul.f32 %v3048_v16, %v594_v15  ;;  %vm601_vm1 = vweird.f32 %v3048_v16  ;;  %v3848_v15 = vld [vmem:[#allocation6 + $0x8] sm:$0xff] }
  0xe7   : > { %vm602_vm3 = vmor %vm600_vm2, %vm601_vm1  ;;  %718 = vmatpush.msra.mxu3 %v3848_v15 }
  0xe8   : > { %v597_v18 = vsub.f32 1.0, %v596_v17 }
  0xea   : > { %v598_v19 = vmul.f32 %v3048_v16, %v597_v18 }
  0xec   : > { %v599_v20 = vadd.f32 %v3048_v16, %v598_v19  ;;  %v3858_v19 = vld [vmem:[#allocation6] sm:$0xff] }
  0xed   : > { %719 = vmatpush.msra.mxu3 %v3858_v19 }
  0xee   : > { %v603_v23 = vsel %vm602_vm3, %v3048_v16, %v599_v20 }
  0xef   : > { %v608_v26 = vsel %vm605_vm4, %v607_v24, %v603_v23  ;;  %982 = vmatpush.msrb.mxu3 %v3834_v11  ;;  %vm765_vm4 = vcmask 130048  }
  0xf0   : > { %v611_v28 = vmul.f32 0.0, %v608_v26 }
  0xf1   : > { %983 = vmatpush.msrb.mxu3 %v3836_v12 }
  0xf3   : > { %984 = vmatpush.msrb.mxu3 %v3840_v13 }
  0xf5   : > { %985 = vmatpush.msrb.mxu3 %v3844_v14 }
  0xf7   : > { %986 = vmatpush.msrb.mxu3 %v3848_v15 }
  0xf9   : > { %987 = vmatpush.msrb.mxu3 %v3858_v19 }
 0x14d   : > { %v614_v25 = vpop.permute.xlu0 %613 }
 0x14e   : > { %v616_v27 = vmul.f32 %v614_v25, %v608_v26 }
 0x150   : > { %618 = vrot.lane.b32.xlu0 %v616_v27, %s3532_s16  ;;  %v3873_v27 = vld [vmem:[%s4572_s7] ss:$0 sm:$0xff] }
 0x1c2   : > { %v619_v29 = vpop.permute.xlu0 %618 }
 0x1c3   : > { %v3772_v30 = vadd.f32 %v619_v29, %v611_v28 }
 0x1c5   : > { %3049 = vtanh.f32 %v3772_v30 }
 0x1cb   : > { %v3050_v31 = vpop.eup %3049 }
 0x1cc   : > { %624 = vrot.lane.b32.xlu1 %v3050_v31, %s3532_s16 }
 0x23e   : > { %v625_v39 = vpop.permute.xlu1 %624 }
 0x23f   : > { %v627_v40 = vmul.f32 %v625_v39, %v608_v26 }
 0x241   : > { %629 = vrot.lane.b32.xlu1 %v627_v40, %s3533_s6 }
 0x2b3   : > { %v630_v42 = vpop.permute.xlu1 %629 }
 0x2b4   : > { %2897 = vmatmul.msk.f32.vlgmr.msra.gmra.mxu1 %vm566_vm5, %v630_v42  ;;  %v632_v43 = vsel %vm566_vm5, %v630_v42, 0.0 }
 0x2b5   : > { %2891 = vmatmul.msk.f32.vlgmr.msra.gmra.mxu2 %vm633_vm6, %v632_v43 }
 0x2b6   : > { %1253 = vmatpush.msra.mxu2 %v3834_v11 }
 0x2b8   : > { %1254 = vmatpush.msra.mxu2 %v3836_v12 }
 0x2ba   : > { %1255 = vmatpush.msra.mxu2 %v3840_v13 }
 0x2bc   : > { %1256 = vmatpush.msra.mxu2 %v3844_v14 }
 0x2be   : > { %1257 = vmatpush.msra.mxu2 %v3848_v15 }
 0x2c0   : > { %1258 = vmatpush.msra.mxu2 %v3858_v19 }
 0x331   : > { %v853_v6 = vpop.f32.mrf.mxu1 }
 0x332   : > { %v856_v7 = vadd.f32 %v853_v6, %v3767_v9 }
 0x334   : > { %v2898_v22 = vmul.f32 -1.442695, %v856_v7 }
 0x338   : > { %v654_v45 = vpop.f32.mrf.mxu2 }
 0x339   : > { %v655_v46 = vadd.f32 %v3823_v44, %v654_v45 }
 0x33b   : > { %3051 = vtanh.f32 %v655_v46  ;;  %v2892_v48 = vmul.f32 -1.442695, %v655_v46 }
 0x33d   : > { %3053 = vpow2.f32 %v2892_v48 }
 0x341   : > { %v3052_v47 = vpop.eup %3051 }
 0x342   : > { %679 = vrot.lane.b32.xlu2 %v3052_v47, %s3532_s16 }
 0x343   : > { %v3054_v49 = vpop.eup %3053 }
 0x344   : > { %v660_v50 = vadd.f32 1.0, %v3054_v49 }
 0x346   : > { %3055 = vrcp.f32 %v660_v50  ;;  %v672_v56 = vand.u32 2147483648, %v660_v50  ;;  %vm666_vm8 = vweird.f32 %v660_v50  ;;  %v670_v57 = vand.u32 2147483647, %v660_v50 }
 0x348   : > { %v673_v59 = vor.u32 1.1754944e-38, %v672_v56  ;;  %vm671_vm10 = vcmp.eq.f32.partialorder %v670_v57, 8.507059e+37 }
 0x34c   : > { %v3056_v51 = vpop.eup %3055 }
 0x34d   : > { %v662_v52 = vmul.f32 %v3056_v51, %v660_v50  ;;  %vm667_vm7 = vweird.f32 %v3056_v51 }
 0x34e   : > { %vm668_vm9 = vmor %vm666_vm8, %vm667_vm7 }
 0x34f   : > { %v663_v53 = vsub.f32 1.0, %v662_v52 }
 0x351   : > { %v664_v54 = vmul.f32 %v3056_v51, %v663_v53 }
 0x353   : > { %v665_v55 = vadd.f32 %v3056_v51, %v664_v54 }
 0x355   : > { %v669_v58 = vsel %vm668_vm9, %v3056_v51, %v665_v55 }
 0x356   : > { %v674_v61 = vsel %vm671_vm10, %v673_v59, %v669_v58 }
 0x357   : > { %v677_v63 = vmul.f32 0.0, %v674_v61 }
 0x39c   : > { %v680_v60 = vpop.permute.xlu2 %679 }
 0x39d   : > { %v682_v62 = vmul.f32 %v680_v60, %v674_v61 }
 0x39f   : > { %684 = vrot.lane.b32.xlu2 %v682_v62, %s3532_s16 }
 0x3f9   : > { %v685_v0 = vpop.permute.xlu2 %684 }
 0x3fa   : > { %v3828_v1 = vadd.f32 %v685_v0, %v677_v63 }
 0x3fc   : > { %3057 = vtanh.f32 %v3828_v1 }
 0x3fd   : > { %3059 = vtanh.f32 %v856_v7 }
 0x402   : > { %v3058_v8 = vpop.eup %3057 }
 0x403   : > { %690 = vrot.lane.b32.xlu0 %v3058_v8, %s3532_s16  ;;  %v3060_v10 = vpop.eup %3059 }
 0x40b   : > { %879 = vrot.lane.b32.xlu0 %v3060_v10, %s3532_s16 }
 0x475   : > { %v691_v16 = vpop.permute.xlu0 %690 }
 0x476   : > { %v3854_v17 = vmul.f32 %v691_v16, %v674_v61 }
 0x478   : > { %3061 = vtanh.f32 %v3854_v17 }
 0x479   : > { %3063 = vpow2.f32 %v2898_v22 }
 0x47d   : > { %v880_v48 = vpop.permute.xlu0 %879 }
 0x47e   : > { %v3062_v18 = vpop.eup %3061 }
 0x47f   : > { %696 = vrot.lane.b32.xlu1 %v3062_v18, %s3533_s6  ;;  %v3064_v23 = vpop.eup %3063 }
 0x480   : > { %v860_v24 = vadd.f32 1.0, %v3064_v23 }
 0x482   : > { %3065 = vrcp.f32 %v860_v24  ;;  %v872_v43 = vand.u32 2147483648, %v860_v24  ;;  %vm866_vm13 = vweird.f32 %v860_v24  ;;  %v870_v45 = vand.u32 2147483647, %v860_v24 }
 0x484   : > { %v873_v47 = vor.u32 1.1754944e-38, %v872_v43  ;;  %vm871_vm15 = vcmp.eq.f32.partialorder %v870_v45, 8.507059e+37 }
 0x488   : > { %v3066_v25 = vpop.eup %3065 }
 0x489   : > { %v862_v26 = vmul.f32 %v3066_v25, %v860_v24  ;;  %vm867_vm12 = vweird.f32 %v3066_v25  ;;  %v3891_v24 = vld [vmem:[#allocation7 + $0x18] sm:$0xff] }
 0x48a   : > { %vm868_vm14 = vmor %vm866_vm13, %vm867_vm12  ;;  %782 = vmatpush.msra.mxu0 %v3891_v24  ;;  %1053 = vmatpush.msrb.mxu1 %v3891_v24 }
 0x48b   : > { %v863_v28 = vsub.f32 1.0, %v862_v26  ;;  %v3902_v26 = vld [vmem:[#allocation7] sm:$0xff] }
 0x48d   : > { %v864_v39 = vmul.f32 %v3066_v25, %v863_v28 }
 0x48f   : > { %v865_v40 = vadd.f32 %v3066_v25, %v864_v39 }
 0x491   : > { %v869_v46 = vsel %vm868_vm14, %v3066_v25, %v865_v40  ;;  %v3893_v25 = vld [vmem:[#allocation7 + $0x10] sm:$0xff] }
 0x492   : > { %v874_v49 = vsel %vm871_vm15, %v873_v47, %v869_v46  ;;  %783 = vmatpush.msra.mxu0 %v3893_v25  ;;  %1054 = vmatpush.msrb.mxu1 %v3893_v25 }
 0x493   : > { %v882_v50 = vmul.f32 %v880_v48, %v874_v49  ;;  %v877_v7 = vmul.f32 %v874_v49, %v3772_v30 }
 0x4f1   : > { %v697_v20 = vpop.permute.xlu1 %696 }
 0x4f2   : > { %v699_v21 = vsel %vm566_vm5, %v697_v20, 0.0 }
 0x4f3   : > { %2893 = vmatmul.msk.f32.vlgmr.msra.gmra.mxu3 %vm700_vm11, %v699_v21 }
 0x4f4   : > { %1324 = vmatpush.msra.mxu3 %v3891_v24 }
 0x4f6   : > { %1325 = vmatpush.msra.mxu3 %v3893_v25 }
 0x576   : > { %v721_v29 = vpop.f32.mrf.mxu3 }
 0x577   : > { %v722_v31 = vadd.f32 %v3873_v27, %v721_v29 }
 0x579   : > { %3067 = vtanh.f32 %v722_v31  ;;  %v2894_v51 = vmul.f32 -1.442695, %v722_v31 }
 0x57b   : > { %3069 = vpow2.f32 %v2894_v51 }
 0x57f   : > { %v3068_v42 = vpop.eup %3067 }
 0x580   : > { %746 = vrot.lane.b32.xlu2 %v3068_v42, %s3534_s17 }
 0x581   : > { %v3070_v52 = vpop.eup %3069 }
 0x582   : > { %v727_v53 = vadd.f32 1.0, %v3070_v52 }
 0x584   : > { %3071 = vrcp.f32 %v727_v53  ;;  %v739_v59 = vand.u32 2147483648, %v727_v53  ;;  %vm733_vm1 = vweird.f32 %v727_v53  ;;  %v737_v60 = vand.u32 2147483647, %v727_v53 }
 0x586   : > { %v740_v62 = vor.u32 1.1754944e-38, %v739_v59  ;;  %vm738_vm3 = vcmp.eq.f32.partialorder %v737_v60, 8.507059e+37  ;;  %v3955_v59 = vld [vmem:[%s4574_s9] ss:$0 sm:$0xff] }
 0x588   : > { %884 = vrot.lane.b32.xlu2 %v882_v50, %s3532_s16 }
 0x58a   : > { %v3072_v54 = vpop.eup %3071 }
 0x58b   : > { %v729_v55 = vmul.f32 %v3072_v54, %v727_v53  ;;  %vm734_vm0 = vweird.f32 %v3072_v54 }
 0x58c   : > { %vm735_vm2 = vmor %vm733_vm1, %vm734_vm0 }
 0x58d   : > { %v730_v56 = vsub.f32 1.0, %v729_v55 }
 0x58f   : > { %v731_v57 = vmul.f32 %v3072_v54, %v730_v56 }
 0x591   : > { %v732_v58 = vadd.f32 %v3072_v54, %v731_v57 }
 0x593   : > { %v736_v61 = vsel %vm735_vm2, %v3072_v54, %v732_v58 }
 0x594   : > { %v741_v0 = vsel %vm738_vm3, %v740_v62, %v736_v61 }
 0x595   : > { %v744_v18 = vmul.f32 0.0, %v741_v0 }
 0x5da   : > { %v747_v63 = vpop.permute.xlu2 %746 }
 0x5db   : > { %v749_v6 = vmul.f32 %v747_v63, %v741_v0 }
 0x5dd   : > { %751 = vrot.lane.b32.xlu1 %v749_v6, %s3535_s24 }
 0x5e2   : > { %v885_v8 = vpop.permute.xlu2 %884 }
 0x5e3   : > { %v3880_v10 = vadd.f32 %v885_v8, %v877_v7 }
 0x5e5   : > { %3073 = vtanh.f32 %v3880_v10 }
 0x5eb   : > { %v3074_v16 = vpop.eup %3073 }
 0x5ec   : > { %890 = vrot.lane.b32.xlu1 %v3074_v16, %s3532_s16 }
 0x5f4   : > { %899 = vrot.lane.b32.xlu1 %v3854_v17, %s3536_s13  ;;  %v3897_v17 = vld [vmem:[#allocation7 + $0x8] sm:$0xff] }
 0x5f5   : > { %784 = vmatpush.msra.mxu0 %v3897_v17  ;;  %1055 = vmatpush.msrb.mxu1 %v3897_v17 }
 0x5f6   : > { %1326 = vmatpush.msra.mxu3 %v3897_v17 }
 0x5f7   : > { %785 = vmatpush.msra.mxu0 %v3902_v26  ;;  %1056 = vmatpush.msrb.mxu1 %v3902_v26 }
 0x5f8   : > { %1327 = vmatpush.msra.mxu3 %v3902_v26 }
 0x5f9   : > { %914 = vmatpush.msrb.mxu0 %v3783_v32  ;;  %1185 = vmatpush.msra.mxu1 %v3783_v32 }
 0x5fb   : > { %915 = vmatpush.msrb.mxu0 %v3786_v33  ;;  %1186 = vmatpush.msra.mxu1 %v3786_v33 }
 0x5fd   : > { %916 = vmatpush.msrb.mxu0 %v3790_v34  ;;  %1187 = vmatpush.msra.mxu1 %v3790_v34 }
 0x5ff   : > { %917 = vmatpush.msrb.mxu0 %v3794_v35  ;;  %1188 = vmatpush.msra.mxu1 %v3794_v35 }
 0x601   : > { %918 = vmatpush.msrb.mxu0 %v3798_v36  ;;  %1189 = vmatpush.msra.mxu1 %v3798_v36 }
 0x603   : > { %919 = vmatpush.msrb.mxu0 %v3802_v37  ;;  %1190 = vmatpush.msra.mxu1 %v3802_v37 }
 0x605   : > { %920 = vmatpush.msrb.mxu0 %v3806_v38  ;;  %1191 = vmatpush.msra.mxu1 %v3806_v38 }
 0x607   : > { %921 = vmatpush.msrb.mxu0 %v3812_v41  ;;  %1192 = vmatpush.msra.mxu1 %v3812_v41 }
 0x64f   : > { %v752_v20 = vpop.permute.xlu1 %751 }
 0x650   : > { %v3886_v21 = vadd.f32 %v752_v20, %v744_v18 }
 0x652   : > { %3075 = vtanh.f32 %v3886_v21 }
 0x658   : > { %v3076_v22 = vpop.eup %3075 }
 0x659   : > { %757 = vrot.lane.b32.xlu0 %v3076_v22, %s3535_s24 }
 0x65e   : > { %v891_v30 = vpop.permute.xlu1 %890 }
 0x65f   : > { %v893_v23 = vmul.f32 %v891_v30, %v874_v49 }
 0x661   : > { %895 = vrot.lane.b32.xlu0 %v893_v23, %s3533_s6 }
 0x666   : > { %v900_v42 = vpop.permute.xlu1 %899 }
 0x6cb   : > { %v758_v28 = vpop.permute.xlu0 %757 }
 0x6cc   : > { %v3927_v29 = vmul.f32 %v758_v28, %v741_v0 }
 0x6ce   : > { %762 = vrot.lane.b32.xlu2 %v3927_v29, %s3536_s13 }
 0x6d3   : > { %v896_v31 = vpop.permute.xlu0 %895 }
 0x6d4   : > { %2906 = vmatmul.msk.f32.vlgmr.msrb.gmra.mxu2 %vm566_vm5, %v896_v31  ;;  %v902_v43 = vsel %vm566_vm5, %v896_v31, %v900_v42 }
 0x6d5   : > { %1595 = vmatpush.msrb.mxu2 %v3891_v24 }
 0x6d7   : > { %1596 = vmatpush.msrb.mxu2 %v3893_v25 }
 0x6d9   : > { %1597 = vmatpush.msrb.mxu2 %v3897_v17 }
 0x6db   : > { %1598 = vmatpush.msrb.mxu2 %v3902_v26 }
 0x728   : > { %v763_v39 = vpop.permute.xlu2 %762 }
 0x729   : > { %v766_v40 = vsel %vm765_vm4, %v763_v39, 0.0 }
 0x72a   : > { %2895 = vmatmul.msk.f32.vlgmr.msra.gmra.mxu0 %vm566_vm5, %v766_v40 }
 0x72b   : > { %1390 = vmatpush.msra.mxu0 %v3738_v2 }
 0x72d   : > { %1391 = vmatpush.msra.mxu0 %v3752_v3 }
 0x72f   : > { %1392 = vmatpush.msra.mxu0 %v3757_v4 }
 0x731   : > { %1393 = vmatpush.msra.mxu0 %v3762_v5 }
 0x732   : > { %2899 = vmatmul.msk.f32.vlgmr.msrb.gmra.mxu0 %vm633_vm6, %v902_v43 }
 0x733   : > { %1524 = vmatpush.msrb.mxu0 %v3834_v11 }
 0x735   : > { %1525 = vmatpush.msrb.mxu0 %v3836_v12 }
 0x737   : > { %1526 = vmatpush.msrb.mxu0 %v3840_v13 }
 0x739   : > { %1527 = vmatpush.msrb.mxu0 %v3844_v14 }
 0x73b   : > { %1528 = vmatpush.msrb.mxu0 %v3848_v15 }
 0x73d   : > { %1529 = vmatpush.msrb.mxu0 %v3858_v19 }
 0x7a7   : > { %v787_v45 = vpop.f32.mrf.mxu0 }
 0x7a8   : > { %v788_v62 = vadd.f32 %v3955_v59, %v787_v45 }
 0x7aa   : > { %v2896_v8 = vmul.f32 -1.442695, %v788_v62 }
 0x7af   : > { %v923_v46 = vpop.f32.mrf.mxu0 }
 0x7b0   : > { %v924_v47 = vadd.f32 %v3823_v44, %v923_v46 }
 0x7b2   : > { %3077 = vtanh.f32 %v924_v47  ;;  %v2900_v49 = vmul.f32 -1.442695, %v924_v47 }
 0x7b4   : > { %3079 = vpow2.f32 %v2900_v49 }
 0x7b8   : > { %v3078_v48 = vpop.eup %3077 }
 0x7b9   : > { %948 = vrot.lane.b32.xlu2 %v3078_v48, %s3532_s16 }
 0x7ba   : > { %v3080_v50 = vpop.eup %3079 }
 0x7bb   : > { %v929_v51 = vadd.f32 1.0, %v3080_v50 }
 0x7bd   : > { %3081 = vrcp.f32 %v929_v51  ;;  %v941_v57 = vand.u32 2147483648, %v929_v51  ;;  %vm935_vm8 = vweird.f32 %v929_v51  ;;  %v939_v58 = vand.u32 2147483647, %v929_v51 }
 0x7be   : > { %3083 = vtanh.f32 %v788_v62 }
 0x7bf   : > { %v942_v61 = vor.u32 1.1754944e-38, %v941_v57  ;;  %vm940_vm10 = vcmp.eq.f32.partialorder %v939_v58, 8.507059e+37  ;;  %3085 = vpow2.f32 %v2896_v8 }
 0x7c3   : > { %v3082_v52 = vpop.eup %3081 }
 0x7c4   : > { %v931_v53 = vmul.f32 %v3082_v52, %v929_v51  ;;  %vm936_vm7 = vweird.f32 %v3082_v52  ;;  %v3084_v7 = vpop.eup %3083 }
 0x7c5   : > { %vm937_vm9 = vmor %vm935_vm8, %vm936_vm7  ;;  %v3086_v16 = vpop.eup %3085 }
 0x7c6   : > { %v932_v54 = vsub.f32 1.0, %v931_v53  ;;  %v793_v18 = vadd.f32 1.0, %v3086_v16 }
 0x7c8   : > { %v933_v55 = vmul.f32 %v3082_v52, %v932_v54  ;;  %3087 = vrcp.f32 %v793_v18  ;;  %v805_v42 = vand.u32 2147483648, %v793_v18  ;;  %vm799_vm13 = vweird.f32 %v793_v18 }
 0x7c9   : > { %v803_v43 = vand.u32 2147483647, %v793_v18 }
 0x7ca   : > { %v934_v56 = vadd.f32 %v3082_v52, %v933_v55  ;;  %v806_v46 = vor.u32 1.1754944e-38, %v805_v42  ;;  %v1124_v55 = vpop.f32.mrf.mxu2 }
 0x7cb   : > { %vm804_vm15 = vcmp.eq.f32.partialorder %v803_v43, 8.507059e+37 }
 0x7cc   : > { %v938_v60 = vsel %vm937_vm9, %v3082_v52, %v934_v56  ;;  %v1127_v56 = vadd.f32 %v1124_v55, %v3767_v9 }
 0x7cd   : > { %v943_v0 = vsel %vm940_vm10, %v942_v61, %v938_v60 }
 0x7ce   : > { %v3088_v20 = vpop.eup %3087  ;;  %v946_v28 = vmul.f32 %v943_v0, %v3828_v1  ;;  %v2907_v61 = vmul.f32 -1.442695, %v1127_v56 }
 0x7cf   : > { %v795_v22 = vmul.f32 %v3088_v20, %v793_v18  ;;  %vm800_vm12 = vweird.f32 %v3088_v20 }
 0x7d0   : > { %vm801_vm14 = vmor %vm799_vm13, %vm800_vm12 }
 0x7d1   : > { %v796_v30 = vsub.f32 1.0, %v795_v22 }
 0x7d3   : > { %v797_v23 = vmul.f32 %v3088_v20, %v796_v30 }
 0x7d5   : > { %v798_v40 = vadd.f32 %v3088_v20, %v797_v23 }
 0x7d7   : > { %v802_v45 = vsel %vm801_vm14, %v3088_v20, %v798_v40 }
 0x7d8   : > { %v3964_v47 = vsel %vm804_vm15, %v806_v46, %v802_v45 }
 0x7d9   : > { %v810_v51 = vmul.f32 0.0, %v3964_v47 }
 0x813   : > { %v949_v63 = vpop.permute.xlu2 %948 }
 0x814   : > { %v951_v6 = vmul.f32 %v949_v63, %v943_v0 }
 0x816   : > { %953 = vrot.lane.b32.xlu0 %v951_v6, %s3532_s16 }
 0x81e   : > { %812 = vrot.lane.b32.xlu0 %v3084_v7, %s3534_s17 }
 0x888   : > { %v954_v31 = vpop.permute.xlu0 %953 }
 0x889   : > { %v3961_v39 = vadd.f32 %v954_v31, %v946_v28 }
 0x88b   : > { %3089 = vtanh.f32 %v3961_v39 }
 0x890   : > { %v813_v48 = vpop.permute.xlu0 %812 }
 0x891   : > { %v3090_v49 = vpop.eup %3089  ;;  %v815_v1 = vmul.f32 %v813_v48, %v3964_v47 }
 0x892   : > { %959 = vrot.lane.b32.xlu1 %v3090_v49, %s3532_s16 }
 0x893   : > { %817 = vrot.lane.b32.xlu0 %v815_v1, %s3535_s24 }
 0x904   : > { %v960_v50 = vpop.permute.xlu1 %959 }
 0x905   : > { %v3970_v52 = vmul.f32 %v960_v50, %v943_v0  ;;  %v818_v53 = vpop.permute.xlu0 %817 }
 0x906   : > { %v3972_v54 = vadd.f32 %v818_v53, %v810_v51 }
 0x907   : > { %3091 = vtanh.f32 %v3970_v52 }
 0x908   : > { %3093 = vtanh.f32 %v3972_v54 }
 0x909   : > { %3095 = vtanh.f32 %v1127_v56 }
 0x90a   : > { %3097 = vpow2.f32 %v2907_v61 }
 0x90d   : > { %v3092_v57 = vpop.eup %3091 }
 0x90e   : > { %v3094_v58 = vpop.eup %3093  ;;  %965 = vrot.lane.b32.xlu2 %v3092_v57, %s3533_s6 }
 0x90f   : > { %823 = vrot.lane.b32.xlu0 %v3094_v58, %s3535_s24  ;;  %v3096_v60 = vpop.eup %3095 }
 0x910   : > { %v3098_v62 = vpop.eup %3097 }
 0x911   : > { %v1131_v63 = vadd.f32 1.0, %v3098_v62 }
 0x913   : > { %3099 = vrcp.f32 %v1131_v63  ;;  %v1143_v22 = vand.u32 2147483648, %v1131_v63  ;;  %vm1137_vm1 = vweird.f32 %v1131_v63  ;;  %v1141_v30 = vand.u32 2147483647, %v1131_v63 }
 0x915   : > { %v1144_v28 = vor.u32 1.1754944e-38, %v1143_v22  ;;  %vm1142_vm3 = vcmp.eq.f32.partialorder %v1141_v30, 8.507059e+37 }
 0x916   : > { %1150 = vrot.lane.b32.xlu2 %v3096_v60, %s3532_s16 }
 0x919   : > { %v3100_v0 = vpop.eup %3099 }
 0x91a   : > { %v1133_v6 = vmul.f32 %v3100_v0, %v1131_v63  ;;  %vm1138_vm0 = vweird.f32 %v3100_v0 }
 0x91b   : > { %vm1139_vm2 = vmor %vm1137_vm1, %vm1138_vm0 }
 0x91c   : > { %v1134_v7 = vsub.f32 1.0, %v1133_v6 }
 0x91e   : > { %v1135_v8 = vmul.f32 %v3100_v0, %v1134_v7 }
 0x920   : > { %v1136_v20 = vadd.f32 %v3100_v0, %v1135_v8 }
 0x922   : > { %v1140_v23 = vsel %vm1139_vm2, %v3100_v0, %v1136_v20 }
 0x923   : > { %v1145_v31 = vsel %vm1142_vm3, %v1144_v28, %v1140_v23 }
 0x924   : > { %v1148_v42 = vmul.f32 %v1145_v31, %v3880_v10 }
 0x968   : > { %v966_v16 = vpop.permute.xlu2 %965 }
 0x969   : > { %v968_v18 = vsel %vm566_vm5, %v966_v16, %v3927_v29 }
 0x96a   : > { %2901 = vmatmul.msk.f32.vlgmr.msrb.gmra.mxu3 %vm700_vm11, %v968_v18 }
 0x96b   : > { %1456 = vmatpush.msrb.mxu3 %v3783_v32 }
 0x96d   : > { %1457 = vmatpush.msrb.mxu3 %v3786_v33 }
 0x96f   : > { %1458 = vmatpush.msrb.mxu3 %v3790_v34 }
 0x970   : > { %v1151_v40 = vpop.permute.xlu2 %1150 }
 0x971   : > { %v1153_v29 = vmul.f32 %v1151_v40, %v1145_v31  ;;  %1459 = vmatpush.msrb.mxu3 %v3794_v35 }
 0x973   : > { %1155 = vrot.lane.b32.xlu2 %v1153_v29, %s3532_s16  ;;  %1460 = vmatpush.msrb.mxu3 %v3798_v36 }
 0x975   : > { %1461 = vmatpush.msrb.mxu3 %v3802_v37 }
 0x977   : > { %1462 = vmatpush.msrb.mxu3 %v3806_v38 }
 0x979   : > { %1463 = vmatpush.msrb.mxu3 %v3812_v41 }
 0x9cd   : > { %v1156_v43 = vpop.permute.xlu2 %1155 }
 0x9ce   : > { %v3993_v45 = vadd.f32 %v1156_v43, %v1148_v42 }
 0x9d0   : > { %3101 = vtanh.f32 %v3993_v45 }
 0x9d6   : > { %v3102_v46 = vpop.eup %3101 }
 0x9d7   : > { %1161 = vrot.lane.b32.xlu2 %v3102_v46, %s3532_s16 }
 0x9ed   : > { %v989_v48 = vpop.f32.mrf.mxu3 }
 0x9ee   : > { %v990_v49 = vadd.f32 %v3873_v27, %v989_v48 }
 0x9f0   : > { %3103 = vtanh.f32 %v990_v49  ;;  %v2902_v10 = vmul.f32 -1.442695, %v990_v49 }
 0x9f2   : > { %3105 = vpow2.f32 %v2902_v10 }
 0x9f6   : > { %v3104_v1 = vpop.eup %3103 }
 0x9f7   : > { %1014 = vrot.lane.b32.xlu1 %v3104_v1, %s3534_s17 }
 0x9f8   : > { %v3106_v53 = vpop.eup %3105 }
 0x9f9   : > { %v995_v55 = vadd.f32 1.0, %v3106_v53 }
 0x9fb   : > { %3107 = vrcp.f32 %v995_v55  ;;  %v1007_v62 = vand.u32 2147483648, %v995_v55  ;;  %vm1001_vm8 = vweird.f32 %v995_v55  ;;  %v1005_v63 = vand.u32 2147483647, %v995_v55 }
 0x9fd   : > { %v1008_v6 = vor.u32 1.1754944e-38, %v1007_v62  ;;  %vm1006_vm10 = vcmp.eq.f32.partialorder %v1005_v63, 8.507059e+37 }
 0xa01   : > { %v3108_v56 = vpop.eup %3107 }
 0xa02   : > { %v997_v57 = vmul.f32 %v3108_v56, %v995_v55  ;;  %vm1002_vm7 = vweird.f32 %v3108_v56 }
 0xa03   : > { %vm1003_vm9 = vmor %vm1001_vm8, %vm1002_vm7 }
 0xa04   : > { %v998_v58 = vsub.f32 1.0, %v997_v57 }
 0xa06   : > { %v999_v60 = vmul.f32 %v3108_v56, %v998_v58 }
 0xa08   : > { %v1000_v61 = vadd.f32 %v3108_v56, %v999_v60 }
 0xa0a   : > { %v1004_v0 = vsel %vm1003_vm9, %v3108_v56, %v1000_v61 }
 0xa0b   : > { %v1009_v8 = vsel %vm1006_vm10, %v1008_v6, %v1004_v0 }
 0xa0c   : > { %v1012_v20 = vmul.f32 %v1009_v8, %v3886_v21 }
 0xa31   : > { %v1162_v50 = vpop.permute.xlu2 %1161 }
 0xa32   : > { %v1164_v51 = vmul.f32 %v1162_v50, %v1145_v31 }
 0xa34   : > { %1166 = vrot.lane.b32.xlu2 %v1164_v51, %s3533_s6 }
 0xa69   : > { %v1015_v7 = vpop.permute.xlu1 %1014 }
 0xa6a   : > { %v1017_v16 = vmul.f32 %v1015_v7, %v1009_v8 }
 0xa6c   : > { %1019 = vrot.lane.b32.xlu1 %v1017_v16, %s3535_s24 }
 0xa8e   : > { %v1167_v18 = vpop.permute.xlu2 %1166 }
 0xa8f   : > { %2915 = vmatmul.msk.f32.vlgmr.msra.gmra.mxu0 %vm566_vm5, %v1167_v18 }
 0xa90   : > { %1795 = vmatpush.msra.mxu0 %v3834_v11  ;;  %v824_v11 = vpop.permute.xlu0 %823 }
 0xa92   : > { %1796 = vmatpush.msra.mxu0 %v3836_v12  ;;  %v4014_v12 = vmul.f32 %v824_v11, %v3964_v47 }
 0xa94   : > { %1797 = vmatpush.msra.mxu0 %v3840_v13 }
 0xa96   : > { %1798 = vmatpush.msra.mxu0 %v3844_v14 }
 0xa98   : > { %1799 = vmatpush.msra.mxu0 %v3848_v15 }
 0xa9a   : > { %1800 = vmatpush.msra.mxu0 %v3858_v19 }
 0xade   : > { %v1020_v22 = vpop.permute.xlu1 %1019 }
 0xadf   : > { %v4009_v30 = vadd.f32 %v1020_v22, %v1012_v20 }
 0xae1   : > { %3109 = vtanh.f32 %v4009_v30 }
 0xae7   : > { %v3110_v23 = vpop.eup %3109 }
 0xae8   : > { %1025 = vrot.lane.b32.xlu1 %v3110_v23, %s3535_s24 }
 0xaf0   : > { %1034 = vrot.lane.b32.xlu1 %v4014_v12, %s3537_s19 }
 0xb5a   : > { %v1026_v13 = vpop.permute.xlu1 %1025 }
 0xb5b   : > { %v4018_v14 = vmul.f32 %v1026_v13, %v1009_v8 }
 0xb5d   : > { %1030 = vrot.lane.b32.xlu0 %v4018_v14, %s3536_s13 }
 0xb62   : > { %v1035_v15 = vpop.permute.xlu1 %1034 }
 0xb65   : > { %1170 = vrot.lane.b32.xlu0 %v3970_v52, %s3536_s13 }
 0xbcf   : > { %v1031_v21 = vpop.permute.xlu0 %1030 }
 0xbd0   : > { %v1037_v28 = vsel %vm765_vm4, %v1031_v21, %v1035_v15 }
 0xbd1   : > { %2903 = vmatmul.msk.f32.vlgmr.msrb.gmra.mxu1 %vm566_vm5, %v1037_v28 }
 0xbd2   : > { %1661 = vmatpush.msrb.mxu1 %v3738_v2 }
 0xbd4   : > { %1662 = vmatpush.msrb.mxu1 %v3752_v3 }
 0xbd6   : > { %1663 = vmatpush.msrb.mxu1 %v3757_v4 }
 0xbd7   : > { %v1171_v47 = vpop.permute.xlu0 %1170 }
 0xbd8   : > { %v1173_v31 = vsel %vm566_vm5, %v1167_v18, %v1171_v47  ;;  %1664 = vmatpush.msrb.mxu1 %v3762_v5 }
 0xbd9   : > { %2908 = vmatmul.msk.f32.vlgmr.msra.gmra.mxu1 %vm633_vm6, %v1173_v31  ;;  %v1395_v31 = vpop.f32.mrf.mxu0 }
 0xbda   : > { %1866 = vmatpush.msra.mxu1 %v3891_v24 }
 0xbdc   : > { %1867 = vmatpush.msra.mxu1 %v3893_v25 }
 0xbde   : > { %1868 = vmatpush.msra.mxu1 %v3897_v17 }
 0xbe0   : > { %1869 = vmatpush.msra.mxu1 %v3902_v26 }
 0xc4e   : > { %v1058_v2 = vpop.f32.mrf.mxu1 }
 0xc4f   : > { %v1059_v49 = vadd.f32 %v3955_v59, %v1058_v2  ;;  %v1398_v2 = vadd.f32 %v1395_v31, %v3767_v9  ;;  %v4113_v31 = vld [vmem:[%s3780_s28 + $0x8] sm:$0xff] }
 0xc51   : > { %v2904_v53 = vmul.f32 -1.442695, %v1059_v49 }
 0xc56   : > { %v1194_v52 = vpop.f32.mrf.mxu1 }
 0xc57   : > { %v1195_v3 = vadd.f32 %v3823_v44, %v1194_v52 }
 0xc59   : > { %3111 = vtanh.f32 %v1195_v3  ;;  %v2909_v40 = vmul.f32 -1.442695, %v1195_v3  ;;  %v2916_v3 = vmul.f32 -1.442695, %v1398_v2 }
 0xc5b   : > { %3113 = vpow2.f32 %v2909_v40 }
 0xc5f   : > { %v3112_v4 = vpop.eup %3111 }
 0xc60   : > { %1219 = vrot.lane.b32.xlu1 %v3112_v4, %s3532_s16 }
 0xc61   : > { %v3114_v5 = vpop.eup %3113 }
 0xc62   : > { %v1200_v29 = vadd.f32 1.0, %v3114_v5 }
 0xc64   : > { %3115 = vrcp.f32 %v1200_v29  ;;  %v1212_v26 = vand.u32 2147483648, %v1200_v29  ;;  %vm1206_vm13 = vweird.f32 %v1200_v29  ;;  %v1210_v46 = vand.u32 2147483647, %v1200_v29 }
 0xc65   : > { %3117 = vtanh.f32 %v1059_v49 }
 0xc66   : > { %v1213_v48 = vor.u32 1.1754944e-38, %v1212_v26  ;;  %vm1211_vm15 = vcmp.eq.f32.partialorder %v1210_v46, 8.507059e+37  ;;  %3119 = vpow2.f32 %v2904_v53 }
 0xc6a   : > { %v3116_v24 = vpop.eup %3115 }
 0xc6b   : > { %v1202_v42 = vmul.f32 %v3116_v24, %v1200_v29  ;;  %vm1207_vm12 = vweird.f32 %v3116_v24  ;;  %v3118_v10 = vpop.eup %3117 }
 0xc6c   : > { %vm1208_vm14 = vmor %vm1206_vm13, %vm1207_vm12  ;;  %v3120_v55 = vpop.eup %3119 }
 0xc6d   : > { %v1203_v25 = vsub.f32 1.0, %v1202_v42  ;;  %v1064_v56 = vadd.f32 1.0, %v3120_v55 }
 0xc6f   : > { %v1204_v43 = vmul.f32 %v3116_v24, %v1203_v25  ;;  %3121 = vrcp.f32 %v1064_v56  ;;  %v1076_v7 = vand.u32 2147483648, %v1064_v56  ;;  %vm1070_vm1 = vweird.f32 %v1064_v56 }
 0xc70   : > { %v1074_v8 = vand.u32 2147483647, %v1064_v56 }
 0xc71   : > { %v1205_v17 = vadd.f32 %v3116_v24, %v1204_v43  ;;  %v1077_v18 = vor.u32 1.1754944e-38, %v1076_v7 }
 0xc72   : > { %vm1075_vm3 = vcmp.eq.f32.partialorder %v1074_v8, 8.507059e+37 }
 0xc73   : > { %v1209_v44 = vsel %vm1208_vm14, %v3116_v24, %v1205_v17 }
 0xc74   : > { %v1214_v50 = vsel %vm1211_vm15, %v1213_v48, %v1209_v44 }
 0xc75   : > { %v3122_v57 = vpop.eup %3121  ;;  %v1217_v62 = vmul.f32 %v1214_v50, %v3961_v39 }
 0xc76   : > { %v1066_v58 = vmul.f32 %v3122_v57, %v1064_v56  ;;  %vm1071_vm0 = vweird.f32 %v3122_v57 }
 0xc77   : > { %vm1072_vm2 = vmor %vm1070_vm1, %vm1071_vm0 }
 0xc78   : > { %v1067_v60 = vsub.f32 1.0, %v1066_v58 }
 0xc7a   : > { %v1068_v61 = vmul.f32 %v3122_v57, %v1067_v60 }
 0xc7c   : > { %v1069_v6 = vadd.f32 %v3122_v57, %v1068_v61 }
 0xc7e   : > { %v1073_v16 = vsel %vm1072_vm2, %v3122_v57, %v1069_v6 }
 0xc7f   : > { %v4045_v20 = vsel %vm1075_vm3, %v1077_v18, %v1073_v16  ;;  %v4085_v16 = vld [vmem:[%s3780_s28 + $0x38] sm:$0xff]  ;;  %v4089_v18 = vld [vmem:[%s3780_s28 + $0x30] sm:$0xff] }
 0xc80   : > { %v1081_v11 = vmul.f32 %v4045_v20, %v3972_v54 }
 0xcd2   : > { %v1220_v1 = vpop.permute.xlu1 %1219 }
 0xcd3   : > { %v1222_v51 = vmul.f32 %v1220_v1, %v1214_v50 }
 0xcd5   : > { %1224 = vrot.lane.b32.xlu2 %v1222_v51, %s3532_s16 }
 0xcdd   : > { %1083 = vrot.lane.b32.xlu2 %v3118_v10, %s3534_s17 }
 0xd2f   : > { %v1225_v63 = vpop.permute.xlu2 %1224 }
 0xd30   : > { %v4042_v0 = vadd.f32 %v1225_v63, %v1217_v62 }
 0xd32   : > { %3123 = vtanh.f32 %v4042_v0 }
 0xd37   : > { %v1084_v22 = vpop.permute.xlu2 %1083 }
 0xd38   : > { %v3124_v23 = vpop.eup %3123  ;;  %v1086_v39 = vmul.f32 %v1084_v22, %v4045_v20  ;;  %v4093_v22 = vld [vmem:[%s3780_s28 + $0x28] sm:$0xff] }
 0xd39   : > { %1230 = vrot.lane.b32.xlu0 %v3124_v23, %s3532_s16 }
 0xd3a   : > { %1088 = vrot.lane.b32.xlu2 %v1086_v39, %s3535_s24 }
 0xd94   : > { %v1089_v13 = vpop.permute.xlu2 %1088 }
 0xd95   : > { %v4052_v15 = vadd.f32 %v1089_v13, %v1081_v11  ;;  %v4098_v11 = vld [vmem:[%s3780_s28 + $0x20] sm:$0xff] }
 0xd97   : > { %3125 = vtanh.f32 %v4052_v15 }
 0xd9d   : > { %v3126_v21 = vpop.eup %3125 }
 0xd9e   : > { %1094 = vrot.lane.b32.xlu2 %v3126_v21, %s3535_s24  ;;  %v4104_v21 = vld [vmem:[%s3780_s28 + $0x18] sm:$0xff] }
 0xdab   : > { %v1231_v28 = vpop.permute.xlu0 %1230 }
 0xdac   : > { %v4056_v47 = vmul.f32 %v1231_v28, %v1214_v50  ;;  %v4109_v28 = vld [vmem:[%s3780_s28 + $0x10] sm:$0xff] }
 0xdae   : > { %3127 = vtanh.f32 %v4056_v47 }
 0xdaf   : > { %3129 = vtanh.f32 %v1398_v2 }
 0xdb0   : > { %3131 = vpow2.f32 %v2916_v3 }
 0xdb4   : > { %v3128_v52 = vpop.eup %3127 }
 0xdb5   : > { %1236 = vrot.lane.b32.xlu1 %v3128_v52, %s3533_s6  ;;  %v3130_v54 = vpop.eup %3129 }
 0xdb6   : > { %v3132_v4 = vpop.eup %3131 }
 0xdb7   : > { %v1402_v40 = vadd.f32 1.0, %v3132_v4 }
 0xdb9   : > { %3133 = vrcp.f32 %v1402_v40  ;;  %v1414_v26 = vand.u32 2147483648, %v1402_v40  ;;  %vm1408_vm8 = vweird.f32 %v1402_v40  ;;  %v1412_v46 = vand.u32 2147483647, %v1402_v40 }
 0xdbb   : > { %v1415_v48 = vor.u32 1.1754944e-38, %v1414_v26  ;;  %vm1413_vm10 = vcmp.eq.f32.partialorder %v1412_v46, 8.507059e+37  ;;  %v4155_v26 = vld [vmem:[#allocation6 + $0x20] sm:$0xff]  ;;  %v4158_v46 = vld [vmem:[#allocation6 + $0x18] sm:$0xff] }
 0xdbd   : > { %1421 = vrot.lane.b32.xlu1 %v3130_v54, %s3532_s16 }
 0xdbf   : > { %v3134_v5 = vpop.eup %3133 }
 0xdc0   : > { %v1404_v29 = vmul.f32 %v3134_v5, %v1402_v40  ;;  %vm1409_vm7 = vweird.f32 %v3134_v5 }
 0xdc1   : > { %vm1410_vm9 = vmor %vm1408_vm8, %vm1409_vm7 }
 0xdc2   : > { %v1405_v24 = vsub.f32 1.0, %v1404_v29 }
 0xdc4   : > { %v1406_v42 = vmul.f32 %v3134_v5, %v1405_v24  ;;  %v4139_v24 = vld [vmem:[%s3716_s8 + $0x10] sm:$0xff] }
 0xdc6   : > { %v1407_v17 = vadd.f32 %v3134_v5, %v1406_v42  ;;  %v4143_v42 = vld [vmem:[%s3716_s8 + $0x8] sm:$0xff] }
 0xdc8   : > { %v1411_v44 = vsel %vm1410_vm9, %v3134_v5, %v1407_v17  ;;  %v4152_v17 = vld [vmem:[#allocation6 + $0x28] sm:$0xff] }
 0xdc9   : > { %v1416_v49 = vsel %vm1413_vm10, %v1415_v48, %v1411_v44  ;;  %v4161_v44 = vld [vmem:[#allocation6 + $0x10] sm:$0xff]  ;;  %v4164_v48 = vld [vmem:[#allocation6 + $0x8] sm:$0xff] }
 0xdf8   : > { %v1095_v52 = vpop.permute.xlu2 %1094 }
 0xdf9   : > { %v4122_v54 = vmul.f32 %v1095_v52, %v4045_v20  ;;  %v4135_v20 = vld [vmem:[%s3716_s8 + $0x18] sm:$0xff] }
 0xe27   : > { %v1237_v25 = vpop.permute.xlu1 %1236 }
 0xe28   : > { %v1239_v43 = vsel %vm566_vm5, %v1237_v25, %v4018_v14 }
 0xe29   : > { %2910 = vmatmul.msk.f32.vlgmr.msra.gmra.mxu2 %vm700_vm11, %v1239_v43  ;;  %v4148_v43 = vld [vmem:[%s3716_s8] sm:$0xff] }
 0xe2a   : > { %1727 = vmatpush.msra.mxu2 %v3783_v32  ;;  %v1419_v32 = vmul.f32 %v1416_v49, %v3993_v45 }
 0xe2c   : > { %1728 = vmatpush.msra.mxu2 %v3786_v33 }
 0xe2e   : > { %1729 = vmatpush.msra.mxu2 %v3790_v34 }
 0xe2f   : > { %v1422_v1 = vpop.permute.xlu1 %1421 }
 0xe30   : > { %v1424_v14 = vmul.f32 %v1422_v1, %v1416_v49  ;;  %1730 = vmatpush.msra.mxu2 %v3794_v35 }
 0xe32   : > { %1426 = vrot.lane.b32.xlu1 %v1424_v14, %s3532_s16  ;;  %1731 = vmatpush.msra.mxu2 %v3798_v36  ;;  %v4169_v14 = vld [vmem:[%s3748_s18] ss:$0 sm:$0xff] }
 0xe34   : > { %1732 = vmatpush.msra.mxu2 %v3802_v37 }
 0xe36   : > { %1733 = vmatpush.msra.mxu2 %v3806_v38 }
 0xe38   : > { %1734 = vmatpush.msra.mxu2 %v3812_v41 }
 0xea4   : > { %v1427_v33 = vpop.permute.xlu1 %1426 }
 0xea5   : > { %v4075_v50 = vadd.f32 %v1427_v33, %v1419_v32 }
 0xea7   : > { %3135 = vtanh.f32 %v4075_v50 }
 0xeac   : > { %v1260_v34 = vpop.f32.mrf.mxu2 }
 0xead   : > { %v3136_v51 = vpop.eup %3135  ;;  %v1261_v35 = vadd.f32 %v3873_v27, %v1260_v34 }
 0xeae   : > { %1432 = vrot.lane.b32.xlu1 %v3136_v51, %s3532_s16 }
 0xeaf   : > { %3137 = vtanh.f32 %v1261_v35  ;;  %v2911_v37 = vmul.f32 -1.442695, %v1261_v35 }
 0xeb1   : > { %3139 = vpow2.f32 %v2911_v37 }
 0xeb5   : > { %v3138_v36 = vpop.eup %3137 }
 0xeb6   : > { %1285 = vrot.lane.b32.xlu0 %v3138_v36, %s3534_s17 }
 0xeb7   : > { %v3140_v38 = vpop.eup %3139 }
 0xeb8   : > { %v1266_v41 = vadd.f32 1.0, %v3140_v38 }
 0xeba   : > { %3141 = vrcp.f32 %v1266_v41  ;;  %v1278_v27 = vand.u32 2147483648, %v1266_v41  ;;  %vm1272_vm13 = vweird.f32 %v1266_v41  ;;  %v1276_v60 = vand.u32 2147483647, %v1266_v41 }
 0xebc   : > { %v1279_v62 = vor.u32 1.1754944e-38, %v1278_v27  ;;  %vm1277_vm15 = vcmp.eq.f32.partialorder %v1276_v60, 8.507059e+37 }
 0xec0   : > { %v3142_v45 = vpop.eup %3141 }
 0xec1   : > { %v1268_v10 = vmul.f32 %v3142_v45, %v1266_v41  ;;  %vm1273_vm12 = vweird.f32 %v3142_v45 }
 0xec2   : > { %vm1274_vm14 = vmor %vm1272_vm13, %vm1273_vm12 }
 0xec3   : > { %v1269_v53 = vsub.f32 1.0, %v1268_v10 }
 0xec5   : > { %v1270_v55 = vmul.f32 %v3142_v45, %v1269_v53 }
 0xec7   : > { %v1271_v58 = vadd.f32 %v3142_v45, %v1270_v55 }
 0xec9   : > { %v1275_v61 = vsel %vm1274_vm14, %v3142_v45, %v1271_v58 }
 0xeca   : > { %v1280_v6 = vsel %vm1277_vm15, %v1279_v62, %v1275_v61 }
 0xecb   : > { %v1283_v23 = vmul.f32 %v1280_v6, %v4009_v30  ;;  %v4117_v30 = vld [vmem:[%s3780_s28] sm:$0xff] }
 0xf20   : > { %v1433_v56 = vpop.permute.xlu1 %1432 }
 0xf21   : > { %v1435_v57 = vmul.f32 %v1433_v56, %v1416_v49 }
 0xf23   : > { %1437 = vrot.lane.b32.xlu1 %v1435_v57, %s3533_s6 }
 0xf28   : > { %v1286_v63 = vpop.permute.xlu0 %1285 }
 0xf29   : > { %v1288_v7 = vmul.f32 %v1286_v63, %v1280_v6 }
 0xf2b   : > { %1290 = vrot.lane.b32.xlu0 %v1288_v7, %s3535_s24 }
 0xf95   : > { %v1438_v8 = vpop.permute.xlu1 %1437 }
 0xf96   : > { %2924 = vmatmul.msk.f32.vlgmr.msrb.gmra.mxu1 %vm566_vm5, %v1438_v8 }
 0xf97   : > { %1998 = vmatpush.msrb.mxu1 %v4085_v16 }
 0xf99   : > { %1999 = vmatpush.msrb.mxu1 %v4089_v18 }
 0xf9b   : > { %2000 = vmatpush.msrb.mxu1 %v4093_v22 }
 0xf9d   : > { %v1291_v39 = vpop.permute.xlu0 %1290  ;;  %2001 = vmatpush.msrb.mxu1 %v4098_v11 }
 0xf9e   : > { %v4101_v13 = vadd.f32 %v1291_v39, %v1283_v23 }
 0xf9f   : > { %2002 = vmatpush.msrb.mxu1 %v4104_v21 }
 0xfa0   : > { %3143 = vtanh.f32 %v4101_v13 }
 0xfa1   : > { %2003 = vmatpush.msrb.mxu1 %v4109_v28 }
 0xfa3   : > { %2004 = vmatpush.msrb.mxu1 %v4113_v31 }
 0xfa5   : > { %2005 = vmatpush.msrb.mxu1 %v4117_v30 }
 0xfa6   : > { %v3144_v2 = vpop.eup %3143 }
 0xfa7   : > { %1296 = vrot.lane.b32.xlu0 %v3144_v2, %s3535_s24 }
 0xfaf   : > { %1305 = vrot.lane.b32.xlu0 %v4122_v54, %s3537_s19 }
0x1019   : > { %v1297_v3 = vpop.permute.xlu0 %1296 }
0x101a   : > { %v4126_v4 = vmul.f32 %v1297_v3, %v1280_v6 }
0x101c   : > { %1301 = vrot.lane.b32.xlu2 %v4126_v4, %s3536_s13 }
0x1021   : > { %v1306_v40 = vpop.permute.xlu0 %1305 }
0x1024   : > { %1441 = vrot.lane.b32.xlu2 %v4056_v47, %s3536_s13 }
0x1076   : > { %v1302_v5 = vpop.permute.xlu2 %1301 }
0x1077   : > { %v1308_v29 = vsel %vm765_vm4, %v1302_v5, %v1306_v40 }
0x1078   : > { %2912 = vmatmul.msk.f32.vlgmr.msra.gmra.mxu3 %vm566_vm5, %v1308_v29 }
0x1079   : > { %1932 = vmatpush.msra.mxu3 %v4135_v20 }
0x107b   : > { %1933 = vmatpush.msra.mxu3 %v4139_v24 }
0x107d   : > { %1934 = vmatpush.msra.mxu3 %v4143_v42 }
0x107e   : > { %v1442_v25 = vpop.permute.xlu2 %1441 }
0x107f   : > { %v1444_v47 = vsel %vm566_vm5, %v1438_v8, %v1442_v25  ;;  %1935 = vmatpush.msra.mxu3 %v4148_v43 }
0x1080   : > { %2917 = vmatmul.msk.f32.vlgmr.msrb.gmra.mxu3 %vm633_vm6, %v1444_v47 }
0x1081   : > { %2066 = vmatpush.msrb.mxu3 %v4152_v17 }
0x1083   : > { %2067 = vmatpush.msrb.mxu3 %v4155_v26 }
0x1085   : > { %2068 = vmatpush.msrb.mxu3 %v4158_v46 }
0x1087   : > { %2069 = vmatpush.msrb.mxu3 %v4161_v44 }
0x1089   : > { %2070 = vmatpush.msrb.mxu3 %v4164_v48 }
0x108b   : > { %2071 = vmatpush.msrb.mxu3 %v3858_v19 }
0x10fb   : > { %v1329_v49 = vpop.f32.mrf.mxu3 }
0x10fc   : > { %v1330_v56 = vadd.f32 %v3955_v59, %v1329_v49 }
0x10fe   : > { %v2913_v61 = vmul.f32 -1.442695, %v1330_v56 }
0x1103   : > { %v1465_v1 = vpop.f32.mrf.mxu3 }
0x1104   : > { %v1466_v32 = vadd.f32 %v4169_v14, %v1465_v1 }
0x1106   : > { %3145 = vtanh.f32 %v1466_v32  ;;  %v2918_v34 = vmul.f32 -1.442695, %v1466_v32 }
0x1108   : > { %3147 = vpow2.f32 %v2918_v34 }
0x110c   : > { %v3146_v33 = vpop.eup %3145 }
0x110d   : > { %1490 = vrot.lane.b32.xlu0 %v3146_v33, %s3532_s16  ;;  %v1666_v33 = vpop.f32.mrf.mxu1 }
0x110e   : > { %v3148_v51 = vpop.eup %3147  ;;  %v1669_v34 = vadd.f32 %v1666_v33, %v3767_v9 }
0x110f   : > { %v1471_v35 = vadd.f32 1.0, %v3148_v51 }
0x1111   : > { %3149 = vrcp.f32 %v1471_v35  ;;  %v1483_v45 = vand.u32 2147483648, %v1471_v35  ;;  %vm1477_vm1 = vweird.f32 %v1471_v35  ;;  %v1481_v10 = vand.u32 2147483647, %v1471_v35 }
0x1112   : > { %3151 = vtanh.f32 %v1330_v56 }
0x1113   : > { %v1484_v55 = vor.u32 1.1754944e-38, %v1483_v45  ;;  %vm1482_vm3 = vcmp.eq.f32.partialorder %v1481_v10, 8.507059e+37  ;;  %3153 = vpow2.f32 %v2913_v61 }
0x1117   : > { %v3150_v36 = vpop.eup %3149 }
0x1118   : > { %v1473_v37 = vmul.f32 %v3150_v36, %v1471_v35  ;;  %vm1478_vm0 = vweird.f32 %v3150_v36  ;;  %v3152_v60 = vpop.eup %3151 }
0x1119   : > { %vm1479_vm2 = vmor %vm1477_vm1, %vm1478_vm0  ;;  %v3154_v62 = vpop.eup %3153 }
0x111a   : > { %v1474_v38 = vsub.f32 1.0, %v1473_v37  ;;  %v1335_v63 = vadd.f32 1.0, %v3154_v62  ;;  %v4200_v62 = vld [vmem:[#allocation7 + $0x18] sm:$0xff] }
0x111c   : > { %v1475_v41 = vmul.f32 %v3150_v36, %v1474_v38  ;;  %3155 = vrcp.f32 %v1335_v63  ;;  %v1347_v3 = vand.u32 2147483648, %v1335_v63  ;;  %vm1341_vm8 = vweird.f32 %v1335_v63 }
0x111d   : > { %v1345_v40 = vand.u32 2147483647, %v1335_v63 }
0x111e   : > { %v1476_v19 = vadd.f32 %v3150_v36, %v1475_v41  ;;  %v1348_v29 = vor.u32 1.1754944e-38, %v1347_v3 }
0x111f   : > { %vm1346_vm10 = vcmp.eq.f32.partialorder %v1345_v40, 8.507059e+37 }
0x1120   : > { %v1480_v53 = vsel %vm1479_vm2, %v3150_v36, %v1476_v19  ;;  %v2925_v19 = vmul.f32 -1.442695, %v1669_v34 }
0x1121   : > { %v1485_v58 = vsel %vm1482_vm3, %v1484_v55, %v1480_v53 }
0x1122   : > { %v3156_v6 = vpop.eup %3155  ;;  %v1488_v59 = vmul.f32 %v1485_v58, %v4042_v0 }
0x1123   : > { %v1337_v7 = vmul.f32 %v3156_v6, %v1335_v63  ;;  %vm1342_vm7 = vweird.f32 %v3156_v6 }
0x1124   : > { %vm1343_vm9 = vmor %vm1341_vm8, %vm1342_vm7 }
0x1125   : > { %v1338_v8 = vsub.f32 1.0, %v1337_v7 }
0x1127   : > { %v1339_v23 = vmul.f32 %v3156_v6, %v1338_v8 }
0x1129   : > { %v1340_v52 = vadd.f32 %v3156_v6, %v1339_v23 }
0x112b   : > { %v1344_v5 = vsel %vm1343_vm9, %v3156_v6, %v1340_v52  ;;  %v4203_v6 = vld [vmem:[#allocation7 + $0x10] sm:$0xff] }
0x112c   : > { %v4180_v25 = vsel %vm1346_vm10, %v1348_v29, %v1344_v5  ;;  %v4220_v29 = vld [vmem:[%s4572_s7] ss:$0 sm:$0xff] }
0x112d   : > { %v1352_v36 = vmul.f32 %v4180_v25, %v4052_v15 }
0x117f   : > { %v1491_v57 = vpop.permute.xlu0 %1490 }
0x1180   : > { %v1493_v27 = vmul.f32 %v1491_v57, %v1485_v58 }
0x1182   : > { %1495 = vrot.lane.b32.xlu1 %v1493_v27, %s3532_s16 }
0x118a   : > { %1354 = vrot.lane.b32.xlu1 %v3152_v60, %s3534_s17 }
0x11f4   : > { %v1496_v39 = vpop.permute.xlu1 %1495 }
0x11f5   : > { %v4177_v2 = vadd.f32 %v1496_v39, %v1488_v59  ;;  %v4209_v39 = vld [vmem:[#allocation7] sm:$0xff] }
0x11f7   : > { %3157 = vtanh.f32 %v4177_v2 }
0x11fc   : > { %v1355_v47 = vpop.permute.xlu1 %1354 }
0x11fd   : > { %v3158_v49 = vpop.eup %3157  ;;  %v1357_v0 = vmul.f32 %v1355_v47, %v4180_v25 }
0x11fe   : > { %1501 = vrot.lane.b32.xlu2 %v3158_v49, %s3532_s16 }
0x11ff   : > { %1359 = vrot.lane.b32.xlu1 %v1357_v0, %s3535_s24 }
0x1258   : > { %v1502_v1 = vpop.permute.xlu2 %1501 }
0x1259   : > { %v4185_v32 = vmul.f32 %v1502_v1, %v1485_v58 }
0x125b   : > { %3159 = vtanh.f32 %v4185_v32 }
0x125c   : > { %3161 = vtanh.f32 %v1669_v34 }
0x1261   : > { %v3160_v51 = vpop.eup %3159 }
0x1262   : > { %1507 = vrot.lane.b32.xlu0 %v3160_v51, %s3533_s6  ;;  %v3162_v35 = vpop.eup %3161 }
0x126a   : > { %1692 = vrot.lane.b32.xlu0 %v3162_v35, %s3532_s16 }
0x1271   : > { %v1360_v37 = vpop.permute.xlu1 %1359 }
0x1272   : > { %v4193_v38 = vadd.f32 %v1360_v37, %v1352_v36 }
0x1274   : > { %3163 = vtanh.f32 %v4193_v38 }
0x1275   : > { %3165 = vpow2.f32 %v2925_v19 }
0x127a   : > { %v3164_v41 = vpop.eup %3163 }
0x127b   : > { %1365 = vrot.lane.b32.xlu1 %v3164_v41, %s3535_s24  ;;  %v3166_v45 = vpop.eup %3165 }
0x127c   : > { %v1673_v10 = vadd.f32 1.0, %v3166_v45 }
0x127e   : > { %3167 = vrcp.f32 %v1673_v10  ;;  %v1685_v60 = vand.u32 2147483648, %v1673_v10  ;;  %vm1679_vm13 = vweird.f32 %v1673_v10  ;;  %v1683_v61 = vand.u32 2147483647, %v1673_v10 }
0x1280   : > { %v1686_v7 = vor.u32 1.1754944e-38, %v1685_v60  ;;  %vm1684_vm15 = vcmp.eq.f32.partialorder %v1683_v61, 8.507059e+37 }
0x1284   : > { %v3168_v53 = vpop.eup %3167 }
0x1285   : > { %v1675_v55 = vmul.f32 %v3168_v53, %v1673_v10  ;;  %vm1680_vm12 = vweird.f32 %v3168_v53 }
0x1286   : > { %vm1681_vm14 = vmor %vm1679_vm13, %vm1680_vm12 }
0x1287   : > { %v1676_v56 = vsub.f32 1.0, %v1675_v55 }
0x1289   : > { %v1677_v57 = vmul.f32 %v3168_v53, %v1676_v56 }
0x128b   : > { %v1678_v27 = vadd.f32 %v3168_v53, %v1677_v57 }
0x128d   : > { %v1682_v63 = vsel %vm1681_vm14, %v3168_v53, %v1678_v27 }
0x128e   : > { %v1687_v8 = vsel %vm1684_vm15, %v1686_v7, %v1682_v63 }
0x128f   : > { %v1690_v52 = vmul.f32 %v1687_v8, %v4075_v50 }
0x12d4   : > { %v1508_v58 = vpop.permute.xlu0 %1507 }
0x12d5   : > { %v1510_v15 = vsel %vm566_vm5, %v1508_v58, %v4126_v4  ;;  %v4206_v4 = vld [vmem:[#allocation7 + $0x8] sm:$0xff] }
0x12d6   : > { %2919 = vmatmul.msk.f32.vlgmr.msrb.gmra.mxu0 %vm700_vm11, %v1510_v15 }
0x12d7   : > { %2137 = vmatpush.msrb.mxu0 %v4200_v62 }
0x12d9   : > { %2138 = vmatpush.msrb.mxu0 %v4203_v6 }
0x12db   : > { %2139 = vmatpush.msrb.mxu0 %v4206_v4 }
0x12dc   : > { %v1693_v23 = vpop.permute.xlu0 %1692 }
0x12dd   : > { %v1695_v59 = vmul.f32 %v1693_v23, %v1687_v8  ;;  %2140 = vmatpush.msrb.mxu0 %v4209_v39 }
0x12df   : > { %1697 = vrot.lane.b32.xlu0 %v1695_v59, %s3532_s16 }
0x12ed   : > { %v1366_v63 = vpop.permute.xlu1 %1365 }
0x12ee   : > { %v4233_v7 = vmul.f32 %v1366_v63, %v4180_v25 }
0x1351   : > { %v1698_v3 = vpop.permute.xlu0 %1697 }
0x1352   : > { %v4214_v40 = vadd.f32 %v1698_v3, %v1690_v52 }
0x1353   : > { %v1531_v5 = vpop.f32.mrf.mxu0 }
0x1354   : > { %3169 = vtanh.f32 %v4214_v40  ;;  %v1532_v47 = vadd.f32 %v4220_v29, %v1531_v5 }
0x1356   : > { %3171 = vtanh.f32 %v1532_v47  ;;  %v2920_v50 = vmul.f32 -1.442695, %v1532_v47 }
0x1358   : > { %3173 = vpow2.f32 %v2920_v50 }
0x135a   : > { %v3170_v49 = vpop.eup %3169 }
0x135b   : > { %1703 = vrot.lane.b32.xlu0 %v3170_v49, %s3532_s16 }
0x135c   : > { %v3172_v0 = vpop.eup %3171 }
0x135d   : > { %1556 = vrot.lane.b32.xlu2 %v3172_v0, %s3534_s17 }
0x135e   : > { %v3174_v1 = vpop.eup %3173 }
0x135f   : > { %v1537_v33 = vadd.f32 1.0, %v3174_v1 }
0x1361   : > { %3175 = vrcp.f32 %v1537_v33  ;;  %v1549_v41 = vand.u32 2147483648, %v1537_v33  ;;  %vm1543_vm1 = vweird.f32 %v1537_v33  ;;  %v1547_v19 = vand.u32 2147483647, %v1537_v33 }
0x1363   : > { %v1550_v10 = vor.u32 1.1754944e-38, %v1549_v41  ;;  %vm1548_vm3 = vcmp.eq.f32.partialorder %v1547_v19, 8.507059e+37 }
0x1367   : > { %v3176_v34 = vpop.eup %3175 }
0x1368   : > { %v1539_v51 = vmul.f32 %v3176_v34, %v1537_v33  ;;  %vm1544_vm0 = vweird.f32 %v3176_v34 }
0x1369   : > { %vm1545_vm2 = vmor %vm1543_vm1, %vm1544_vm0 }
0x136a   : > { %v1540_v35 = vsub.f32 1.0, %v1539_v51 }
0x136c   : > { %v1541_v36 = vmul.f32 %v3176_v34, %v1540_v35 }
0x136e   : > { %v1542_v37 = vadd.f32 %v3176_v34, %v1541_v36 }
0x1370   : > { %v1546_v45 = vsel %vm1545_vm2, %v3176_v34, %v1542_v37 }
0x1371   : > { %v1551_v55 = vsel %vm1548_vm3, %v1550_v10, %v1546_v45 }
0x1372   : > { %v1554_v15 = vmul.f32 %v1551_v55, %v4101_v13 }
0x13b7   : > { %v1557_v53 = vpop.permute.xlu2 %1556 }
0x13b8   : > { %v1559_v56 = vmul.f32 %v1557_v53, %v1551_v55 }
0x13ba   : > { %1561 = vrot.lane.b32.xlu2 %v1559_v56, %s3535_s24 }
0x13cd   : > { %v1704_v57 = vpop.permute.xlu0 %1703 }
0x13ce   : > { %v1706_v58 = vmul.f32 %v1704_v57, %v1687_v8 }
0x13d0   : > { %1708 = vrot.lane.b32.xlu0 %v1706_v58, %s3533_s6 }
0x1414   : > { %v1562_v27 = vpop.permute.xlu2 %1561 }
0x1415   : > { %v4228_v60 = vadd.f32 %v1562_v27, %v1554_v15 }
0x1417   : > { %3177 = vtanh.f32 %v4228_v60 }
0x141d   : > { %v3178_v61 = vpop.eup %3177 }
0x141e   : > { %1567 = vrot.lane.b32.xlu2 %v3178_v61, %s3535_s24 }
0x1426   : > { %1576 = vrot.lane.b32.xlu2 %v4233_v7, %s3537_s19 }
0x1442   : > { %v1709_v8 = vpop.permute.xlu0 %1708 }
0x1443   : > { %2933 = vmatmul.msk.f32.vlgmr.msra.gmra.mxu3 %vm566_vm5, %v1709_v8 }
0x1444   : > { %2408 = vmatpush.msra.mxu3 %v4200_v62 }
0x1446   : > { %2409 = vmatpush.msra.mxu3 %v4203_v6 }
0x1448   : > { %2410 = vmatpush.msra.mxu3 %v4206_v4 }
0x144a   : > { %2411 = vmatpush.msra.mxu3 %v4209_v39 }
0x1478   : > { %v1568_v13 = vpop.permute.xlu2 %1567 }
0x1479   : > { %v4242_v23 = vmul.f32 %v1568_v13, %v1551_v55  ;;  %v4269_v55 = vld [vmem:[%s4574_s9] ss:$0 sm:$0xff] }
0x147b   : > { %1572 = vrot.lane.b32.xlu1 %v4242_v23, %s3536_s13 }
0x1480   : > { %v1577_v25 = vpop.permute.xlu2 %1576 }
0x1483   : > { %1712 = vrot.lane.b32.xlu1 %v4185_v32, %s3536_s13  ;;  %v4261_v32 = vld [vmem:[#allocation6] sm:$0xff] }
0x14ed   : > { %v1573_v59 = vpop.permute.xlu1 %1572 }
0x14ee   : > { %v1579_v52 = vsel %vm765_vm4, %v1573_v59, %v1577_v25 }
0x14ef   : > { %2921 = vmatmul.msk.f32.vlgmr.msrb.gmra.mxu2 %vm566_vm5, %v1579_v52 }
0x14f0   : > { %2203 = vmatpush.msrb.mxu2 %v4135_v20 }
0x14f2   : > { %2204 = vmatpush.msrb.mxu2 %v4139_v24 }
0x14f4   : > { %2205 = vmatpush.msrb.mxu2 %v4143_v42 }
0x14f5   : > { %v1713_v3 = vpop.permute.xlu1 %1712 }
0x14f6   : > { %v1715_v5 = vsel %vm566_vm5, %v1709_v8, %v1713_v3  ;;  %2206 = vmatpush.msrb.mxu2 %v4148_v43 }
0x14f7   : > { %2926 = vmatmul.msk.f32.vlgmr.msra.gmra.mxu2 %vm633_vm6, %v1715_v5 }
0x14f8   : > { %2337 = vmatpush.msra.mxu2 %v4152_v17 }
0x14fa   : > { %2338 = vmatpush.msra.mxu2 %v4155_v26 }
0x14fc   : > { %2339 = vmatpush.msra.mxu2 %v4158_v46 }
0x14fe   : > { %2340 = vmatpush.msra.mxu2 %v4161_v44 }
0x1500   : > { %2341 = vmatpush.msra.mxu2 %v4164_v48 }
0x1502   : > { %2342 = vmatpush.msra.mxu2 %v4261_v32 }
0x1572   : > { %v1600_v47 = vpop.f32.mrf.mxu2 }
0x1573   : > { %v1601_v56 = vadd.f32 %v4269_v55, %v1600_v47 }
0x1575   : > { %v2922_v61 = vmul.f32 -1.442695, %v1601_v56 }
0x157a   : > { %v1736_v49 = vpop.f32.mrf.mxu2 }
0x157b   : > { %v1737_v0 = vadd.f32 %v4169_v14, %v1736_v49 }
0x157d   : > { %3179 = vtanh.f32 %v1737_v0  ;;  %v2927_v1 = vmul.f32 -1.442695, %v1737_v0 }
0x157f   : > { %3181 = vpow2.f32 %v2927_v1 }
0x1583   : > { %v3180_v50 = vpop.eup %3179 }
0x1584   : > { %1761 = vrot.lane.b32.xlu2 %v3180_v50, %s3532_s16 }
0x1585   : > { %v3182_v33 = vpop.eup %3181 }
0x1586   : > { %v1742_v34 = vadd.f32 1.0, %v3182_v33 }
0x1588   : > { %3183 = vrcp.f32 %v1742_v34  ;;  %v1754_v19 = vand.u32 2147483648, %v1742_v34  ;;  %vm1748_vm8 = vweird.f32 %v1742_v34  ;;  %v1752_v45 = vand.u32 2147483647, %v1742_v34 }
0x1589   : > { %3185 = vtanh.f32 %v1601_v56 }
0x158a   : > { %v1755_v53 = vor.u32 1.1754944e-38, %v1754_v19  ;;  %vm1753_vm10 = vcmp.eq.f32.partialorder %v1752_v45, 8.507059e+37  ;;  %3187 = vpow2.f32 %v2922_v61 }
0x158e   : > { %v3184_v51 = vpop.eup %3183 }
0x158f   : > { %v1744_v35 = vmul.f32 %v3184_v51, %v1742_v34  ;;  %vm1749_vm7 = vweird.f32 %v3184_v51  ;;  %v3186_v27 = vpop.eup %3185 }
0x1590   : > { %vm1750_vm9 = vmor %vm1748_vm8, %vm1749_vm7  ;;  %v3188_v63 = vpop.eup %3187 }
0x1591   : > { %v1745_v36 = vsub.f32 1.0, %v1744_v35  ;;  %v1606_v8 = vadd.f32 1.0, %v3188_v63 }
0x1593   : > { %v1746_v37 = vmul.f32 %v3184_v51, %v1745_v36  ;;  %3189 = vrcp.f32 %v1606_v8  ;;  %v1618_v0 = vand.u32 2147483648, %v1606_v8  ;;  %vm1612_vm13 = vweird.f32 %v1606_v8 }
0x1594   : > { %v1616_v50 = vand.u32 2147483647, %v1606_v8 }
0x1595   : > { %v1747_v41 = vadd.f32 %v3184_v51, %v1746_v37  ;;  %v1619_v33 = vor.u32 1.1754944e-38, %v1618_v0 }
0x1596   : > { %vm1617_vm15 = vcmp.eq.f32.partialorder %v1616_v50, 8.507059e+37 }
0x1597   : > { %v1751_v10 = vsel %vm1750_vm9, %v3184_v51, %v1747_v41 }
0x1598   : > { %v1756_v58 = vsel %vm1753_vm10, %v1755_v53, %v1751_v10  ;;  %v1937_v10 = vpop.f32.mrf.mxu3 }
0x1599   : > { %v3190_v13 = vpop.eup %3189  ;;  %v1759_v3 = vmul.f32 %v1756_v58, %v4177_v2  ;;  %v1940_v53 = vadd.f32 %v1937_v10, %v3767_v9 }
0x159a   : > { %v1608_v25 = vmul.f32 %v3190_v13, %v1606_v8  ;;  %vm1613_vm12 = vweird.f32 %v3190_v13 }
0x159b   : > { %vm1614_vm14 = vmor %vm1612_vm13, %vm1613_vm12 }
0x159c   : > { %v1609_v59 = vsub.f32 1.0, %v1608_v25 }
0x159e   : > { %v1610_v52 = vmul.f32 %v3190_v13, %v1609_v59 }
0x15a0   : > { %v1611_v49 = vadd.f32 %v3190_v13, %v1610_v52 }
0x15a2   : > { %v1615_v1 = vsel %vm1614_vm14, %v3190_v13, %v1611_v49 }
0x15a3   : > { %v4278_v34 = vsel %vm1617_vm15, %v1619_v33, %v1615_v1 }
0x15a4   : > { %v1623_v37 = vmul.f32 %v4278_v34, %v4193_v38 }
0x15de   : > { %v1762_v57 = vpop.permute.xlu2 %1761 }
0x15df   : > { %v1764_v15 = vmul.f32 %v1762_v57, %v1756_v58 }
0x15e1   : > { %1766 = vrot.lane.b32.xlu0 %v1764_v15, %s3532_s16 }
0x15e9   : > { %1625 = vrot.lane.b32.xlu0 %v3186_v27, %s3534_s17 }
0x1653   : > { %v1767_v5 = vpop.permute.xlu0 %1766 }
0x1654   : > { %v4275_v47 = vadd.f32 %v1767_v5, %v1759_v3 }
0x1656   : > { %3191 = vtanh.f32 %v4275_v47 }
0x165b   : > { %v1626_v51 = vpop.permute.xlu0 %1625 }
0x165c   : > { %v3192_v35 = vpop.eup %3191  ;;  %v1628_v2 = vmul.f32 %v1626_v51, %v4278_v34 }
0x165d   : > { %1772 = vrot.lane.b32.xlu1 %v3192_v35, %s3532_s16 }
0x165e   : > { %1630 = vrot.lane.b32.xlu0 %v1628_v2, %s3535_s24 }
0x16cf   : > { %v1773_v36 = vpop.permute.xlu1 %1772 }
0x16d0   : > { %v4285_v41 = vmul.f32 %v1773_v36, %v1756_v58  ;;  %v1631_v19 = vpop.permute.xlu0 %1630  ;;  %v2934_v58 = vmul.f32 -1.442695, %v1940_v53 }
0x16d1   : > { %v4287_v45 = vadd.f32 %v1631_v19, %v1623_v37 }
0x16d2   : > { %3193 = vtanh.f32 %v4285_v41 }
0x16d3   : > { %3195 = vtanh.f32 %v4287_v45 }
0x16d4   : > { %3197 = vtanh.f32 %v1940_v53 }
0x16d5   : > { %3199 = vpow2.f32 %v2934_v58 }
0x16d8   : > { %v3194_v56 = vpop.eup %3193 }
0x16d9   : > { %v3196_v57 = vpop.eup %3195  ;;  %1778 = vrot.lane.b32.xlu2 %v3194_v56, %s3533_s6 }
0x16da   : > { %1636 = vrot.lane.b32.xlu0 %v3196_v57, %s3535_s24  ;;  %v3198_v38 = vpop.eup %3197 }
0x16db   : > { %v3200_v15 = vpop.eup %3199 }
0x16dc   : > { %v1944_v27 = vadd.f32 1.0, %v3200_v15 }
0x16de   : > { %3201 = vrcp.f32 %v1944_v27  ;;  %v1956_v3 = vand.u32 2147483648, %v1944_v27  ;;  %vm1950_vm1 = vweird.f32 %v1944_v27  ;;  %v1954_v5 = vand.u32 2147483647, %v1944_v27 }
0x16e0   : > { %v1957_v0 = vor.u32 1.1754944e-38, %v1956_v3  ;;  %vm1955_vm3 = vcmp.eq.f32.partialorder %v1954_v5, 8.507059e+37 }
0x16e1   : > { %1963 = vrot.lane.b32.xlu2 %v3198_v38, %s3532_s16 }
0x16e4   : > { %v3202_v61 = vpop.eup %3201 }
0x16e5   : > { %v1946_v63 = vmul.f32 %v3202_v61, %v1944_v27  ;;  %vm1951_vm0 = vweird.f32 %v3202_v61 }
0x16e6   : > { %vm1952_vm2 = vmor %vm1950_vm1, %vm1951_vm0 }
0x16e7   : > { %v1947_v8 = vsub.f32 1.0, %v1946_v63 }
0x16e9   : > { %v1948_v13 = vmul.f32 %v3202_v61, %v1947_v8 }
0x16eb   : > { %v1949_v52 = vadd.f32 %v3202_v61, %v1948_v13 }
0x16ed   : > { %v1953_v49 = vsel %vm1952_vm2, %v3202_v61, %v1949_v52 }
0x16ee   : > { %v1958_v50 = vsel %vm1955_vm3, %v1957_v0, %v1953_v49 }
0x16ef   : > { %v1961_v33 = vmul.f32 %v1958_v50, %v4214_v40 }
0x1733   : > { %v1779_v25 = vpop.permute.xlu2 %1778 }
0x1734   : > { %v1781_v59 = vsel %vm566_vm5, %v1779_v25, %v4242_v23 }
0x1735   : > { %2928 = vmatmul.msk.f32.vlgmr.msra.gmra.mxu0 %vm700_vm11, %v1781_v59 }
0x1736   : > { %2269 = vmatpush.msra.mxu0 %v4085_v16 }
0x1738   : > { %2270 = vmatpush.msra.mxu0 %v4089_v18 }
0x173a   : > { %2271 = vmatpush.msra.mxu0 %v4093_v22 }
0x173b   : > { %v1964_v1 = vpop.permute.xlu2 %1963 }
0x173c   : > { %v1966_v23 = vmul.f32 %v1964_v1, %v1958_v50  ;;  %2272 = vmatpush.msra.mxu0 %v4098_v11 }
0x173e   : > { %1968 = vrot.lane.b32.xlu2 %v1966_v23, %s3532_s16  ;;  %2273 = vmatpush.msra.mxu0 %v4104_v21 }
0x1740   : > { %2274 = vmatpush.msra.mxu0 %v4109_v28 }
0x1742   : > { %2275 = vmatpush.msra.mxu0 %v4113_v31 }
0x1744   : > { %2276 = vmatpush.msra.mxu0 %v4117_v30 }
0x174c   : > { %v1637_v23 = vpop.permute.xlu0 %1636 }
0x1798   : > { %v1969_v51 = vpop.permute.xlu2 %1968 }
0x1799   : > { %v4308_v35 = vadd.f32 %v1969_v51, %v1961_v33  ;;  %v4327_v33 = vmul.f32 %v1637_v23, %v4278_v34 }
0x179b   : > { %3203 = vtanh.f32 %v4308_v35 }
0x17a1   : > { %v3204_v2 = vpop.eup %3203 }
0x17a2   : > { %1974 = vrot.lane.b32.xlu2 %v3204_v2, %s3532_s16 }
0x17b2   : > { %v1802_v36 = vpop.f32.mrf.mxu0 }
0x17b3   : > { %v1803_v37 = vadd.f32 %v4220_v29, %v1802_v36 }
0x17b5   : > { %3205 = vtanh.f32 %v1803_v37  ;;  %v2929_v40 = vmul.f32 -1.442695, %v1803_v37 }
0x17b7   : > { %3207 = vpow2.f32 %v2929_v40 }
0x17bb   : > { %v3206_v19 = vpop.eup %3205 }
0x17bc   : > { %1827 = vrot.lane.b32.xlu1 %v3206_v19, %s3534_s17 }
0x17bd   : > { %v3208_v56 = vpop.eup %3207 }
0x17be   : > { %v1808_v57 = vadd.f32 1.0, %v3208_v56 }
0x17c0   : > { %3209 = vrcp.f32 %v1808_v57  ;;  %v1820_v63 = vand.u32 2147483648, %v1808_v57  ;;  %vm1814_vm8 = vweird.f32 %v1808_v57  ;;  %v1818_v8 = vand.u32 2147483647, %v1808_v57 }
0x17c2   : > { %v1821_v25 = vor.u32 1.1754944e-38, %v1820_v63  ;;  %vm1819_vm10 = vcmp.eq.f32.partialorder %v1818_v8, 8.507059e+37 }
0x17c6   : > { %v3210_v38 = vpop.eup %3209 }
0x17c7   : > { %v1810_v58 = vmul.f32 %v3210_v38, %v1808_v57  ;;  %vm1815_vm7 = vweird.f32 %v3210_v38 }
0x17c8   : > { %vm1816_vm9 = vmor %vm1814_vm8, %vm1815_vm7 }
0x17c9   : > { %v1811_v15 = vsub.f32 1.0, %v1810_v58 }
0x17cb   : > { %v1812_v27 = vmul.f32 %v3210_v38, %v1811_v15 }
0x17cd   : > { %v1813_v61 = vadd.f32 %v3210_v38, %v1812_v27 }
0x17cf   : > { %v1817_v13 = vsel %vm1816_vm9, %v3210_v38, %v1813_v61 }
0x17d0   : > { %v1822_v52 = vsel %vm1819_vm10, %v1821_v25, %v1817_v13 }
0x17d1   : > { %v1825_v49 = vmul.f32 %v1822_v52, %v4228_v60 }
0x17fc   : > { %v1975_v10 = vpop.permute.xlu2 %1974 }
0x17fd   : > { %v1977_v53 = vmul.f32 %v1975_v10, %v1958_v50 }
0x17ff   : > { %1979 = vrot.lane.b32.xlu2 %v1977_v53, %s3533_s6 }
0x182e   : > { %v1828_v59 = vpop.permute.xlu1 %1827 }
0x182f   : > { %v1830_v3 = vmul.f32 %v1828_v59, %v1822_v52 }
0x1831   : > { %1832 = vrot.lane.b32.xlu1 %v1830_v3, %s3535_s24 }
0x1859   : > { %v1980_v5 = vpop.permute.xlu2 %1979 }
0x185a   : > { %2942 = vmatmul.msk.f32.vlgmr.msrb.gmra.mxu2 %vm566_vm5, %v1980_v5 }
0x185b   : > { %2679 = vmatpush.msrb.mxu2 %v4200_v62 }
0x185d   : > { %2680 = vmatpush.msrb.mxu2 %v4203_v6 }
0x185f   : > { %2681 = vmatpush.msrb.mxu2 %v4206_v4 }
0x1861   : > { %2682 = vmatpush.msrb.mxu2 %v4209_v39 }
0x18a3   : > { %v1833_v0 = vpop.permute.xlu1 %1832 }
0x18a4   : > { %v4322_v50 = vadd.f32 %v1833_v0, %v1825_v49 }
0x18a6   : > { %3211 = vtanh.f32 %v4322_v50 }
0x18ac   : > { %v3212_v1 = vpop.eup %3211 }
0x18ad   : > { %1838 = vrot.lane.b32.xlu1 %v3212_v1, %s3535_s24 }
0x18b5   : > { %1847 = vrot.lane.b32.xlu1 %v4327_v33, %s3537_s19 }
0x191f   : > { %v1839_v62 = vpop.permute.xlu1 %1838 }
0x1920   : > { %v4331_v6 = vmul.f32 %v1839_v62, %v1822_v52 }
0x1922   : > { %1843 = vrot.lane.b32.xlu0 %v4331_v6, %s3536_s13 }
0x1927   : > { %v1848_v4 = vpop.permute.xlu1 %1847 }
0x192a   : > { %1983 = vrot.lane.b32.xlu0 %v4285_v41, %s3536_s13 }
0x1994   : > { %v1844_v39 = vpop.permute.xlu0 %1843 }
0x1995   : > { %v1850_v60 = vsel %vm765_vm4, %v1844_v39, %v1848_v4 }
0x1996   : > { %2930 = vmatmul.msk.f32.vlgmr.msra.gmra.mxu1 %vm566_vm5, %v1850_v60 }
0x1997   : > { %2474 = vmatpush.msra.mxu1 %v4135_v20 }
0x1999   : > { %2475 = vmatpush.msra.mxu1 %v4139_v24 }
0x199b   : > { %2476 = vmatpush.msra.mxu1 %v4143_v42 }
0x199c   : > { %v1984_v34 = vpop.permute.xlu0 %1983 }
0x199d   : > { %v1986_v51 = vsel %vm566_vm5, %v1980_v5, %v1984_v34  ;;  %2477 = vmatpush.msra.mxu1 %v4148_v43 }
0x199e   : > { %2935 = vmatmul.msk.f32.vlgmr.msrb.gmra.mxu1 %vm633_vm6, %v1986_v51 }
0x199f   : > { %2608 = vmatpush.msrb.mxu1 %v4152_v17 }
0x19a1   : > { %2609 = vmatpush.msrb.mxu1 %v4155_v26 }
0x19a3   : > { %2610 = vmatpush.msrb.mxu1 %v4158_v46 }
0x19a5   : > { %2611 = vmatpush.msrb.mxu1 %v4161_v44 }
0x19a7   : > { %2612 = vmatpush.msrb.mxu1 %v4164_v48 }
0x19a9   : > { %2613 = vmatpush.msrb.mxu1 %v4261_v32 }
0x1a13   : > { %v1871_v20 = vpop.f32.mrf.mxu1 }
0x1a14   : > { %v1872_v10 = vadd.f32 %v4269_v55, %v1871_v20 }
0x1a16   : > { %v2931_v38 = vmul.f32 -1.442695, %v1872_v10 }
0x1a1b   : > { %v2007_v24 = vpop.f32.mrf.mxu1 }
0x1a1c   : > { %v2008_v42 = vadd.f32 %v4169_v14, %v2007_v24  ;;  %v2208_v24 = vpop.f32.mrf.mxu2 }
0x1a1e   : > { %3213 = vtanh.f32 %v2008_v42  ;;  %v2936_v41 = vmul.f32 -1.442695, %v2008_v42  ;;  %v2211_v42 = vadd.f32 %v2208_v24, %v3767_v9 }
0x1a20   : > { %3215 = vpow2.f32 %v2936_v41  ;;  %v2943_v41 = vmul.f32 -1.442695, %v2211_v42 }
0x1a24   : > { %v3214_v43 = vpop.eup %3213 }
0x1a25   : > { %2032 = vrot.lane.b32.xlu1 %v3214_v43, %s3532_s16 }
0x1a26   : > { %v3216_v17 = vpop.eup %3215 }
0x1a27   : > { %v2013_v26 = vadd.f32 1.0, %v3216_v17 }
0x1a29   : > { %3217 = vrcp.f32 %v2013_v26  ;;  %v2025_v32 = vand.u32 2147483648, %v2013_v26  ;;  %vm2019_vm13 = vweird.f32 %v2013_v26  ;;  %v2023_v37 = vand.u32 2147483647, %v2013_v26 }
0x1a2a   : > { %3219 = vtanh.f32 %v1872_v10 }
0x1a2b   : > { %v2026_v19 = vor.u32 1.1754944e-38, %v2025_v32  ;;  %vm2024_vm15 = vcmp.eq.f32.partialorder %v2023_v37, 8.507059e+37  ;;  %3221 = vpow2.f32 %v2931_v38 }
0x1a2f   : > { %v3218_v46 = vpop.eup %3217 }
0x1a30   : > { %v2015_v2 = vmul.f32 %v3218_v46, %v2013_v26  ;;  %vm2020_vm12 = vweird.f32 %v3218_v46  ;;  %v3220_v57 = vpop.eup %3219 }
0x1a31   : > { %vm2021_vm14 = vmor %vm2019_vm13, %vm2020_vm12  ;;  %v3222_v58 = vpop.eup %3221 }
0x1a32   : > { %v2016_v44 = vsub.f32 1.0, %v2015_v2  ;;  %v1877_v15 = vadd.f32 1.0, %v3222_v58 }
0x1a34   : > { %v2017_v36 = vmul.f32 %v3218_v46, %v2016_v44  ;;  %3223 = vrcp.f32 %v1877_v15  ;;  %v1889_v3 = vand.u32 2147483648, %v1877_v15  ;;  %vm1883_vm1 = vweird.f32 %v1877_v15 }
0x1a35   : > { %v1887_v5 = vand.u32 2147483647, %v1877_v15 }
0x1a36   : > { %v2018_v48 = vadd.f32 %v3218_v46, %v2017_v36  ;;  %v1890_v0 = vor.u32 1.1754944e-38, %v1889_v3 }
0x1a37   : > { %vm1888_vm3 = vcmp.eq.f32.partialorder %v1887_v5, 8.507059e+37 }
0x1a38   : > { %v2022_v14 = vsel %vm2021_vm14, %v3218_v46, %v2018_v48 }
0x1a39   : > { %v2027_v40 = vsel %vm2024_vm15, %v2026_v19, %v2022_v14 }
0x1a3a   : > { %v3224_v27 = vpop.eup %3223  ;;  %v2030_v13 = vmul.f32 %v2027_v40, %v4275_v47 }
0x1a3b   : > { %v1879_v61 = vmul.f32 %v3224_v27, %v1877_v15  ;;  %vm1884_vm0 = vweird.f32 %v3224_v27 }
0x1a3c   : > { %vm1885_vm2 = vmor %vm1883_vm1, %vm1884_vm0 }
0x1a3d   : > { %v1880_v63 = vsub.f32 1.0, %v1879_v61 }
0x1a3f   : > { %v1881_v8 = vmul.f32 %v3224_v27, %v1880_v63 }
0x1a41   : > { %v1882_v52 = vadd.f32 %v3224_v27, %v1881_v8 }
0x1a43   : > { %v1886_v49 = vsel %vm1885_vm2, %v3224_v27, %v1882_v52 }
0x1a44   : > { %v4360_v1 = vsel %vm1888_vm3, %v1890_v0, %v1886_v49 }
0x1a45   : > { %v1894_v4 = vmul.f32 %v4360_v1, %v4287_v45 }
0x1a97   : > { %v2033_v53 = vpop.permute.xlu1 %2032 }
0x1a98   : > { %v2035_v56 = vmul.f32 %v2033_v53, %v2027_v40 }
0x1a9a   : > { %2037 = vrot.lane.b32.xlu2 %v2035_v56, %s3532_s16 }
0x1aa2   : > { %1896 = vrot.lane.b32.xlu2 %v3220_v57, %s3534_s17 }
0x1af4   : > { %v2038_v25 = vpop.permute.xlu2 %2037 }
0x1af5   : > { %v4357_v59 = vadd.f32 %v2038_v25, %v2030_v13 }
0x1af7   : > { %3225 = vtanh.f32 %v4357_v59 }
0x1afc   : > { %v1897_v23 = vpop.permute.xlu2 %1896 }
0x1afd   : > { %v3226_v62 = vpop.eup %3225  ;;  %v1899_v47 = vmul.f32 %v1897_v23, %v4360_v1 }
0x1afe   : > { %2043 = vrot.lane.b32.xlu0 %v3226_v62, %s3532_s16 }
0x1aff   : > { %1901 = vrot.lane.b32.xlu2 %v1899_v47, %s3535_s24 }
0x1b59   : > { %v1902_v39 = vpop.permute.xlu2 %1901 }
0x1b5a   : > { %v4367_v60 = vadd.f32 %v1902_v39, %v1894_v4 }
0x1b5c   : > { %3227 = vtanh.f32 %v4367_v60 }
0x1b62   : > { %v3228_v34 = vpop.eup %3227 }
0x1b63   : > { %1907 = vrot.lane.b32.xlu2 %v3228_v34, %s3535_s24 }
0x1b70   : > { %v2044_v51 = vpop.permute.xlu0 %2043 }
0x1b71   : > { %v4371_v20 = vmul.f32 %v2044_v51, %v2027_v40 }
0x1b73   : > { %3229 = vtanh.f32 %v4371_v20 }
0x1b74   : > { %3231 = vtanh.f32 %v2211_v42 }
0x1b75   : > { %3233 = vpow2.f32 %v2943_v41 }
0x1b79   : > { %v3230_v43 = vpop.eup %3229 }
0x1b7a   : > { %2049 = vrot.lane.b32.xlu1 %v3230_v43, %s3533_s6  ;;  %v3232_v45 = vpop.eup %3231 }
0x1b7b   : > { %v3234_v17 = vpop.eup %3233 }
0x1b7c   : > { %v2215_v26 = vadd.f32 1.0, %v3234_v17 }
0x1b7e   : > { %3235 = vrcp.f32 %v2215_v26  ;;  %v2227_v14 = vand.u32 2147483648, %v2215_v26  ;;  %vm2221_vm8 = vweird.f32 %v2215_v26  ;;  %v2225_v19 = vand.u32 2147483647, %v2215_v26 }
0x1b80   : > { %v2228_v53 = vor.u32 1.1754944e-38, %v2227_v14  ;;  %vm2226_vm10 = vcmp.eq.f32.partialorder %v2225_v19, 8.507059e+37 }
0x1b82   : > { %2234 = vrot.lane.b32.xlu1 %v3232_v45, %s3532_s16 }
0x1b84   : > { %v3236_v46 = vpop.eup %3235 }
0x1b85   : > { %v2217_v2 = vmul.f32 %v3236_v46, %v2215_v26  ;;  %vm2222_vm7 = vweird.f32 %v3236_v46  ;;  %v4420_v26 = vld [vmem:[%s3748_s18] ss:$0 sm:$0xff] }
0x1b86   : > { %vm2223_vm9 = vmor %vm2221_vm8, %vm2222_vm7 }
0x1b87   : > { %v2218_v44 = vsub.f32 1.0, %v2217_v2 }
0x1b89   : > { %v2219_v36 = vmul.f32 %v3236_v46, %v2218_v44 }
0x1b8b   : > { %v2220_v37 = vadd.f32 %v3236_v46, %v2219_v36 }
0x1b8d   : > { %v2224_v10 = vsel %vm2223_vm9, %v3236_v46, %v2220_v37 }
0x1b8e   : > { %v2229_v40 = vsel %vm2226_vm10, %v2228_v53, %v2224_v10 }
0x1bbd   : > { %v1908_v39 = vpop.permute.xlu2 %1907 }
0x1bbe   : > { %v4405_v34 = vmul.f32 %v1908_v39, %v4360_v1 }
0x1bec   : > { %v2050_v48 = vpop.permute.xlu1 %2049 }
0x1bed   : > { %v2052_v32 = vsel %vm566_vm5, %v2050_v48, %v4331_v6 }
0x1bee   : > { %2937 = vmatmul.msk.f32.vlgmr.msrb.gmra.mxu3 %vm700_vm11, %v2052_v32 }
0x1bef   : > { %2540 = vmatpush.msrb.mxu3 %v4085_v16  ;;  %v2232_v16 = vmul.f32 %v2229_v40, %v4308_v35 }
0x1bf1   : > { %2541 = vmatpush.msrb.mxu3 %v4089_v18 }
0x1bf3   : > { %2542 = vmatpush.msrb.mxu3 %v4093_v22 }
0x1bf4   : > { %v2235_v56 = vpop.permute.xlu1 %2234 }
0x1bf5   : > { %v2237_v6 = vmul.f32 %v2235_v56, %v2229_v40  ;;  %2543 = vmatpush.msrb.mxu3 %v4098_v11 }
0x1bf7   : > { %2239 = vrot.lane.b32.xlu1 %v2237_v6, %s3532_s16  ;;  %2544 = vmatpush.msrb.mxu3 %v4104_v21 }
0x1bf9   : > { %2545 = vmatpush.msrb.mxu3 %v4109_v28 }
0x1bfb   : > { %2546 = vmatpush.msrb.mxu3 %v4113_v31 }
0x1bfd   : > { %2547 = vmatpush.msrb.mxu3 %v4117_v30 }
0x1c69   : > { %v2240_v18 = vpop.permute.xlu1 %2239 }
0x1c6a   : > { %v4390_v57 = vadd.f32 %v2240_v18, %v2232_v16 }
0x1c6c   : > { %3237 = vtanh.f32 %v4390_v57 }
0x1c71   : > { %v2073_v22 = vpop.f32.mrf.mxu3 }
0x1c72   : > { %v3238_v38 = vpop.eup %3237  ;;  %v2074_v11 = vadd.f32 %v4220_v29, %v2073_v22 }
0x1c73   : > { %2245 = vrot.lane.b32.xlu1 %v3238_v38, %s3532_s16 }
0x1c74   : > { %3239 = vtanh.f32 %v2074_v11  ;;  %v2938_v28 = vmul.f32 -1.442695, %v2074_v11 }
0x1c76   : > { %3241 = vpow2.f32 %v2938_v28 }
0x1c7a   : > { %v3240_v21 = vpop.eup %3239 }
0x1c7b   : > { %2098 = vrot.lane.b32.xlu0 %v3240_v21, %s3534_s17 }
0x1c7c   : > { %v3242_v31 = vpop.eup %3241 }
0x1c7d   : > { %v2079_v30 = vadd.f32 1.0, %v3242_v31 }
0x1c7f   : > { %3243 = vrcp.f32 %v2079_v30  ;;  %v2091_v29 = vand.u32 2147483648, %v2079_v30  ;;  %vm2085_vm13 = vweird.f32 %v2079_v30  ;;  %v2089_v13 = vand.u32 2147483647, %v2079_v30 }
0x1c81   : > { %v2092_v52 = vor.u32 1.1754944e-38, %v2091_v29  ;;  %vm2090_vm15 = vcmp.eq.f32.partialorder %v2089_v13, 8.507059e+37 }
0x1c85   : > { %v3244_v35 = vpop.eup %3243 }
0x1c86   : > { %v2081_v58 = vmul.f32 %v3244_v35, %v2079_v30  ;;  %vm2086_vm12 = vweird.f32 %v3244_v35 }
0x1c87   : > { %vm2087_vm14 = vmor %vm2085_vm13, %vm2086_vm12 }
0x1c88   : > { %v2082_v15 = vsub.f32 1.0, %v2081_v58 }
0x1c8a   : > { %v2083_v27 = vmul.f32 %v3244_v35, %v2082_v15 }
0x1c8c   : > { %v2084_v8 = vadd.f32 %v3244_v35, %v2083_v27 }
0x1c8e   : > { %v2088_v25 = vsel %vm2087_vm14, %v3244_v35, %v2084_v8 }
0x1c8f   : > { %v2093_v5 = vsel %vm2090_vm15, %v2092_v52, %v2088_v25 }
0x1c90   : > { %v2096_v23 = vmul.f32 %v2093_v5, %v4322_v50 }
0x1ce5   : > { %v2246_v61 = vpop.permute.xlu1 %2245 }
0x1ce6   : > { %v2248_v63 = vmul.f32 %v2246_v61, %v2229_v40 }
0x1ce8   : > { %2250 = vrot.lane.b32.xlu1 %v2248_v63, %s3533_s6 }
0x1ced   : > { %v2099_v3 = vpop.permute.xlu0 %2098 }
0x1cee   : > { %v2101_v49 = vmul.f32 %v2099_v3, %v2093_v5 }
0x1cf0   : > { %2103 = vrot.lane.b32.xlu0 %v2101_v49, %s3535_s24 }
0x1d5a   : > { %v2251_v0 = vpop.permute.xlu1 %2250 }
0x1d5b   : > { %2951 = vmatmul.msk.f32.vlgmr.msra.gmra.mxu1 %vm566_vm5, %v2251_v0 }
0x1d62   : > { %v2104_v62 = vpop.permute.xlu0 %2103 }
0x1d63   : > { %v4400_v47 = vadd.f32 %v2104_v62, %v2096_v23 }
0x1d65   : > { %3245 = vtanh.f32 %v4400_v47 }
0x1d6b   : > { %v3246_v4 = vpop.eup %3245 }
0x1d6c   : > { %2109 = vrot.lane.b32.xlu0 %v3246_v4, %s3535_s24 }
0x1d74   : > { %2118 = vrot.lane.b32.xlu0 %v4405_v34, %s3537_s19 }
0x1dd8   : > { %v2479_v23 = vpop.f32.mrf.mxu1 }
0x1dd9   : > { %v2482_v62 = vadd.f32 %v2479_v23, %v3767_v9 }
0x1dde   : > { %v2110_v51 = vpop.permute.xlu0 %2109 }
0x1ddf   : > { %v4409_v24 = vmul.f32 %v2110_v51, %v2093_v5 }
0x1de1   : > { %2114 = vrot.lane.b32.xlu2 %v4409_v24, %s3536_s13 }
0x1de6   : > { %v2119_v50 = vpop.permute.xlu0 %2118 }
0x1de9   : > { %2254 = vrot.lane.b32.xlu2 %v4371_v20, %s3536_s13 }
0x1e3b   : > { %v2115_v42 = vpop.permute.xlu2 %2114 }
0x1e3c   : > { %v2121_v43 = vsel %vm765_vm4, %v2115_v42, %v2119_v50 }
0x1e3d   : > { %2939 = vmatmul.msk.f32.vlgmr.msrb.gmra.mxu0 %vm566_vm5, %v2121_v43 }
0x1e43   : > { %v2255_v1 = vpop.permute.xlu2 %2254 }
0x1e44   : > { %v2257_v45 = vsel %vm566_vm5, %v2251_v0, %v2255_v1  ;;  %v2952_v1 = vmul.f32 -1.442695, %v2482_v62 }
0x1e45   : > { %2944 = vmatmul.msk.f32.vlgmr.msra.gmra.mxu0 %vm633_vm6, %v2257_v45 }
0x1eba   : > { %v2142_v41 = vpop.f32.mrf.mxu0 }
0x1ebb   : > { %v2143_v6 = vadd.f32 %v4269_v55, %v2142_v41 }
0x1ebd   : > { %v2940_v11 = vmul.f32 -1.442695, %v2143_v6 }
0x1ec2   : > { %v2278_v17 = vpop.f32.mrf.mxu0 }
0x1ec3   : > { %v2279_v46 = vadd.f32 %v4420_v26, %v2278_v17 }
0x1ec5   : > { %3247 = vtanh.f32 %v2279_v46  ;;  %v2945_v20 = vmul.f32 -1.442695, %v2279_v46 }
0x1ec7   : > { %3249 = vpow2.f32 %v2945_v20 }
0x1ecb   : > { %v3248_v2 = vpop.eup %3247 }
0x1ecc   : > { %2303 = vrot.lane.b32.xlu0 %v3248_v2, %s3532_s16 }
0x1ecd   : > { %v3250_v44 = vpop.eup %3249 }
0x1ece   : > { %v2284_v36 = vadd.f32 1.0, %v3250_v44 }
0x1ed0   : > { %3251 = vrcp.f32 %v2284_v36  ;;  %v2296_v10 = vand.u32 2147483648, %v2284_v36  ;;  %vm2290_vm1 = vweird.f32 %v2284_v36  ;;  %v2294_v53 = vand.u32 2147483647, %v2284_v36 }
0x1ed1   : > { %3253 = vtanh.f32 %v2143_v6 }
0x1ed2   : > { %v2297_v56 = vor.u32 1.1754944e-38, %v2296_v10  ;;  %vm2295_vm3 = vcmp.eq.f32.partialorder %v2294_v53, 8.507059e+37  ;;  %3255 = vpow2.f32 %v2940_v11 }
0x1ed6   : > { %v3252_v48 = vpop.eup %3251 }
0x1ed7   : > { %v2286_v32 = vmul.f32 %v3252_v48, %v2284_v36  ;;  %vm2291_vm0 = vweird.f32 %v3252_v48  ;;  %v3254_v38 = vpop.eup %3253 }
0x1ed8   : > { %vm2292_vm2 = vmor %vm2290_vm1, %vm2291_vm0  ;;  %v3256_v21 = vpop.eup %3255 }
0x1ed9   : > { %v2287_v37 = vsub.f32 1.0, %v2286_v32  ;;  %v2148_v28 = vadd.f32 1.0, %v3256_v21 }
0x1edb   : > { %v2288_v14 = vmul.f32 %v3252_v48, %v2287_v37  ;;  %3257 = vrcp.f32 %v2148_v28  ;;  %v2160_v8 = vand.u32 2147483648, %v2148_v28  ;;  %vm2154_vm8 = vweird.f32 %v2148_v28 }
0x1edc   : > { %v2158_v29 = vand.u32 2147483647, %v2148_v28 }
0x1edd   : > { %v2289_v19 = vadd.f32 %v3252_v48, %v2288_v14  ;;  %v2161_v25 = vor.u32 1.1754944e-38, %v2160_v8 }
0x1ede   : > { %vm2159_vm10 = vcmp.eq.f32.partialorder %v2158_v29, 8.507059e+37 }
0x1edf   : > { %v2293_v40 = vsel %vm2292_vm2, %v3252_v48, %v2289_v19 }
0x1ee0   : > { %v2298_v18 = vsel %vm2295_vm3, %v2297_v56, %v2293_v40 }
0x1ee1   : > { %v3258_v31 = vpop.eup %3257  ;;  %v2301_v15 = vmul.f32 %v2298_v18, %v4357_v59 }
0x1ee2   : > { %v2150_v30 = vmul.f32 %v3258_v31, %v2148_v28  ;;  %vm2155_vm7 = vweird.f32 %v3258_v31 }
0x1ee3   : > { %vm2156_vm9 = vmor %vm2154_vm8, %vm2155_vm7 }
0x1ee4   : > { %v2151_v35 = vsub.f32 1.0, %v2150_v30 }
0x1ee6   : > { %v2152_v58 = vmul.f32 %v3258_v31, %v2151_v35 }
0x1ee8   : > { %v2153_v63 = vadd.f32 %v3258_v31, %v2152_v58 }
0x1eea   : > { %v2157_v13 = vsel %vm2156_vm9, %v3258_v31, %v2153_v63 }
0x1eeb   : > { %v4431_v52 = vsel %vm2159_vm10, %v2161_v25, %v2157_v13 }
0x1eec   : > { %v2165_v51 = vmul.f32 %v4431_v52, %v4367_v60 }
0x1f3e   : > { %v2304_v16 = vpop.permute.xlu0 %2303 }
0x1f3f   : > { %v2306_v22 = vmul.f32 %v2304_v16, %v2298_v18  ;;  %v4456_v16 = vld [vmem:[%s4572_s7] ss:$0 sm:$0xff] }
0x1f41   : > { %2308 = vrot.lane.b32.xlu1 %v2306_v22, %s3532_s16 }
0x1f49   : > { %2167 = vrot.lane.b32.xlu1 %v3254_v38, %s3534_s17 }
0x1fb3   : > { %v2309_v27 = vpop.permute.xlu1 %2308 }
0x1fb4   : > { %v4428_v61 = vadd.f32 %v2309_v27, %v2301_v15 }
0x1fb6   : > { %3259 = vtanh.f32 %v4428_v61 }
0x1fbb   : > { %v2168_v3 = vpop.permute.xlu1 %2167 }
0x1fbc   : > { %v3260_v5 = vpop.eup %3259  ;;  %v2170_v59 = vmul.f32 %v2168_v3, %v4431_v52 }
0x1fbd   : > { %2314 = vrot.lane.b32.xlu2 %v3260_v5, %s3532_s16 }
0x1fbe   : > { %2172 = vrot.lane.b32.xlu1 %v2170_v59, %s3535_s24 }
0x2017   : > { %v2315_v49 = vpop.permute.xlu2 %2314 }
0x2018   : > { %v4436_v0 = vmul.f32 %v2315_v49, %v2298_v18 }
0x201a   : > { %3261 = vtanh.f32 %v4436_v0 }
0x201b   : > { %3263 = vtanh.f32 %v2482_v62 }
0x2020   : > { %v3262_v4 = vpop.eup %3261 }
0x2021   : > { %2320 = vrot.lane.b32.xlu0 %v3262_v4, %s3533_s6  ;;  %v3264_v39 = vpop.eup %3263 }
0x2029   : > { %2505 = vrot.lane.b32.xlu0 %v3264_v39, %s3532_s16 }
0x2030   : > { %v2173_v50 = vpop.permute.xlu1 %2172 }
0x2031   : > { %v4444_v42 = vadd.f32 %v2173_v50, %v2165_v51 }
0x2033   : > { %3265 = vtanh.f32 %v4444_v42 }
0x2034   : > { %3267 = vpow2.f32 %v2952_v1 }
0x2039   : > { %v3266_v43 = vpop.eup %3265 }
0x203a   : > { %2178 = vrot.lane.b32.xlu1 %v3266_v43, %s3535_s24  ;;  %v3268_v9 = vpop.eup %3267 }
0x203b   : > { %v2486_v45 = vadd.f32 1.0, %v3268_v9 }
0x203d   : > { %3269 = vrcp.f32 %v2486_v45  ;;  %v2498_v36 = vand.u32 2147483648, %v2486_v45  ;;  %vm2492_vm13 = vweird.f32 %v2486_v45  ;;  %v2496_v48 = vand.u32 2147483647, %v2486_v45 }
0x203f   : > { %v2499_v37 = vor.u32 1.1754944e-38, %v2498_v36  ;;  %vm2497_vm15 = vcmp.eq.f32.partialorder %v2496_v48, 8.507059e+37 }
0x2043   : > { %v3270_v41 = vpop.eup %3269 }
0x2044   : > { %v2488_v17 = vmul.f32 %v3270_v41, %v2486_v45  ;;  %vm2493_vm12 = vweird.f32 %v3270_v41 }
0x2045   : > { %vm2494_vm14 = vmor %vm2492_vm13, %vm2493_vm12 }
0x2046   : > { %v2489_v46 = vsub.f32 1.0, %v2488_v17 }
0x2048   : > { %v2490_v2 = vmul.f32 %v3270_v41, %v2489_v46 }
0x204a   : > { %v2491_v44 = vadd.f32 %v3270_v41, %v2490_v2 }
0x204c   : > { %v2495_v32 = vsel %vm2494_vm14, %v3270_v41, %v2491_v44 }
0x204d   : > { %v2500_v14 = vsel %vm2497_vm15, %v2499_v37, %v2495_v32 }
0x204e   : > { %v2503_v53 = vmul.f32 %v2500_v14, %v4390_v57 }
0x2093   : > { %v2321_v20 = vpop.permute.xlu0 %2320 }
0x2094   : > { %v2323_v60 = vsel %vm566_vm5, %v2321_v20, %v4409_v24 }
0x2095   : > { %2946 = vmatmul.msk.f32.vlgmr.msra.gmra.mxu2 %vm700_vm11, %v2323_v60 }
0x209b   : > { %v2506_v19 = vpop.permute.xlu0 %2505 }
0x209c   : > { %v2508_v10 = vmul.f32 %v2506_v19, %v2500_v14 }
0x209e   : > { %2510 = vrot.lane.b32.xlu0 %v2508_v10, %s3532_s16 }
0x20ac   : > { %v2179_v62 = vpop.permute.xlu1 %2178 }
0x20ad   : > { %v4469_v4 = vmul.f32 %v2179_v62, %v4431_v52 }
0x2110   : > { %v2511_v40 = vpop.permute.xlu0 %2510 }
0x2111   : > { %v2513_v24 = vadd.f32 %v2511_v40, %v2503_v53 }
0x2113   : > { %3271 = vtanh.f32 %v2513_v24 }
0x2118   : > { %v2344_v56 = vpop.f32.mrf.mxu2 }
0x2119   : > { %v3272_v6 = vpop.eup %3271  ;;  %v2345_v18 = vadd.f32 %v4456_v16, %v2344_v56 }
0x211a   : > { %2516 = vrot.lane.b32.xlu0 %v3272_v6, %s3532_s16 }
0x211b   : > { %3273 = vtanh.f32 %v2345_v18  ;;  %v2947_v38 = vmul.f32 -1.442695, %v2345_v18 }
0x211d   : > { %3275 = vpow2.f32 %v2947_v38 }
0x2121   : > { %v3274_v22 = vpop.eup %3273 }
0x2122   : > { %2369 = vrot.lane.b32.xlu2 %v3274_v22, %s3534_s17 }
0x2123   : > { %v3276_v57 = vpop.eup %3275 }
0x2124   : > { %v2350_v11 = vadd.f32 1.0, %v3276_v57 }
0x2126   : > { %3277 = vrcp.f32 %v2350_v11  ;;  %v2362_v58 = vand.u32 2147483648, %v2350_v11  ;;  %vm2356_vm1 = vweird.f32 %v2350_v11  ;;  %v2360_v15 = vand.u32 2147483647, %v2350_v11 }
0x2128   : > { %v2363_v63 = vor.u32 1.1754944e-38, %v2362_v58  ;;  %vm2361_vm3 = vcmp.eq.f32.partialorder %v2360_v15, 8.507059e+37 }
0x212c   : > { %v3278_v21 = vpop.eup %3277 }
0x212d   : > { %v2352_v28 = vmul.f32 %v3278_v21, %v2350_v11  ;;  %vm2357_vm0 = vweird.f32 %v3278_v21 }
0x212e   : > { %vm2358_vm2 = vmor %vm2356_vm1, %vm2357_vm0 }
0x212f   : > { %v2353_v31 = vsub.f32 1.0, %v2352_v28 }
0x2131   : > { %v2354_v30 = vmul.f32 %v3278_v21, %v2353_v31 }
0x2133   : > { %v2355_v35 = vadd.f32 %v3278_v21, %v2354_v30 }
0x2135   : > { %v2359_v27 = vsel %vm2358_vm2, %v3278_v21, %v2355_v35 }
0x2136   : > { %v2364_v29 = vsel %vm2361_vm3, %v2363_v63, %v2359_v27 }
0x2137   : > { %v2367_v5 = vmul.f32 %v2364_v29, %v4400_v47 }
0x217c   : > { %v2370_v8 = vpop.permute.xlu2 %2369 }
0x217d   : > { %v2372_v13 = vmul.f32 %v2370_v8, %v2364_v29 }
0x217f   : > { %2374 = vrot.lane.b32.xlu2 %v2372_v13, %s3535_s24 }
0x218c   : > { %v2517_v25 = vpop.permute.xlu0 %2516 }
0x218d   : > { %v2519_v3 = vmul.f32 %v2517_v25, %v2500_v14 }
0x218f   : > { %2521 = vrot.lane.b32.xlu0 %v2519_v3, %s3533_s6 }
0x21d9   : > { %v2375_v59 = vpop.permute.xlu2 %2374 }
0x21da   : > { %v4464_v49 = vadd.f32 %v2375_v59, %v2367_v5 }
0x21dc   : > { %3279 = vtanh.f32 %v4464_v49 }
0x21e2   : > { %v3280_v23 = vpop.eup %3279 }
0x21e3   : > { %2380 = vrot.lane.b32.xlu2 %v3280_v23, %s3535_s24 }
0x21eb   : > { %2389 = vrot.lane.b32.xlu2 %v4469_v4, %s3537_s19 }
0x2201   : > { %v2522_v52 = vpop.permute.xlu0 %2521 }
0x223d   : > { %v2381_v39 = vpop.permute.xlu2 %2380 }
0x223e   : > { %v4473_v51 = vmul.f32 %v2381_v39, %v2364_v29 }
0x2240   : > { %2385 = vrot.lane.b32.xlu1 %v4473_v51, %s3536_s13 }
0x2245   : > { %v2390_v47 = vpop.permute.xlu2 %2389 }
0x2248   : > { %2525 = vrot.lane.b32.xlu1 %v4436_v0, %s3536_s13 }
0x22b2   : > { %v2386_v50 = vpop.permute.xlu1 %2385 }
0x22b3   : > { %v2392_v43 = vsel %vm765_vm4, %v2386_v50, %v2390_v47 }
0x22b4   : > { %2948 = vmatmul.msk.f32.vlgmr.msra.gmra.mxu3 %vm566_vm5, %v2392_v43 }
0x22ba   : > { %v2526_v1 = vpop.permute.xlu1 %2525 }
0x22bb   : > { %v2528_v9 = vsel %vm566_vm5, %v2522_v52, %v2526_v1 }
0x22bc   : > { %2953 = vmatmul.msk.f32.vlgmr.msrb.gmra.mxu3 %vm633_vm6, %v2528_v9 }
0x2337   : > { %v2413_v45 = vpop.f32.mrf.mxu3 }
0x2338   : > { %v2414_v10 = vadd.f32 %v4269_v55, %v2413_v45 }
0x233a   : > { %v2949_v57 = vmul.f32 -1.442695, %v2414_v10 }
0x233f   : > { %v2549_v41 = vpop.f32.mrf.mxu3 }
0x2340   : > { %v2550_v17 = vadd.f32 %v4420_v26, %v2549_v41 }
0x2342   : > { %3281 = vtanh.f32 %v2550_v17  ;;  %v2954_v0 = vmul.f32 -1.442695, %v2550_v17 }
0x2344   : > { %3283 = vpow2.f32 %v2954_v0 }
0x2348   : > { %v3282_v46 = vpop.eup %3281 }
0x2349   : > { %2574 = vrot.lane.b32.xlu2 %v3282_v46, %s3532_s16 }
0x234a   : > { %v3284_v2 = vpop.eup %3283 }
0x234b   : > { %v2555_v20 = vadd.f32 1.0, %v3284_v2 }
0x234d   : > { %3285 = vrcp.f32 %v2555_v20  ;;  %v2567_v37 = vand.u32 2147483648, %v2555_v20  ;;  %vm2561_vm6 = vweird.f32 %v2555_v20  ;;  %v2565_v14 = vand.u32 2147483647, %v2555_v20 }
0x234e   : > { %3287 = vtanh.f32 %v2414_v10 }
0x234f   : > { %v2568_v19 = vor.u32 1.1754944e-38, %v2567_v37  ;;  %vm2566_vm9 = vcmp.eq.f32.partialorder %v2565_v14, 8.507059e+37 }
0x2353   : > { %v3286_v60 = vpop.eup %3285 }
0x2354   : > { %v2557_v44 = vmul.f32 %v3286_v60, %v2555_v20  ;;  %vm2562_vm7 = vweird.f32 %v3286_v60  ;;  %v3288_v56 = vpop.eup %3287 }
0x2355   : > { %vm2563_vm8 = vmor %vm2561_vm6, %vm2562_vm7  ;;  %vm832_vm7 = vcmask 123904  }
0x2356   : > { %v2558_v36 = vsub.f32 1.0, %v2557_v44 }
0x2358   : > { %v2559_v48 = vmul.f32 %v3286_v60, %v2558_v36 }
0x235a   : > { %v2560_v32 = vadd.f32 %v3286_v60, %v2559_v48 }
0x235c   : > { %v2564_v26 = vsel %vm2563_vm8, %v3286_v60, %v2560_v32 }
0x235d   : > { %v2569_v40 = vsel %vm2566_vm9, %v2568_v19, %v2564_v26 }
0x235e   : > { %v2572_v6 = vmul.f32 %v2569_v40, %v4428_v61 }
0x23a3   : > { %v2575_v53 = vpop.permute.xlu2 %2574 }
0x23a4   : > { %v2577_v24 = vmul.f32 %v2575_v53, %v2569_v40 }
0x23a6   : > { %2579 = vrot.lane.b32.xlu0 %v2577_v24, %s3532_s16 }
0x23ae   : > { %2438 = vrot.lane.b32.xlu0 %v3288_v56, %s3534_s17 }
0x2418   : > { %v2580_v18 = vpop.permute.xlu0 %2579 }
0x2419   : > { %v2582_v22 = vadd.f32 %v2580_v18, %v2572_v6 }
0x241b   : > { %3289 = vtanh.f32 %v2582_v22 }
0x241c   : > { %3291 = vpow2.f32 %v2949_v57 }
0x2420   : > { %v2439_v13 = vpop.permute.xlu0 %2438 }
0x2421   : > { %v3290_v38 = vpop.eup %3289 }
0x2422   : > { %2585 = vrot.lane.b32.xlu1 %v3290_v38, %s3532_s16  ;;  %v3292_v55 = vpop.eup %3291 }
0x2423   : > { %v2419_v11 = vadd.f32 1.0, %v3292_v55 }
0x2425   : > { %3293 = vrcp.f32 %v2419_v11  ;;  %v2431_v27 = vand.u32 2147483648, %v2419_v11  ;;  %vm2425_vm12 = vweird.f32 %v2419_v11  ;;  %v2429_v63 = vand.u32 2147483647, %v2419_v11 }
0x2427   : > { %v2432_v29 = vor.u32 1.1754944e-38, %v2431_v27  ;;  %vm2430_vm14 = vcmp.eq.f32.partialorder %v2429_v63, 8.507059e+37 }
0x242b   : > { %v3294_v21 = vpop.eup %3293 }
0x242c   : > { %v2421_v28 = vmul.f32 %v3294_v21, %v2419_v11  ;;  %vm2426_vm10 = vweird.f32 %v3294_v21 }
0x242d   : > { %vm2427_vm13 = vmor %vm2425_vm12, %vm2426_vm10 }
0x242e   : > { %v2422_v31 = vsub.f32 1.0, %v2421_v28 }
0x2430   : > { %v2423_v58 = vmul.f32 %v3294_v21, %v2422_v31 }
0x2432   : > { %v2424_v15 = vadd.f32 %v3294_v21, %v2423_v58 }
0x2434   : > { %v2428_v8 = vsel %vm2427_vm13, %v3294_v21, %v2424_v15 }
0x2435   : > { %v2433_v25 = vsel %vm2430_vm14, %v2432_v29, %v2428_v8 }
0x2436   : > { %v2441_v3 = vmul.f32 %v2439_v13, %v2433_v25  ;;  %v2436_v47 = vmul.f32 %v2433_v25, %v4444_v42 }
0x2494   : > { %v2586_v30 = vpop.permute.xlu1 %2585 }
0x2495   : > { %v2588_v35 = vmul.f32 %v2586_v30, %v2569_v40 }
0x2497   : > { %3295 = vtanh.f32 %v2588_v35 }
0x249d   : > { %v3296_v61 = vpop.eup %3295 }
0x249e   : > { %2591 = vrot.lane.b32.xlu2 %v3296_v61, %s3533_s6  ;;  %s4524_s6 = scalar_lea.vmem %s4575_s10, %s2964_s30 }
0x24a6   : > { %2443 = vrot.lane.b32.xlu2 %v2441_v3, %s3535_s24 }
0x24f8   : > { %v2592_v5 = vpop.permute.xlu2 %2591 }
0x24f9   : > { %v2594_v59 = vsel %vm566_vm5, %v2592_v5, %v4473_v51 }
0x24fa   : > { %2955 = vmatmul.msk.f32.vlgmr.msrb.gmra.mxu1 %vm700_vm11, %v2594_v59 }
0x2500   : > { %v2444_v39 = vpop.permute.xlu2 %2443 }
0x2501   : > { %v4497_v50 = vadd.f32 %v2444_v39, %v2436_v47 }
0x2577   : > { %v2615_v23 = vpop.f32.mrf.mxu1 }
0x2578   : > { %v2616_v62 = vadd.f32 %v4456_v16, %v2615_v23 }
0x257a   : > { %3297 = vtanh.f32 %v2616_v62  ;;  %v2956_v51 = vmul.f32 -1.442695, %v2616_v62 }
0x257b   : > { %3299 = vtanh.f32 %v4497_v50 }
0x257c   : > { %3301 = vpow2.f32 %v2956_v51 }
0x2580   : > { %v3298_v43 = vpop.eup %3297 }
0x2581   : > { %2640 = vrot.lane.b32.xlu1 %v3298_v43, %s3534_s17  ;;  %v3300_v52 = vpop.eup %3299 }
0x2582   : > { %v3302_v1 = vpop.eup %3301 }
0x2583   : > { %v2621_v9 = vadd.f32 1.0, %v3302_v1 }
0x2585   : > { %3303 = vrcp.f32 %v2621_v9  ;;  %v2633_v46 = vand.u32 2147483648, %v2621_v9  ;;  %vm2627_vm15 = vweird.f32 %v2621_v9  ;;  %v2631_v0 = vand.u32 2147483647, %v2621_v9 }
0x2587   : > { %v2634_v20 = vor.u32 1.1754944e-38, %v2633_v46  ;;  %vm2632_vm1 = vcmp.eq.f32.partialorder %v2631_v0, 8.507059e+37 }
0x2589   : > { %2449 = vrot.lane.b32.xlu1 %v3300_v52, %s3535_s24 }
0x258b   : > { %v3304_v16 = vpop.eup %3303 }
0x258c   : > { %v2623_v45 = vmul.f32 %v3304_v16, %v2621_v9  ;;  %vm2628_vm11 = vweird.f32 %v3304_v16 }
0x258d   : > { %vm2629_vm0 = vmor %vm2627_vm15, %vm2628_vm11 }
0x258e   : > { %v2624_v41 = vsub.f32 1.0, %v2623_v45 }
0x2590   : > { %v2625_v17 = vmul.f32 %v3304_v16, %v2624_v41 }
0x2592   : > { %v2626_v42 = vadd.f32 %v3304_v16, %v2625_v17 }
0x2594   : > { %v2630_v2 = vsel %vm2629_vm0, %v3304_v16, %v2626_v42 }
0x2595   : > { %v2635_v44 = vsel %vm2632_vm1, %v2634_v20, %v2630_v2 }
0x2596   : > { %v2638_v37 = vmul.f32 %v2635_v44, %v4464_v49  ;;  %v3358_v49 = vld [vmem:[%s4574_s9] ss:$0 sm:$0xff] }
0x25f3   : > { %v2641_v60 = vpop.permute.xlu1 %2640 }
0x25f4   : > { %v2643_v36 = vmul.f32 %v2641_v60, %v2635_v44 }
0x25f6   : > { %2645 = vrot.lane.b32.xlu0 %v2643_v36, %s3535_s24 }
0x25fb   : > { %v2450_v48 = vpop.permute.xlu1 %2449 }
0x25fc   : > { %v2452_v32 = vmul.f32 %v2450_v48, %v2433_v25 }
0x25fe   : > { %2660 = vrot.lane.b32.xlu1 %v2452_v32, %s3537_s19 }
0x2668   : > { %v2646_v14 = vpop.permute.xlu0 %2645 }
0x2669   : > { %v2648_v26 = vadd.f32 %v2646_v14, %v2638_v37 }
0x266b   : > { %3305 = vtanh.f32 %v2648_v26 }
0x2670   : > { %v2661_v40 = vpop.permute.xlu1 %2660 }
0x2671   : > { %v3306_v19 = vpop.eup %3305 }
0x2672   : > { %2651 = vrot.lane.b32.xlu2 %v3306_v19, %s3535_s24 }
0x26cc   : > { %v2652_v10 = vpop.permute.xlu2 %2651 }
0x26cd   : > { %v2654_v53 = vmul.f32 %v2652_v10, %v2635_v44 }
0x26cf   : > { %2656 = vrot.lane.b32.xlu0 %v2654_v53, %s3536_s13 }
0x2741   : > { %v2657_v24 = vpop.permute.xlu0 %2656 }
0x2742   : > { %v2663_v56 = vsel %vm765_vm4, %v2657_v24, %v2661_v40 }
0x2743   : > { %2957 = vmatmul.msk.f32.vlgmr.msrb.gmra.mxu2 %vm566_vm5, %v2663_v56 }
0x27c6   : > { %v2684_v6 = vpop.f32.mrf.mxu2 }
0x27c7   : > { %v2685_v18 = vadd.f32 %v3358_v49, %v2684_v6 }
0x27c9   : > { %3307 = vtanh.f32 %v2685_v18  ;;  %v2958_v11 = vmul.f32 -1.442695, %v2685_v18 }
0x27ca   : > { %3309 = vtanh.f32 %v4014_v12 }
0x27cb   : > { %3311 = vtanh.f32 %v4327_v33 }
0x27cc   : > { %3313 = vtanh.f32 %v2452_v32 }
0x27cd   : > { %3315 = vpow2.f32 %v2958_v11 }
0x27cf   : > { %v3308_v22 = vpop.eup %3307 }
0x27d0   : > { %2709 = vrot.lane.b32.xlu2 %v3308_v22, %s3534_s17  ;;  %v3310_v38 = vpop.eup %3309 }
0x27d1   : > { %v3312_v57 = vpop.eup %3311 }
0x27d2   : > { %v3314_v55 = vpop.eup %3313 }
0x27d3   : > { %v3316_v21 = vpop.eup %3315 }
0x27d4   : > { %v2690_v28 = vadd.f32 1.0, %v3316_v21 }
0x27d6   : > { %3317 = vrcp.f32 %v2690_v28  ;;  %v2702_v33 = vand.u32 2147483648, %v2690_v28  ;;  %vm2696_vm4 = vweird.f32 %v2690_v28  ;;  %v2700_v15 = vand.u32 2147483647, %v2690_v28 }
0x27d7   : > { %3319 = vtanh.f32 %v4122_v54 }
0x27d8   : > { %829 = vrot.lane.b32.xlu2 %v3310_v38, %s3536_s13  ;;  %v2703_v27 = vor.u32 1.1754944e-38, %v2702_v33  ;;  %vm2701_vm3 = vcmp.eq.f32.partialorder %v2700_v15, 8.507059e+37  ;;  %3321 = vtanh.f32 %v4405_v34 }
0x27dc   : > { %v3318_v31 = vpop.eup %3317 }
0x27dd   : > { %v2692_v30 = vmul.f32 %v3318_v31, %v2690_v28  ;;  %vm2697_vm5 = vweird.f32 %v3318_v31  ;;  %v3320_v25 = vpop.eup %3319 }
0x27de   : > { %vm2698_vm2 = vmor %vm2696_vm4, %vm2697_vm5  ;;  %v3322_v54 = vpop.eup %3321 }
0x27df   : > { %v2693_v12 = vsub.f32 1.0, %v2692_v30 }
0x27e0   : > { %1642 = vrot.lane.b32.xlu2 %v3312_v57, %s3536_s13 }
0x27e1   : > { %v2694_v35 = vmul.f32 %v3318_v31, %v2693_v12 }
0x27e3   : > { %v2695_v58 = vadd.f32 %v3318_v31, %v2694_v35 }
0x27e5   : > { %v2699_v61 = vsel %vm2698_vm2, %v3318_v31, %v2695_v58 }
0x27e6   : > { %v2704_v8 = vsel %vm2701_vm3, %v2703_v27, %v2699_v61 }
0x27e7   : > { %v2707_v59 = vmul.f32 %v2704_v8, %v4497_v50 }
0x27e8   : > { %2455 = vrot.lane.b32.xlu2 %v3314_v55, %s3536_s13 }
0x282a   : > { %v2710_v63 = vpop.permute.xlu2 %2709 }
0x282b   : > { %v2712_v29 = vmul.f32 %v2710_v63, %v2704_v8 }
0x282d   : > { %2714 = vrot.lane.b32.xlu0 %v2712_v29, %s3535_s24 }
0x2832   : > { %v830_v13 = vpop.permute.xlu2 %829 }
0x2833   : > { %833 = vst.msk [vmem:[%s4524_s6] sm:$0x3] %vm832_vm7, %v830_v13 }
0x2835   : > { %1100 = vrot.lane.b32.xlu0 %v3320_v25, %s3536_s13 }
0x283a   : > { %v1643_v3 = vpop.permute.xlu2 %1642 }
0x283b   : > { %2923 = vst.msk [vmem:[%s4524_s6 + $0x6] sm:$0x3] %vm832_vm7, %v1643_v3 }
0x283d   : > { %1913 = vrot.lane.b32.xlu0 %v3322_v54, %s3536_s13 }
0x2842   : > { %v2456_v5 = vpop.permute.xlu2 %2455 }
0x2843   : > { %2950 = vst.msk [vmem:[%s4524_s6 + $0xc] sm:$0x3] %vm832_vm7, %v2456_v5 }
0x289f   : > { %v2715_v23 = vpop.permute.xlu0 %2714 }
0x28a0   : > { %v2717_v62 = vadd.f32 %v2715_v23, %v2707_v59 }
0x28a2   : > { %3323 = vtanh.f32 %v2717_v62 }
0x28a3   : > { %3325 = vtanh.f32 %v4233_v7 }
0x28a4   : > { %3327 = vtanh.f32 %v4469_v4 }
0x28a7   : > { %v1101_v39 = vpop.permute.xlu0 %1100 }
0x28a8   : > { %v3324_v47 = vpop.eup %3323  ;;  %2905 = vst.msk [vmem:[%s4524_s6 + $0x2] sm:$0x3] %vm832_vm7, %v1101_v39 }
0x28a9   : > { %2720 = vrot.lane.b32.xlu1 %v3324_v47, %s3535_s24  ;;  %v3326_v43 = vpop.eup %3325 }
0x28aa   : > { %v3328_v50 = vpop.eup %3327 }
0x28af   : > { %v1914_v34 = vpop.permute.xlu0 %1913 }
0x28b0   : > { %2932 = vst.msk [vmem:[%s4524_s6 + $0x8] sm:$0x3] %vm832_vm7, %v1914_v34 }
0x28b1   : > { %1371 = vrot.lane.b32.xlu1 %v3326_v43, %s3536_s13 }
0x28b9   : > { %2184 = vrot.lane.b32.xlu1 %v3328_v50, %s3536_s13 }
0x291b   : > { %v2721_v52 = vpop.permute.xlu1 %2720 }
0x291c   : > { %v2723_v51 = vmul.f32 %v2721_v52, %v2704_v8 }
0x291e   : > { %3329 = vtanh.f32 %v2723_v51 }
0x2923   : > { %v1372_v1 = vpop.permute.xlu1 %1371 }
0x2924   : > { %v3330_v9 = vpop.eup %3329  ;;  %2914 = vst.msk [vmem:[%s4524_s6 + $0x4] sm:$0x3] %vm832_vm7, %v1372_v1 }
0x2925   : > { %2726 = vrot.lane.b32.xlu0 %v3330_v9, %s3536_s13 }
0x292b   : > { %v2185_v7 = vpop.permute.xlu1 %2184 }
0x292c   : > { %2941 = vst.msk [vmem:[%s4524_s6 + $0xa] sm:$0x3] %vm832_vm7, %v2185_v7 }
0x2997   : > { %v2727_v16 = vpop.permute.xlu0 %2726 }
0x2998   : > { %2959 = vst.msk [vmem:[%s4524_s6 + $0xe] sm:$0x3] %vm832_vm7, %v2727_v16 }
0x2999 PF: > { %s4593_s16 = sld [smem:[#allocation14_spill]]  ;;  %s4596_s13 = smov %s3517_s14 }
0x299a   : > { %s4594_s20 = sld [smem:[#allocation13_spill]] }
0x299b   : > { %s4595_s15 = sld [smem:[#allocation15_spill]] }
0x299f   : > { %p24_p1 = scmp.ge.s32.totalorder %s4593_s16, 4  }
0x29a0   : > { %s4597_s14 = smov %s4594_s20 }
0x29a1   :  { %26 = sbr.rel (!%p24_p1) target bundleno = 9 (0x9), region = 137 }
0x29a6   :  { %2752 = vsyncpa [#allocation3], 1 }
0x29a7   :  { %2754 = vsyncpa [#allocation3 + $0x1], 1 }
0x29a8   :  { %2755 = vsyncpa [#allocation5], 1 }
0x29a9   :  { %2757 = vsyncpa [#allocation5 + $0x1], 1 }
0x29aa   :  { %2758 = vsyncpa [#allocation8], 1 }

</bundles_post_ra>
